<compile_context>
chip_gen: v7x
topology: tpu7x:2x2x1
jax: 0.10.0
libtpu: 0.0.40
codegen_flags: <defaults>
</compile_context>

<pallas_src>
import functools
import numpy as np
import jax
import jax.numpy as jnp
from jax.experimental import pallas as pl
from jax.experimental.pallas import tpu as pltpu

NEG = -1e30  # large finite negative instead of -inf (avoids inf-inf NaN paths)


def _vmem():
    return pl.BlockSpec(memory_space=pltpu.MemorySpace.VMEM)


def _smem():
    return pl.BlockSpec(memory_space=pltpu.MemorySpace.SMEM)


def _ln(x, g, b, eps=1e-5):
    mu = jnp.mean(x, axis=-1, keepdims=True)
    xc = x - mu
    var = jnp.mean(xc * xc, axis=-1, keepdims=True)
    return xc * jax.lax.rsqrt(var + eps) * g + b


# --------------------- K1: trajectory feature kernel ----------------------

def _traj_feat_kernel(obs_ref, act_ref, wo1, bo1, wo2, bo2, wa, ba, pos_ref,
                      o_ref, *, B):
    obs = obs_ref[...].astype(jnp.bfloat16)
    h = jnp.dot(obs, wo1[...], preferred_element_type=jnp.float32) + bo1[...]
    of = jnp.dot(h.astype(jnp.bfloat16), wo2[...],
                 preferred_element_type=jnp.float32) + bo2[...]
    af = jnp.dot(act_ref[...].astype(jnp.bfloat16), wa[...],
                 preferred_element_type=jnp.float32) + ba[...]
    feats = jnp.concatenate([of, af], axis=-1)            # (B*T, W)
    pos = jnp.concatenate([pos_ref[...]] * B, axis=0)     # (B*T, W)
    o_ref[...] = feats + pos


def trajectory_features(params, obs2d, act2d, B, T, W):
    return pl.pallas_call(
        functools.partial(_traj_feat_kernel, B=B),
        out_shape=jax.ShapeDtypeStruct((B * T, W), jnp.float32),
        in_specs=[_vmem()] * 9,
        out_specs=_vmem(),
    )(obs2d, act2d, params["obs_enc_w"], params["obs_enc_b"],
      params["obs_lin_w"], params["obs_lin_b"],
      params["act_w"], params["act_b"], params["traj_pos_emb"])


# ------------------ K2: fused residual attention block --------------------

def _resblock_kernel(x_ref, mask_ref, ln1g, ln1b, wqkv, bqkv, wo, bo,
                     ln2g, ln2b, wfc, bfc, wpr, bpr, o_ref, *, B, T, H, Dh):
    W = H * Dh
    x = x_ref[...]                                         # (B*T, W) f32

    # --- attention branch ---
    h = _ln(x, ln1g[...], ln1b[...])
    qkv = jnp.dot(h.astype(jnp.bfloat16), wqkv[...],
                  preferred_element_type=jnp.float32) + bqkv[...]  # (B*T, 3W)
    scale = 1.0 / float(np.sqrt(Dh))
    mask = mask_ref[...]                                   # (T, T) 0 / NEG

    head_outs = []
    for hh in range(H):                                    # static unroll
        q = qkv[:, hh * Dh:(hh + 1) * Dh].reshape(B, T, Dh).astype(jnp.bfloat16)
        k = qkv[:, W + hh * Dh:W + (hh + 1) * Dh].reshape(B, T, Dh).astype(jnp.bfloat16)
        v = qkv[:, 2 * W + hh * Dh:2 * W + (hh + 1) * Dh].reshape(B, T, Dh).astype(jnp.bfloat16)
        s = jnp.einsum('bqd,bkd->bqk', q, k,
                       preferred_element_type=jnp.float32) * scale
        s = s + mask[None, :, :]
        s = s - jnp.max(s, axis=-1, keepdims=True)
        p = jnp.exp(s)
        p = p * pl.reciprocal(jnp.sum(p, axis=-1, keepdims=True), approx=True)
        o = jnp.einsum('bqk,bkd->bqd', p.astype(jnp.bfloat16), v,
                       preferred_element_type=jnp.float32)          # (B, T, Dh)
        head_outs.append(o.reshape(B * T, Dh))
    attn = jnp.concatenate(head_outs, axis=-1)                       # (B*T, W)
    attn = jnp.dot(attn.astype(jnp.bfloat16), wo[...],
                   preferred_element_type=jnp.float32) + bo[...]
    x = x + attn

    # --- MLP branch ---
    h2 = _ln(x, ln2g[...], ln2b[...])
    f = jnp.dot(h2.astype(jnp.bfloat16), wfc[...],
                preferred_element_type=jnp.float32) + bfc[...]
    f = f * jax.nn.sigmoid(1.702 * f)                      # QuickGELU
    f = jnp.dot(f.astype(jnp.bfloat16), wpr[...],
                preferred_element_type=jnp.float32) + bpr[...]
    o_ref[...] = x + f


def resblock(x2d, blk, mask, B, T, heads):
    W = x2d.shape[-1]
    return pl.pallas_call(
        functools.partial(_resblock_kernel, B=B, T=T, H=heads, Dh=W // heads),
        out_shape=jax.ShapeDtypeStruct((B * T, W), jnp.float32),
        in_specs=[_vmem()] * 14,
        out_specs=_vmem(),
    )(x2d, mask, blk["ln1_g"], blk["ln1_b"], blk["in_proj_w"], blk["in_proj_b"],
      blk["out_proj_w"], blk["out_proj_b"], blk["ln2_g"], blk["ln2_b"],
      blk["fc_w"], blk["fc_b"], blk["proj_w"], blk["proj_b"])


# ----------------------------- K3: text head ------------------------------

def _text_head_kernel(emb_ref, m_ref, wp, bp, wt, o_ref, *, eps):
    emb = emb_ref[...]                                     # (B, L, 768)
    m = m_ref[...]                                         # (B, L)
    s = jnp.sum(emb * m[:, :, None], axis=1)               # (B, 768)
    denom = jnp.maximum(jnp.sum(m, axis=1, keepdims=True), 1.0)
    pooled = s / denom
    pooled = jnp.tanh(jnp.dot(pooled.astype(jnp.bfloat16), wp[...],
                              preferred_element_type=jnp.float32) + bp[...])
    tf = jnp.dot(pooled.astype(jnp.bfloat16), wt[...],
                 preferred_element_type=jnp.float32)       # (B, E)
    inv = jax.lax.rsqrt(jnp.sum(tf * tf, axis=-1, keepdims=True) + eps)
    o_ref[...] = tf * inv


def encode_text(params, input_ids, attention_mask):
    # TODO(synk): BertModel.from_pretrained(BERT_PATH) has no Pallas
    # equivalent; replaced with a deterministic synthetic encoder (token
    # embedding + masked mean pool + tanh pooler) producing the same (B, 768)
    # pooled output that feeds text_projection.
    emb = params["bert_tok_emb"][input_ids]                # (B, L, 768) gather
    m = attention_mask.astype(jnp.float32)
    B = emb.shape[0]
    E = params["text_projection"].shape[1]
    return pl.pallas_call(
        functools.partial(_text_head_kernel, eps=1e-12),
        out_shape=jax.ShapeDtypeStruct((B, E), jnp.float32),
        in_specs=[_vmem()] * 5,
        out_specs=_vmem(),
    )(emb, m, params["bert_pool_w"], params["bert_pool_b"],
      params["text_projection"])


# -------------------------- K4: trajectory head ----------------------------

def _traj_head_kernel(lens_ref, scal_ref, x_ref, lng, lnb, wproj, text_ref,
                      caw1h, caw1t, cab1, caw2, epw1, epb1, epw2,
                      logits_ref, loss_ref, *, B, T, E, eps):
    scale = scal_ref[0]                                    # exp(logit_scale)
    ca_b2 = scal_ref[1]
    ep_b2 = scal_ref[2]

    # final LN + trajectory projection + L2 normalize
    h = _ln(x_ref[...], lng[...], lnb[...])                # (B*T, W)
    y = jnp.dot(h.astype(jnp.bfloat16), wproj[...],
                preferred_element_type=jnp.float32)        # (B*T, E)
    y = y * jax.lax.rsqrt(jnp.sum(y * y, axis=-1, keepdims=True) + eps)
    y3 = y.reshape(B, T, E)
    text = text_ref[...]                                   # (B, E), normalized

    # cosine similarity + length mask
    cos = jnp.sum(y3 * text[:, None, :], axis=-1) * scale  # (B, T)
    t_idx = jax.lax.broadcasted_iota(jnp.int32, (B, T), 1)
    b_idx = jax.lax.broadcasted_iota(jnp.int32, (B, T), 0)
    lens_mat = jnp.zeros((B, T), jnp.int32)
    for b in range(B):                                     # B static, tiny
        lens_mat = jnp.where(b_idx == b, lens_ref[b], lens_mat)
    valid = t_idx < lens_mat
    cos_m = jnp.where(valid, cos, NEG)
    hidden = jax.nn.sigmoid(cos_m)[:, :, None] * y3        # (B, T, E)

    # episodic cost head: Linear-ReLU-Linear-Sigmoid on text embed
    e1 = jnp.maximum(jnp.dot(text.astype(jnp.bfloat16), epw1[...],
                             preferred_element_type=jnp.float32) + epb1[...],
                     0.0)                                  # (B, E)
    ep = jax.nn.sigmoid(jnp.sum(e1 * epw2[...], axis=-1, keepdims=True)
                        + ep_b2)                           # (B, 1)

    # cost assignment head on [hidden, text] rows (rowwise => full compute +
    # masked sum over t < length-1 is exact)
    c1 = jnp.dot(hidden.reshape(B * T, E).astype(jnp.bfloat16), caw1h[...],
                 preferred_element_type=jnp.float32).reshape(B, T, E)
    c1 = c1 + (jnp.dot(text.astype(jnp.bfloat16), caw1t[...],
                       preferred_element_type=jnp.float32)
               + cab1[...])[:, None, :]
    c1 = jnp.maximum(c1, 0.0)
    c = jax.nn.sigmoid(jnp.sum(c1 * caw2[...][None, :, :], axis=-1) + ca_b2)

    step_mask = (t_idx < (lens_mat - 1)).astype(jnp.float32)
    sum_cost = jnp.sum(c * step_mask, axis=-1, keepdims=True)        # (B, 1)
    # (MSE(a,b)+MSE(b,a))/2 == (a-b)^2 for scalars, then mean over batch
    ca_loss = jnp.sum((sum_cost - ep) ** 2, axis=0, keepdims=True) / B

    # CrossEntropyLoss(cos_sim, lengths - 1)
    mx = jnp.max(cos_m, axis=-1, keepdims=True)
    lse = jnp.log(jnp.sum(jnp.exp(cos_m - mx), axis=-1, keepdims=True)) + mx
    is_tgt = (t_idx == (lens_mat - 1)).astype(jnp.float32)
    tgt_logit = jnp.sum(cos_m * is_tgt, axis=-1, keepdims=True)      # (B, 1)
    ce = jnp.sum(lse - tgt_logit, axis=0, keepdims=True) / B
    loss_ref[...] = ca_loss + ce

    # last_embed gather + logits_per_trajectory
    last = jnp.sum(y3 * is_tgt[:, :, None], axis=1)                  # (B, E)
    logits_ref[...] = jax.lax.dot_general(
        last * scale, text, (((1,), (1,)), ((), ())),
        preferred_element_type=jnp.float32)                          # (B, B)


def trajectory_head(params, cfg, x2d, text_feat, lengths, logit_scale):
    B, E = text_feat.shape
    T = cfg["trajectory_length"]
    scalars = jnp.stack([logit_scale, params["ca_b2"], params["ep_b2"]])
    logits, loss = pl.pallas_call(
        functools.partial(_traj_head_kernel, B=B, T=T, E=E, eps=1e-12),
        out_shape=(jax.ShapeDtypeStruct((B, B), jnp.float32),
                   jax.ShapeDtypeStruct((1, 1), jnp.float32)),
        in_specs=[_smem(), _smem()] + [_vmem()] * 12,
        out_specs=(_vmem(), _vmem()),
    )(lengths.astype(jnp.int32), scalars, x2d,
      params["traj_ln_g"], params["traj_ln_b"], params["traj_proj"], text_feat,
      params["ca_w1_h"], params["ca_w1_t"], params["ca_b1"], params["ca_w2"],
      params["ep_w1"], params["ep_b1"], params["ep_w2"])
    return logits, loss[0, 0]


# ------------------------------- forward -----------------------------------

def ttct_forward(params, cfg, observations, actions, input_ids,
                 attention_mask, lengths):
    B = observations.shape[0]
    T = cfg["trajectory_length"]
    W = cfg["transformer_width"]

    obs2d = observations.reshape(B * T, -1)
    act2d = actions.reshape(B * T, -1)
    x = trajectory_features(params, obs2d, act2d, B, T, W)      # (B*T, W)

    for blk in params["blocks"]:
        x = resblock(x, blk, cfg["attn_mask"], B, T, cfg["heads"])

    text_features = encode_text(params, input_ids, attention_mask)  # (B, E)

    logit_scale = jnp.exp(params["logit_scale"])
    logits, loss = trajectory_head(params, cfg, x, text_features,
                                   lengths, logit_scale)
    return logits, loss


# ------------------------------ parameters ---------------------------------

def init_params(key, cfg):
    ks = iter(jax.random.split(key, 64))
    bf = jnp.bfloat16

    def nrm(shape, std=0.02, dtype=jnp.float32):
        return (std * jax.random.normal(next(ks), shape, jnp.float32)).astype(dtype)

    W, E, L, T = (cfg["transformer_width"], cfg["embed_dim"],
                  cfg["layers"], cfg["trajectory_length"])
    proj_std = (W ** -0.5) * ((2 * L) ** -0.5)
    attn_std = W ** -0.5
    fc_std = (2 * W) ** -0.5
    blocks = []
    for _ in range(L):
        blocks.append(dict(
            ln1_g=jnp.ones((1, W), jnp.float32), ln1_b=jnp.zeros((1, W), jnp.float32),
            in_proj_w=nrm((W, 3 * W), attn_std, bf),
            in_proj_b=jnp.zeros((1, 3 * W), jnp.float32),
            out_proj_w=nrm((W, W), proj_std, bf),
            out_proj_b=jnp.zeros((1, W), jnp.float32),
            ln2_g=jnp.ones((1, W), jnp.float32), ln2_b=jnp.zeros((1, W), jnp.float32),
            fc_w=nrm((W, 4 * W), fc_std, bf), fc_b=jnp.zeros((1, 4 * W), jnp.float32),
            proj_w=nrm((4 * W, W), proj_std, bf), proj_b=jnp.zeros((1, W), jnp.float32),
        ))
    return dict(
        act_w=nrm((cfg["act_dim"], 16), 0.02, bf),
        act_b=jnp.zeros((1, 16), jnp.float32),
        obs_enc_w=nrm((cfg["obs_dim"], cfg["obs_emb_dim"]), 0.02, bf),
        obs_enc_b=jnp.zeros((1, cfg["obs_emb_dim"]), jnp.float32),
        obs_lin_w=nrm((cfg["obs_emb_dim"], W - 16), 0.02, bf),
        obs_lin_b=jnp.zeros((1, W - 16), jnp.float32),
        traj_pos_emb=nrm((T, W), 0.01),
        blocks=blocks,
        traj_ln_g=jnp.ones((1, W), jnp.float32),
        traj_ln_b=jnp.zeros((1, W), jnp.float32),
        traj_proj=nrm((W, E), W ** -0.5, bf),
        text_projection=nrm((768, E), 768 ** -0.5, bf),
        logit_scale=jnp.array(np.log(1.0 / 0.07), jnp.float32),
        # cost_assignment_layer: first linear split into hidden/text halves
        ca_w1_h=nrm((E, E), 0.1, bf), ca_w1_t=nrm((E, E), 0.1, bf),
        ca_b1=jnp.zeros((1, E), jnp.float32),
        ca_w2=nrm((1, E), 0.1), ca_b2=jnp.zeros((), jnp.float32),
        ep_w1=nrm((E, E), 0.1, bf), ep_b1=jnp.zeros((1, E), jnp.float32),
        ep_w2=nrm((1, E), 0.1), ep_b2=jnp.zeros((), jnp.float32),
        bert_tok_emb=nrm((cfg["vocab_size"], 768)),
        bert_pool_w=nrm((768, 768), 768 ** -0.5, bf),
        bert_pool_b=jnp.zeros((1, 768), jnp.float32),
    )


# -------------------------------- driver -----------------------------------

if __name__ == "__main__":
    cfg = dict(embed_dim=32, act_dim=4, obs_dim=4 * 8 * 8, obs_emb_dim=64,
               trajectory_length=8, context_length=8, vocab_size=100,
               transformer_width=64, heads=4, layers=2)
    T = cfg["trajectory_length"]
    # build_trajectory_attention_mask: large-negative strictly above diagonal
    cfg["attn_mask"] = jnp.where(
        jnp.arange(T)[None, :] > jnp.arange(T)[:, None], NEG, 0.0
    ).astype(jnp.float32)

    key = jax.random.PRNGKey(0)
    kp, ko, ka, ki = jax.random.split(key, 4)
    params = init_params(kp, cfg)

    B = 2
    observations = jax.random.normal(ko, (B, T, 4, 8, 8), jnp.float32)  # NCHW/step
    actions = jax.random.normal(ka, (B, T, cfg["act_dim"]), jnp.float32)
    input_ids = jax.random.randint(ki, (B, cfg["context_length"]), 0,
                                   cfg["vocab_size"])
    attention_mask = jnp.ones((B, cfg["context_length"]), jnp.int32)
    lengths = jnp.array([5, 8], jnp.int32)

    fwd = jax.jit(lambda o, a, i, m, l: ttct_forward(params, cfg, o, a, i, m, l))
    logits, loss = fwd(observations, actions, input_ids, attention_mask, lengths)
    jax.block_until_ready((logits, loss))

    assert logits.shape == (B, B)
    assert loss.shape == ()
    assert bool(jnp.isfinite(logits).all()) and bool(jnp.isfinite(loss))
    print("KERNEL_OK")
</pallas_src>

<mosaic_0001>
module attributes {stable_mosaic.version = 11 : i64} {
  func.func @_traj_feat_kernel(%arg0: memref<16x256xf32, #tpu.memory_space<vmem>>, %arg1: memref<16x4xf32, #tpu.memory_space<vmem>>, %arg2: memref<256x64xbf16, #tpu.memory_space<vmem>>, %arg3: memref<1x64xf32, #tpu.memory_space<vmem>>, %arg4: memref<64x48xbf16, #tpu.memory_space<vmem>>, %arg5: memref<1x48xf32, #tpu.memory_space<vmem>>, %arg6: memref<4x16xbf16, #tpu.memory_space<vmem>>, %arg7: memref<1x16xf32, #tpu.memory_space<vmem>>, %arg8: memref<8x64xf32, #tpu.memory_space<vmem>>, %arg9: memref<16x64xf32, #tpu.memory_space<vmem>>) attributes {dimension_semantics = [], scalar_prefetch = 0 : i64, scratch_operands = 0 : i64, tpu.core_type = #tpu.core_type<tc>} {
    %c0 = arith.constant 0 : index
    %c0_0 = arith.constant 0 : index
    %0 = vector.load %arg0[%c0, %c0_0] : memref<16x256xf32, #tpu.memory_space<vmem>>, vector<16x256xf32>
    %1 = arith.truncf %0 : vector<16x256xf32> to vector<16x256xbf16>
    %c0_1 = arith.constant 0 : index
    %c0_2 = arith.constant 0 : index
    %2 = vector.load %arg2[%c0_1, %c0_2] : memref<256x64xbf16, #tpu.memory_space<vmem>>, vector<256x64xbf16>
    %cst = arith.constant dense<0.000000e+00> : vector<16x64xf32>
    %3 = tpu.matmul %1, %2, %cst {dimension_numbers = #tpu.dot_dimension_numbers<[1], [0], [0], [1], [0, 0, 1, 1], [], []>} : vector<16x256xbf16>, vector<256x64xbf16>, vector<16x64xf32> -> vector<16x64xf32>
    %c0_3 = arith.constant 0 : index
    %c0_4 = arith.constant 0 : index
    %4 = vector.load %arg3[%c0_3, %c0_4] : memref<1x64xf32, #tpu.memory_space<vmem>>, vector<1x64xf32>
    %5 = vector.broadcast %4 : vector<1x64xf32> to vector<16x64xf32>
    %6 = arith.addf %3, %5 : vector<16x64xf32>
    %7 = arith.truncf %6 : vector<16x64xf32> to vector<16x64xbf16>
    %c0_5 = arith.constant 0 : index
    %c0_6 = arith.constant 0 : index
    %8 = vector.load %arg4[%c0_5, %c0_6] : memref<64x48xbf16, #tpu.memory_space<vmem>>, vector<64x48xbf16>
    %cst_7 = arith.constant dense<0.000000e+00> : vector<16x48xf32>
    %9 = tpu.matmul %7, %8, %cst_7 {dimension_numbers = #tpu.dot_dimension_numbers<[1], [0], [0], [1], [0, 0, 1, 1], [], []>} : vector<16x64xbf16>, vector<64x48xbf16>, vector<16x48xf32> -> vector<16x48xf32>
    %c0_8 = arith.constant 0 : index
    %c0_9 = arith.constant 0 : index
    %10 = vector.load %arg5[%c0_8, %c0_9] : memref<1x48xf32, #tpu.memory_space<vmem>>, vector<1x48xf32>
    %11 = vector.broadcast %10 : vector<1x48xf32> to vector<16x48xf32>
    %12 = arith.addf %9, %11 : vector<16x48xf32>
    %c0_10 = arith.constant 0 : index
    %c0_11 = arith.constant 0 : index
    %13 = vector.load %arg1[%c0_10, %c0_11] : memref<16x4xf32, #tpu.memory_space<vmem>>, vector<16x4xf32>
    %14 = arith.truncf %13 : vector<16x4xf32> to vector<16x4xbf16>
    %c0_12 = arith.constant 0 : index
    %c0_13 = arith.constant 0 : index
    %15 = vector.load %arg6[%c0_12, %c0_13] : memref<4x16xbf16, #tpu.memory_space<vmem>>, vector<4x16xbf16>
    %cst_14 = arith.constant dense<0.000000e+00> : vector<16x16xf32>
    %16 = tpu.matmul %14, %15, %cst_14 {dimension_numbers = #tpu.dot_dimension_numbers<[1], [0], [0], [1], [0, 0, 1, 1], [], []>} : vector<16x4xbf16>, vector<4x16xbf16>, vector<16x16xf32> -> vector<16x16xf32>
    %c0_15 = arith.constant 0 : index
    %c0_16 = arith.constant 0 : index
    %17 = vector.load %arg7[%c0_15, %c0_16] : memref<1x16xf32, #tpu.memory_space<vmem>>, vector<1x16xf32>
    %18 = vector.broadcast %17 : vector<1x16xf32> to vector<16x16xf32>
    %19 = arith.addf %16, %18 : vector<16x16xf32>
    %20 = tpu.concatenate %12, %19 in 1 : vector<16x48xf32>, vector<16x16xf32> -> vector<16x64xf32>
    %c0_17 = arith.constant 0 : index
    %c0_18 = arith.constant 0 : index
    %21 = vector.load %arg8[%c0_17, %c0_18] : memref<8x64xf32, #tpu.memory_space<vmem>>, vector<8x64xf32>
    %22 = tpu.concatenate %21, %21 in 0 : vector<8x64xf32>, vector<8x64xf32> -> vector<16x64xf32>
    %23 = arith.addf %20, %22 : vector<16x64xf32>
    %c0_19 = arith.constant 0 : index
    %c0_20 = arith.constant 0 : index
    %24 = vector.load %arg9[%c0_19, %c0_20] : memref<16x64xf32, #tpu.memory_space<vmem>>, vector<16x64xf32>
    tpu.vector_store %arg9[%c0_19, %c0_20], %23 {strides = array<i32>} : memref<16x64xf32, #tpu.memory_space<vmem>>, vector<16x64xf32>,
    return
  }
}

module attributes {stable_mosaic.version = 11 : i64} {
  func.func @_resblock_kernel(%arg0: memref<16x64xf32, #tpu.memory_space<vmem>>, %arg1: memref<8x8xf32, #tpu.memory_space<vmem>>, %arg2: memref<1x64xf32, #tpu.memory_space<vmem>>, %arg3: memref<1x64xf32, #tpu.memory_space<vmem>>, %arg4: memref<64x192xbf16, #tpu.memory_space<vmem>>, %arg5: memref<1x192xf32, #tpu.memory_space<vmem>>, %arg6: memref<64x64xbf16, #tpu.memory_space<vmem>>, %arg7: memref<1x64xf32, #tpu.memory_space<vmem>>, %arg8: memref<1x64xf32, #tpu.memory_space<vmem>>, %arg9: memref<1x64xf32, #tpu.memory_space<vmem>>, %arg10: memref<64x256xbf16, #tpu.memory_space<vmem>>, %arg11: memref<1x256xf32, #tpu.memory_space<vmem>>, %arg12: memref<256x64xbf16, #tpu.memory_space<vmem>>, %arg13: memref<1x64xf32, #tpu.memory_space<vmem>>, %arg14: memref<16x64xf32, #tpu.memory_space<vmem>>) attributes {dimension_semantics = [], scalar_prefetch = 0 : i64, scratch_operands = 0 : i64, tpu.core_type = #tpu.core_type<tc>} {
    %c0 = arith.constant 0 : index
    %c0_0 = arith.constant 0 : index
    %0 = vector.load %arg0[%c0, %c0_0] : memref<16x64xf32, #tpu.memory_space<vmem>>, vector<16x64xf32>
    %c0_1 = arith.constant 0 : index
    %c0_2 = arith.constant 0 : index
    %1 = vector.load %arg2[%c0_1, %c0_2] : memref<1x64xf32, #tpu.memory_space<vmem>>, vector<1x64xf32>
    %c0_3 = arith.constant 0 : index
    %c0_4 = arith.constant 0 : index
    %2 = vector.load %arg3[%c0_3, %c0_4] : memref<1x64xf32, #tpu.memory_space<vmem>>, vector<1x64xf32>
    %cst = arith.constant dense<0.000000e+00> : vector<16xf32>
    %3 = vector.multi_reduction <add>, %0, %cst [1] : vector<16x64xf32> to vector<16xf32>
    %4 = vector.shape_cast %3 : vector<16xf32> to vector<16x1xf32>
    %cst_5 = arith.constant 6.400000e+01 : f32
    %5 = vector.broadcast %cst_5 : f32 to vector<16x1xf32>
    %6 = arith.divf %4, %5 : vector<16x1xf32>
    %7 = vector.broadcast %6 : vector<16x1xf32> to vector<16x64xf32>
    %8 = arith.subf %0, %7 : vector<16x64xf32>
    %9 = arith.mulf %8, %8 : vector<16x64xf32>
    %cst_6 = arith.constant dense<0.000000e+00> : vector<16xf32>
    %10 = vector.multi_reduction <add>, %9, %cst_6 [1] : vector<16x64xf32> to vector<16xf32>
    %11 = vector.shape_cast %10 : vector<16xf32> to vector<16x1xf32>
    %cst_7 = arith.constant 6.400000e+01 : f32
    %12 = vector.broadcast %cst_7 : f32 to vector<16x1xf32>
    %13 = arith.divf %11, %12 : vector<16x1xf32>
    %cst_8 = arith.constant 9.99999974E-6 : f32
    %14 = vector.broadcast %cst_8 : f32 to vector<16x1xf32>
    %15 = arith.addf %13, %14 : vector<16x1xf32>
    %16 = math.rsqrt %15 : vector<16x1xf32>
    %17 = vector.broadcast %16 : vector<16x1xf32> to vector<16x64xf32>
    %18 = arith.mulf %8, %17 : vector<16x64xf32>
    %19 = vector.broadcast %1 : vector<1x64xf32> to vector<16x64xf32>
    %20 = arith.mulf %18, %19 : vector<16x64xf32>
    %21 = vector.broadcast %2 : vector<1x64xf32> to vector<16x64xf32>
    %22 = arith.addf %20, %21 : vector<16x64xf32>
    %23 = arith.truncf %22 : vector<16x64xf32> to vector<16x64xbf16>
    %c0_9 = arith.constant 0 : index
    %c0_10 = arith.constant 0 : index
    %24 = vector.load %arg4[%c0_9, %c0_10] : memref<64x192xbf16, #tpu.memory_space<vmem>>, vector<64x192xbf16>
    %cst_11 = arith.constant dense<0.000000e+00> : vector<16x192xf32>
    %25 = tpu.matmul %23, %24, %cst_11 {dimension_numbers = #tpu.dot_dimension_numbers<[1], [0], [0], [1], [0, 0, 1, 1], [], []>} : vector<16x64xbf16>, vector<64x192xbf16>, vector<16x192xf32> -> vector<16x192xf32>
    %c0_12 = arith.constant 0 : index
    %c0_13 = arith.constant 0 : index
    %26 = vector.load %arg5[%c0_12, %c0_13] : memref<1x192xf32, #tpu.memory_space<vmem>>, vector<1x192xf32>
    %27 = vector.broadcast %26 : vector<1x192xf32> to vector<16x192xf32>
    %28 = arith.addf %25, %27 : vector<16x192xf32>
    %c0_14 = arith.constant 0 : index
    %c0_15 = arith.constant 0 : index
    %29 = vector.load %arg1[%c0_14, %c0_15] : memref<8x8xf32, #tpu.memory_space<vmem>>, vector<8x8xf32>
    %30 = vector.extract_strided_slice %28 {offsets = [0, 0], sizes = [16, 16], strides = [1, 1]} : vector<16x192xf32> to vector<16x16xf32>
    %31 = vector.shape_cast %30 : vector<16x16xf32> to vector<2x8x16xf32>
    %32 = arith.truncf %31 : vector<2x8x16xf32> to vector<2x8x16xbf16>
    %33 = vector.extract_strided_slice %28 {offsets = [0, 64], sizes = [16, 16], strides = [1, 1]} : vector<16x192xf32> to vector<16x16xf32>
    %34 = vector.shape_cast %33 : vector<16x16xf32> to vector<2x8x16xf32>
    %35 = arith.truncf %34 : vector<2x8x16xf32> to vector<2x8x16xbf16>
    %36 = vector.extract_strided_slice %28 {offsets = [0, 128], sizes = [16, 16], strides = [1, 1]} : vector<16x192xf32> to vector<16x16xf32>
    %37 = vector.shape_cast %36 : vector<16x16xf32> to vector<2x8x16xf32>
    %38 = arith.truncf %37 : vector<2x8x16xf32> to vector<2x8x16xbf16>
    "tpu.trace_start"() <{level = 10 : i32, message = "bqd,bkd->bqk"}> : () -> ()
    %cst_16 = arith.constant dense<0.000000e+00> : vector<2x8x8xf32>
    %39 = tpu.matmul %32, %35, %cst_16 {dimension_numbers = #tpu.dot_dimension_numbers<[2], [2], [1], [1], [0, 0, 0, 1, 1, 1], [0], [0]>} : vector<2x8x16xbf16>, vector<2x8x16xbf16>, vector<2x8x8xf32> -> vector<2x8x8xf32>
    "tpu.trace_stop"() : () -> ()
    %cst_17 = arith.constant 2.500000e-01 : f32
    %40 = vector.broadcast %cst_17 : f32 to vector<2x8x8xf32>
    %41 = arith.mulf %39, %40 : vector<2x8x8xf32>
    %42 = vector.shape_cast %29 : vector<8x8xf32> to vector<1x8x8xf32>
    %43 = vector.broadcast %42 : vector<1x8x8xf32> to vector<2x8x8xf32>
    %44 = arith.addf %41, %43 : vector<2x8x8xf32>
    %cst_18 = arith.constant dense<0xFF800000> : vector<2x8xf32>
    %45 = vector.multi_reduction <maximumf>, %44, %cst_18 [2] : vector<2x8x8xf32> to vector<2x8xf32>
    %46 = vector.shape_cast %45 : vector<2x8xf32> to vector<2x8x1xf32>
    %47 = vector.broadcast %46 : vector<2x8x1xf32> to vector<2x8x8xf32>
    %48 = arith.subf %44, %47 : vector<2x8x8xf32>
    %49 = math.exp %48 : vector<2x8x8xf32>
    %cst_19 = arith.constant dense<0.000000e+00> : vector<2x8xf32>
    %50 = vector.multi_reduction <add>, %49, %cst_19 [2] : vector<2x8x8xf32> to vector<2x8xf32>
    %51 = vector.shape_cast %50 : vector<2x8xf32> to vector<2x8x1xf32>
    %52 = tpu.reciprocal %51 {approx = true} : vector<2x8x1xf32> -> vector<2x8x1xf32>
    %53 = vector.broadcast %52 : vector<2x8x1xf32> to vector<2x8x8xf32>
    %54 = arith.mulf %49, %53 : vector<2x8x8xf32>
    %55 = arith.truncf %54 : vector<2x8x8xf32> to vector<2x8x8xbf16>
    "tpu.trace_start"() <{level = 10 : i32, message = "bqk,bkd->bqd"}> : () -> ()
    %cst_20 = arith.constant dense<0.000000e+00> : vector<2x8x16xf32>
    %56 = tpu.matmul %55, %38, %cst_20 {dimension_numbers = #tpu.dot_dimension_numbers<[2], [1], [1], [2], [0, 0, 0, 1, 1, 2], [0], [0]>} : vector<2x8x8xbf16>, vector<2x8x16xbf16>, vector<2x8x16xf32> -> vector<2x8x16xf32>
    "tpu.trace_stop"() : () -> ()
    %57 = vector.shape_cast %56 : vector<2x8x16xf32> to vector<16x16xf32>
    %58 = vector.extract_strided_slice %28 {offsets = [0, 16], sizes = [16, 16], strides = [1, 1]} : vector<16x192xf32> to vector<16x16xf32>
    %59 = vector.shape_cast %58 : vector<16x16xf32> to vector<2x8x16xf32>
    %60 = arith.truncf %59 : vector<2x8x16xf32> to vector<2x8x16xbf16>
    %61 = vector.extract_strided_slice %28 {offsets = [0, 80], sizes = [16, 16], strides = [1, 1]} : vector<16x192xf32> to vector<16x16xf32>
    %62 = vector.shape_cast %61 : vector<16x16xf32> to vector<2x8x16xf32>
    %63 = arith.truncf %62 : vector<2x8x16xf32> to vector<2x8x16xbf16>
    %64 = vector.extract_strided_slice %28 {offsets = [0, 144], sizes = [16, 16], strides = [1, 1]} : vector<16x192xf32> to vector<16x16xf32>
    %65 = vector.shape_cast %64 : vector<16x16xf32> to vector<2x8x16xf32>
    %66 = arith.truncf %65 : vector<2x8x16xf32> to vector<2x8x16xbf16>
    "tpu.trace_start"() <{level = 10 : i32, message = "bqd,bkd->bqk"}> : () -> ()
    %cst_21 = arith.constant dense<0.000000e+00> : vector<2x8x8xf32>
    %67 = tpu.matmul %60, %63, %cst_21 {dimension_numbers = #tpu.dot_dimension_numbers<[2], [2], [1], [1], [0, 0, 0, 1, 1, 1], [0], [0]>} : vector<2x8x16xbf16>, vector<2x8x16xbf16>, vector<2x8x8xf32> -> vector<2x8x8xf32>
    "tpu.trace_stop"() : () -> ()
    %cst_22 = arith.constant 2.500000e-01 : f32
    %68 = vector.broadcast %cst_22 : f32 to vector<2x8x8xf32>
    %69 = arith.mulf %67, %68 : vector<2x8x8xf32>
    %70 = vector.shape_cast %29 : vector<8x8xf32> to vector<1x8x8xf32>
    %71 = vector.broadcast %70 : vector<1x8x8xf32> to vector<2x8x8xf32>
    %72 = arith.addf %69, %71 : vector<2x8x8xf32>
    %cst_23 = arith.constant dense<0xFF800000> : vector<2x8xf32>
    %73 = vector.multi_reduction <maximumf>, %72, %cst_23 [2] : vector<2x8x8xf32> to vector<2x8xf32>
    %74 = vector.shape_cast %73 : vector<2x8xf32> to vector<2x8x1xf32>
    %75 = vector.broadcast %74 : vector<2x8x1xf32> to vector<2x8x8xf32>
    %76 = arith.subf %72, %75 : vector<2x8x8xf32>
    %77 = math.exp %76 : vector<2x8x8xf32>
    %cst_24 = arith.constant dense<0.000000e+00> : vector<2x8xf32>
    %78 = vector.multi_reduction <add>, %77, %cst_24 [2] : vector<2x8x8xf32> to vector<2x8xf32>
    %79 = vector.shape_cast %78 : vector<2x8xf32> to vector<2x8x1xf32>
    %80 = tpu.reciprocal %79 {approx = true} : vector<2x8x1xf32> -> vector<2x8x1xf32>
    %81 = vector.broadcast %80 : vector<2x8x1xf32> to vector<2x8x8xf32>
    %82 = arith.mulf %77, %81 : vector<2x8x8xf32>
    %83 = arith.truncf %82 : vector<2x8x8xf32> to vector<2x8x8xbf16>
    "tpu.trace_start"() <{level = 10 : i32, message = "bqk,bkd->bqd"}> : () -> ()
    %cst_25 = arith.constant dense<0.000000e+00> : vector<2x8x16xf32>
    %84 = tpu.matmul %83, %66, %cst_25 {dimension_numbers = #tpu.dot_dimension_numbers<[2], [1], [1], [2], [0, 0, 0, 1, 1, 2], [0], [0]>} : vector<2x8x8xbf16>, vector<2x8x16xbf16>, vector<2x8x16xf32> -> vector<2x8x16xf32>
    "tpu.trace_stop"() : () -> ()
    %85 = vector.shape_cast %84 : vector<2x8x16xf32> to vector<16x16xf32>
    %86 = vector.extract_strided_slice %28 {offsets = [0, 32], sizes = [16, 16], strides = [1, 1]} : vector<16x192xf32> to vector<16x16xf32>
    %87 = vector.shape_cast %86 : vector<16x16xf32> to vector<2x8x16xf32>
    %88 = arith.truncf %87 : vector<2x8x16xf32> to vector<2x8x16xbf16>
    %89 = vector.extract_strided_slice %28 {offsets = [0, 96], sizes = [16, 16], strides = [1, 1]} : vector<16x192xf32> to vector<16x16xf32>
    %90 = vector.shape_cast %89 : vector<16x16xf32> to vector<2x8x16xf32>
    %91 = arith.truncf %90 : vector<2x8x16xf32> to vector<2x8x16xbf16>
    %92 = vector.extract_strided_slice %28 {offsets = [0, 160], sizes = [16, 16], strides = [1, 1]} : vector<16x192xf32> to vector<16x16xf32>
    %93 = vector.shape_cast %92 : vector<16x16xf32> to vector<2x8x16xf32>
    %94 = arith.truncf %93 : vector<2x8x16xf32> to vector<2x8x16xbf16>
    "tpu.trace_start"() <{level = 10 : i32, message = "bqd,bkd->bqk"}> : () -> ()
    %cst_26 = arith.constant dense<0.000000e+00> : vector<2x8x8xf32>
    %95 = tpu.matmul %88, %91, %cst_26 {dimension_numbers = #tpu.dot_dimension_numbers<[2], [2], [1], [1], [0, 0, 0, 1, 1, 1], [0], [0]>} : vector<2x8x16xbf16>, vector<2x8x16xbf16>, vector<2x8x8xf32> -> vector<2x8x8xf32>
    "tpu.trace_stop"() : () -> ()
    %cst_27 = arith.constant 2.500000e-01 : f32
    %96 = vector.broadcast %cst_27 : f32 to vector<2x8x8xf32>
    %97 = arith.mulf %95, %96 : vector<2x8x8xf32>
    %98 = vector.shape_cast %29 : vector<8x8xf32> to vector<1x8x8xf32>
    %99 = vector.broadcast %98 : vector<1x8x8xf32> to vector<2x8x8xf32>
    %100 = arith.addf %97, %99 : vector<2x8x8xf32>
    %cst_28 = arith.constant dense<0xFF800000> : vector<2x8xf32>
    %101 = vector.multi_reduction <maximumf>, %100, %cst_28 [2] : vector<2x8x8xf32> to vector<2x8xf32>
    %102 = vector.shape_cast %101 : vector<2x8xf32> to vector<2x8x1xf32>
    %103 = vector.broadcast %102 : vector<2x8x1xf32> to vector<2x8x8xf32>
    %104 = arith.subf %100, %103 : vector<2x8x8xf32>
    %105 = math.exp %104 : vector<2x8x8xf32>
    %cst_29 = arith.constant dense<0.000000e+00> : vector<2x8xf32>
    %106 = vector.multi_reduction <add>, %105, %cst_29 [2] : vector<2x8x8xf32> to vector<2x8xf32>
    %107 = vector.shape_cast %106 : vector<2x8xf32> to vector<2x8x1xf32>
    %108 = tpu.reciprocal %107 {approx = true} : vector<2x8x1xf32> -> vector<2x8x1xf32>
    %109 = vector.broadcast %108 : vector<2x8x1xf32> to vector<2x8x8xf32>
    %110 = arith.mulf %105, %109 : vector<2x8x8xf32>
    %111 = arith.truncf %110 : vector<2x8x8xf32> to vector<2x8x8xbf16>
    "tpu.trace_start"() <{level = 10 : i32, message = "bqk,bkd->bqd"}> : () -> ()
    %cst_30 = arith.constant dense<0.000000e+00> : vector<2x8x16xf32>
    %112 = tpu.matmul %111, %94, %cst_30 {dimension_numbers = #tpu.dot_dimension_numbers<[2], [1], [1], [2], [0, 0, 0, 1, 1, 2], [0], [0]>} : vector<2x8x8xbf16>, vector<2x8x16xbf16>, vector<2x8x16xf32> -> vector<2x8x16xf32>
    "tpu.trace_stop"() : () -> ()
    %113 = vector.shape_cast %112 : vector<2x8x16xf32> to vector<16x16xf32>
    %114 = vector.extract_strided_slice %28 {offsets = [0, 48], sizes = [16, 16], strides = [1, 1]} : vector<16x192xf32> to vector<16x16xf32>
    %115 = vector.shape_cast %114 : vector<16x16xf32> to vector<2x8x16xf32>
    %116 = arith.truncf %115 : vector<2x8x16xf32> to vector<2x8x16xbf16>
    %117 = vector.extract_strided_slice %28 {offsets = [0, 112], sizes = [16, 16], strides = [1, 1]} : vector<16x192xf32> to vector<16x16xf32>
    %118 = vector.shape_cast %117 : vector<16x16xf32> to vector<2x8x16xf32>
    %119 = arith.truncf %118 : vector<2x8x16xf32> to vector<2x8x16xbf16>
    %120 = vector.extract_strided_slice %28 {offsets = [0, 176], sizes = [16, 16], strides = [1, 1]} : vector<16x192xf32> to vector<16x16xf32>
    %121 = vector.shape_cast %120 : vector<16x16xf32> to vector<2x8x16xf32>
    %122 = arith.truncf %121 : vector<2x8x16xf32> to vector<2x8x16xbf16>
    "tpu.trace_start"() <{level = 10 : i32, message = "bqd,bkd->bqk"}> : () -> ()
    %cst_31 = arith.constant dense<0.000000e+00> : vector<2x8x8xf32>
    %123 = tpu.matmul %116, %119, %cst_31 {dimension_numbers = #tpu.dot_dimension_numbers<[2], [2], [1], [1], [0, 0, 0, 1, 1, 1], [0], [0]>} : vector<2x8x16xbf16>, vector<2x8x16xbf16>, vector<2x8x8xf32> -> vector<2x8x8xf32>
    "tpu.trace_stop"() : () -> ()
    %cst_32 = arith.constant 2.500000e-01 : f32
    %124 = vector.broadcast %cst_32 : f32 to vector<2x8x8xf32>
    %125 = arith.mulf %123, %124 : vector<2x8x8xf32>
    %126 = vector.shape_cast %29 : vector<8x8xf32> to vector<1x8x8xf32>
    %127 = vector.broadcast %126 : vector<1x8x8xf32> to vector<2x8x8xf32>
    %128 = arith.addf %125, %127 : vector<2x8x8xf32>
    %cst_33 = arith.constant dense<0xFF800000> : vector<2x8xf32>
    %129 = vector.multi_reduction <maximumf>, %128, %cst_33 [2] : vector<2x8x8xf32> to vector<2x8xf32>
    %130 = vector.shape_cast %129 : vector<2x8xf32> to vector<2x8x1xf32>
    %131 = vector.broadcast %130 : vector<2x8x1xf32> to vector<2x8x8xf32>
    %132 = arith.subf %128, %131 : vector<2x8x8xf32>
    %133 = math.exp %132 : vector<2x8x8xf32>
    %cst_34 = arith.constant dense<0.000000e+00> : vector<2x8xf32>
    %134 = vector.multi_reduction <add>, %133, %cst_34 [2] : vector<2x8x8xf32> to vector<2x8xf32>
    %135 = vector.shape_cast %134 : vector<2x8xf32> to vector<2x8x1xf32>
    %136 = tpu.reciprocal %135 {approx = true} : vector<2x8x1xf32> -> vector<2x8x1xf32>
    %137 = vector.broadcast %136 : vector<2x8x1xf32> to vector<2x8x8xf32>
    %138 = arith.mulf %133, %137 : vector<2x8x8xf32>
    %139 = arith.truncf %138 : vector<2x8x8xf32> to vector<2x8x8xbf16>
    "tpu.trace_start"() <{level = 10 : i32, message = "bqk,bkd->bqd"}> : () -> ()
    %cst_35 = arith.constant dense<0.000000e+00> : vector<2x8x16xf32>
    %140 = tpu.matmul %139, %122, %cst_35 {dimension_numbers = #tpu.dot_dimension_numbers<[2], [1], [1], [2], [0, 0, 0, 1, 1, 2], [0], [0]>} : vector<2x8x8xbf16>, vector<2x8x16xbf16>, vector<2x8x16xf32> -> vector<2x8x16xf32>
    "tpu.trace_stop"() : () -> ()
    %141 = vector.shape_cast %140 : vector<2x8x16xf32> to vector<16x16xf32>
    %142 = tpu.concatenate %57, %85, %113, %141 in 1 : vector<16x16xf32>, vector<16x16xf32>, vector<16x16xf32>, vector<16x16xf32> -> vector<16x64xf32>
    %143 = arith.truncf %142 : vector<16x64xf32> to vector<16x64xbf16>
    %c0_36 = arith.constant 0 : index
    %c0_37 = arith.constant 0 : index
    %144 = vector.load %arg6[%c0_36, %c0_37] : memref<64x64xbf16, #tpu.memory_space<vmem>>, vector<64x64xbf16>
    %cst_38 = arith.constant dense<0.000000e+00> : vector<16x64xf32>
    %145 = tpu.matmul %143, %144, %cst_38 {dimension_numbers = #tpu.dot_dimension_numbers<[1], [0], [0], [1], [0, 0, 1, 1], [], []>} : vector<16x64xbf16>, vector<64x64xbf16>, vector<16x64xf32> -> vector<16x64xf32>
    %c0_39 = arith.constant 0 : index
    %c0_40 = arith.constant 0 : index
    %146 = vector.load %arg7[%c0_39, %c0_40] : memref<1x64xf32, #tpu.memory_space<vmem>>, vector<1x64xf32>
    %147 = vector.broadcast %146 : vector<1x64xf32> to vector<16x64xf32>
    %148 = arith.addf %145, %147 : vector<16x64xf32>
    %149 = arith.addf %0, %148 : vector<16x64xf32>
    %c0_41 = arith.constant 0 : index
    %c0_42 = arith.constant 0 : index
    %150 = vector.load %arg8[%c0_41, %c0_42] : memref<1x64xf32, #tpu.memory_space<vmem>>, vector<1x64xf32>
    %c0_43 = arith.constant 0 : index
    %c0_44 = arith.constant 0 : index
    %151 = vector.load %arg9[%c0_43, %c0_44] : memref<1x64xf32, #tpu.memory_space<vmem>>, vector<1x64xf32>
    %cst_45 = arith.constant dense<0.000000e+00> : vector<16xf32>
    %152 = vector.multi_reduction <add>, %149, %cst_45 [1] : vector<16x64xf32> to vector<16xf32>
    %153 = vector.shape_cast %152 : vector<16xf32> to vector<16x1xf32>
    %cst_46 = arith.constant 6.400000e+01 : f32
    %154 = vector.broadcast %cst_46 : f32 to vector<16x1xf32>
    %155 = arith.divf %153, %154 : vector<16x1xf32>
    %156 = vector.broadcast %155 : vector<16x1xf32> to vector<16x64xf32>
    %157 = arith.subf %149, %156 : vector<16x64xf32>
    %158 = arith.mulf %157, %157 : vector<16x64xf32>
    %cst_47 = arith.constant dense<0.000000e+00> : vector<16xf32>
    %159 = vector.multi_reduction <add>, %158, %cst_47 [1] : vector<16x64xf32> to vector<16xf32>
    %160 = vector.shape_cast %159 : vector<16xf32> to vector<16x1xf32>
    %cst_48 = arith.constant 6.400000e+01 : f32
    %161 = vector.broadcast %cst_48 : f32 to vector<16x1xf32>
    %162 = arith.divf %160, %161 : vector<16x1xf32>
    %cst_49 = arith.constant 9.99999974E-6 : f32
    %163 = vector.broadcast %cst_49 : f32 to vector<16x1xf32>
    %164 = arith.addf %162, %163 : vector<16x1xf32>
    %165 = math.rsqrt %164 : vector<16x1xf32>
    %166 = vector.broadcast %165 : vector<16x1xf32> to vector<16x64xf32>
    %167 = arith.mulf %157, %166 : vector<16x64xf32>
    %168 = vector.broadcast %150 : vector<1x64xf32> to vector<16x64xf32>
    %169 = arith.mulf %167, %168 : vector<16x64xf32>
    %170 = vector.broadcast %151 : vector<1x64xf32> to vector<16x64xf32>
    %171 = arith.addf %169, %170 : vector<16x64xf32>
    %172 = arith.truncf %171 : vector<16x64xf32> to vector<16x64xbf16>
    %c0_50 = arith.constant 0 : index
    %c0_51 = arith.constant 0 : index
    %173 = vector.load %arg10[%c0_50, %c0_51] : memref<64x256xbf16, #tpu.memory_space<vmem>>, vector<64x256xbf16>
    %cst_52 = arith.constant dense<0.000000e+00> : vector<16x256xf32>
    %174 = tpu.matmul %172, %173, %cst_52 {dimension_numbers = #tpu.dot_dimension_numbers<[1], [0], [0], [1], [0, 0, 1, 1], [], []>} : vector<16x64xbf16>, vector<64x256xbf16>, vector<16x256xf32> -> vector<16x256xf32>
    %c0_53 = arith.constant 0 : index
    %c0_54 = arith.constant 0 : index
    %175 = vector.load %arg11[%c0_53, %c0_54] : memref<1x256xf32, #tpu.memory_space<vmem>>, vector<1x256xf32>
    %176 = vector.broadcast %175 : vector<1x256xf32> to vector<16x256xf32>
    %177 = arith.addf %174, %176 : vector<16x256xf32>
    %cst_55 = arith.constant 1.702000e+00 : f32
    %178 = vector.broadcast %cst_55 : f32 to vector<16x256xf32>
    %179 = arith.mulf %178, %177 : vector<16x256xf32>
    %180 = arith.negf %179 : vector<16x256xf32>
    %181 = math.exp %180 : vector<16x256xf32>
    %cst_56 = arith.constant 1.000000e+00 : f32
    %182 = vector.broadcast %cst_56 : f32 to vector<16x256xf32>
    %183 = arith.addf %182, %181 : vector<16x256xf32>
    %184 = arith.divf %182, %183 : vector<16x256xf32>
    %185 = arith.mulf %177, %184 : vector<16x256xf32>
    %186 = arith.truncf %185 : vector<16x256xf32> to vector<16x256xbf16>
    %c0_57 = arith.constant 0 : index
    %c0_58 = arith.constant 0 : index
    %187 = vector.load %arg12[%c0_57, %c0_58] : memref<256x64xbf16, #tpu.memory_space<vmem>>, vector<256x64xbf16>
    %cst_59 = arith.constant dense<0.000000e+00> : vector<16x64xf32>
    %188 = tpu.matmul %186, %187, %cst_59 {dimension_numbers = #tpu.dot_dimension_numbers<[1], [0], [0], [1], [0, 0, 1, 1], [], []>} : vector<16x256xbf16>, vector<256x64xbf16>, vector<16x64xf32> -> vector<16x64xf32>
    %c0_60 = arith.constant 0 : index
    %c0_61 = arith.constant 0 : index
    %189 = vector.load %arg13[%c0_60, %c0_61] : memref<1x64xf32, #tpu.memory_space<vmem>>, vector<1x64xf32>
    %190 = vector.broadcast %189 : vector<1x64xf32> to vector<16x64xf32>
    %191 = arith.addf %188, %190 : vector<16x64xf32>
    %192 = arith.addf %149, %191 : vector<16x64xf32>
    %c0_62 = arith.constant 0 : index
    %c0_63 = arith.constant 0 : index
    %193 = vector.load %arg14[%c0_62, %c0_63] : memref<16x64xf32, #tpu.memory_space<vmem>>, vector<16x64xf32>
    tpu.vector_store %arg14[%c0_62, %c0_63], %192 {strides = array<i32>} : memref<16x64xf32, #tpu.memory_space<vmem>>, vector<16x64xf32>,
    return
  }
}

module attributes {stable_mosaic.version = 11 : i64} {
  func.func @_text_head_kernel(%arg0: memref<2x8x768xf32, #tpu.memory_space<vmem>>, %arg1: memref<2x8xf32, #tpu.memory_space<vmem>>, %arg2: memref<768x768xbf16, #tpu.memory_space<vmem>>, %arg3: memref<1x768xf32, #tpu.memory_space<vmem>>, %arg4: memref<768x32xbf16, #tpu.memory_space<vmem>>, %arg5: memref<2x32xf32, #tpu.memory_space<vmem>>) attributes {dimension_semantics = [], scalar_prefetch = 0 : i64, scratch_operands = 0 : i64, tpu.core_type = #tpu.core_type<tc>} {
    %c0 = arith.constant 0 : index
    %c0_0 = arith.constant 0 : index
    %c0_1 = arith.constant 0 : index
    %0 = vector.load %arg0[%c0, %c0_0, %c0_1] : memref<2x8x768xf32, #tpu.memory_space<vmem>>, vector<2x8x768xf32>
    %c0_2 = arith.constant 0 : index
    %c0_3 = arith.constant 0 : index
    %1 = vector.load %arg1[%c0_2, %c0_3] : memref<2x8xf32, #tpu.memory_space<vmem>>, vector<2x8xf32>
    %2 = vector.shape_cast %1 : vector<2x8xf32> to vector<2x8x1xf32>
    %3 = vector.broadcast %2 : vector<2x8x1xf32> to vector<2x8x768xf32>
    %4 = arith.mulf %0, %3 : vector<2x8x768xf32>
    %cst = arith.constant dense<0.000000e+00> : vector<2x768xf32>
    %5 = vector.multi_reduction <add>, %4, %cst [1] : vector<2x8x768xf32> to vector<2x768xf32>
    %cst_4 = arith.constant dense<0.000000e+00> : vector<2xf32>
    %6 = vector.multi_reduction <add>, %1, %cst_4 [1] : vector<2x8xf32> to vector<2xf32>
    %7 = vector.shape_cast %6 : vector<2xf32> to vector<2x1xf32>
    %cst_5 = arith.constant 1.000000e+00 : f32
    %8 = vector.broadcast %cst_5 : f32 to vector<2x1xf32>
    %9 = arith.maximumf %7, %8 : vector<2x1xf32>
    %10 = vector.broadcast %9 : vector<2x1xf32> to vector<2x768xf32>
    %11 = arith.divf %5, %10 : vector<2x768xf32>
    %12 = arith.truncf %11 : vector<2x768xf32> to vector<2x768xbf16>
    %c0_6 = arith.constant 0 : index
    %c0_7 = arith.constant 0 : index
    %13 = vector.load %arg2[%c0_6, %c0_7] : memref<768x768xbf16, #tpu.memory_space<vmem>>, vector<768x768xbf16>
    %cst_8 = arith.constant dense<0.000000e+00> : vector<2x768xf32>
    %14 = tpu.matmul %12, %13, %cst_8 {dimension_numbers = #tpu.dot_dimension_numbers<[1], [0], [0], [1], [0, 0, 1, 1], [], []>} : vector<2x768xbf16>, vector<768x768xbf16>, vector<2x768xf32> -> vector<2x768xf32>
    %c0_9 = arith.constant 0 : index
    %c0_10 = arith.constant 0 : index
    %15 = vector.load %arg3[%c0_9, %c0_10] : memref<1x768xf32, #tpu.memory_space<vmem>>, vector<1x768xf32>
    %16 = vector.broadcast %15 : vector<1x768xf32> to vector<2x768xf32>
    %17 = arith.addf %14, %16 : vector<2x768xf32>
    %18 = math.tanh %17 : vector<2x768xf32>
    %19 = arith.truncf %18 : vector<2x768xf32> to vector<2x768xbf16>
    %c0_11 = arith.constant 0 : index
    %c0_12 = arith.constant 0 : index
    %20 = vector.load %arg4[%c0_11, %c0_12] : memref<768x32xbf16, #tpu.memory_space<vmem>>, vector<768x32xbf16>
    %cst_13 = arith.constant dense<0.000000e+00> : vector<2x32xf32>
    %21 = tpu.matmul %19, %20, %cst_13 {dimension_numbers = #tpu.dot_dimension_numbers<[1], [0], [0], [1], [0, 0, 1, 1], [], []>} : vector<2x768xbf16>, vector<768x32xbf16>, vector<2x32xf32> -> vector<2x32xf32>
    %22 = arith.mulf %21, %21 : vector<2x32xf32>
    %cst_14 = arith.constant dense<0.000000e+00> : vector<2xf32>
    %23 = vector.multi_reduction <add>, %22, %cst_14 [1] : vector<2x32xf32> to vector<2xf32>
    %24 = vector.shape_cast %23 : vector<2xf32> to vector<2x1xf32>
    %cst_15 = arith.constant 9.99999996E-13 : f32
    %25 = vector.broadcast %cst_15 : f32 to vector<2x1xf32>
    %26 = arith.addf %24, %25 : vector<2x1xf32>
    %27 = math.rsqrt %26 : vector<2x1xf32>
    %28 = vector.broadcast %27 : vector<2x1xf32> to vector<2x32xf32>
    %29 = arith.mulf %21, %28 : vector<2x32xf32>
    %c0_16 = arith.constant 0 : index
    %c0_17 = arith.constant 0 : index
    %30 = vector.load %arg5[%c0_16, %c0_17] : memref<2x32xf32, #tpu.memory_space<vmem>>, vector<2x32xf32>
    tpu.vector_store %arg5[%c0_16, %c0_17], %29 {strides = array<i32>} : memref<2x32xf32, #tpu.memory_space<vmem>>, vector<2x32xf32>,
    return
  }
}

module attributes {stable_mosaic.version = 11 : i64} {
  func.func @_traj_head_kernel(%arg0: memref<2xi32, #tpu.memory_space<smem>>, %arg1: memref<3xf32, #tpu.memory_space<smem>>, %arg2: memref<16x64xf32, #tpu.memory_space<vmem>>, %arg3: memref<1x64xf32, #tpu.memory_space<vmem>>, %arg4: memref<1x64xf32, #tpu.memory_space<vmem>>, %arg5: memref<64x32xbf16, #tpu.memory_space<vmem>>, %arg6: memref<2x32xf32, #tpu.memory_space<vmem>>, %arg7: memref<32x32xbf16, #tpu.memory_space<vmem>>, %arg8: memref<32x32xbf16, #tpu.memory_space<vmem>>, %arg9: memref<1x32xf32, #tpu.memory_space<vmem>>, %arg10: memref<1x32xf32, #tpu.memory_space<vmem>>, %arg11: memref<32x32xbf16, #tpu.memory_space<vmem>>, %arg12: memref<1x32xf32, #tpu.memory_space<vmem>>, %arg13: memref<1x32xf32, #tpu.memory_space<vmem>>, %arg14: memref<2x2xf32, #tpu.memory_space<vmem>>, %arg15: memref<1x1xf32, #tpu.memory_space<vmem>>) attributes {dimension_semantics = [], scalar_prefetch = 0 : i64, scratch_operands = 0 : i64, tpu.core_type = #tpu.core_type<tc>} {
    %c0 = arith.constant 0 : index
    %0 = memref.load %arg1[%c0] : memref<3xf32, #tpu.memory_space<smem>>
    %c1 = arith.constant 1 : index
    %1 = memref.load %arg1[%c1] : memref<3xf32, #tpu.memory_space<smem>>
    %c2 = arith.constant 2 : index
    %2 = memref.load %arg1[%c2] : memref<3xf32, #tpu.memory_space<smem>>
    %c0_0 = arith.constant 0 : index
    %c0_1 = arith.constant 0 : index
    %3 = vector.load %arg2[%c0_0, %c0_1] : memref<16x64xf32, #tpu.memory_space<vmem>>, vector<16x64xf32>
    %c0_2 = arith.constant 0 : index
    %c0_3 = arith.constant 0 : index
    %4 = vector.load %arg3[%c0_2, %c0_3] : memref<1x64xf32, #tpu.memory_space<vmem>>, vector<1x64xf32>
    %c0_4 = arith.constant 0 : index
    %c0_5 = arith.constant 0 : index
    %5 = vector.load %arg4[%c0_4, %c0_5] : memref<1x64xf32, #tpu.memory_space<vmem>>, vector<1x64xf32>
    %cst = arith.constant dense<0.000000e+00> : vector<16xf32>
    %6 = vector.multi_reduction <add>, %3, %cst [1] : vector<16x64xf32> to vector<16xf32>
    %7 = vector.shape_cast %6 : vector<16xf32> to vector<16x1xf32>
    %cst_6 = arith.constant 6.400000e+01 : f32
    %8 = vector.broadcast %cst_6 : f32 to vector<16x1xf32>
    %9 = arith.divf %7, %8 : vector<16x1xf32>
    %10 = vector.broadcast %9 : vector<16x1xf32> to vector<16x64xf32>
    %11 = arith.subf %3, %10 : vector<16x64xf32>
    %12 = arith.mulf %11, %11 : vector<16x64xf32>
    %cst_7 = arith.constant dense<0.000000e+00> : vector<16xf32>
    %13 = vector.multi_reduction <add>, %12, %cst_7 [1] : vector<16x64xf32> to vector<16xf32>
    %14 = vector.shape_cast %13 : vector<16xf32> to vector<16x1xf32>
    %cst_8 = arith.constant 6.400000e+01 : f32
    %15 = vector.broadcast %cst_8 : f32 to vector<16x1xf32>
    %16 = arith.divf %14, %15 : vector<16x1xf32>
    %cst_9 = arith.constant 9.99999974E-6 : f32
    %17 = vector.broadcast %cst_9 : f32 to vector<16x1xf32>
    %18 = arith.addf %16, %17 : vector<16x1xf32>
    %19 = math.rsqrt %18 : vector<16x1xf32>
    %20 = vector.broadcast %19 : vector<16x1xf32> to vector<16x64xf32>
    %21 = arith.mulf %11, %20 : vector<16x64xf32>
    %22 = vector.broadcast %4 : vector<1x64xf32> to vector<16x64xf32>
    %23 = arith.mulf %21, %22 : vector<16x64xf32>
    %24 = vector.broadcast %5 : vector<1x64xf32> to vector<16x64xf32>
    %25 = arith.addf %23, %24 : vector<16x64xf32>
    %26 = arith.truncf %25 : vector<16x64xf32> to vector<16x64xbf16>
    %c0_10 = arith.constant 0 : index
    %c0_11 = arith.constant 0 : index
    %27 = vector.load %arg5[%c0_10, %c0_11] : memref<64x32xbf16, #tpu.memory_space<vmem>>, vector<64x32xbf16>
    %cst_12 = arith.constant dense<0.000000e+00> : vector<16x32xf32>
    %28 = tpu.matmul %26, %27, %cst_12 {dimension_numbers = #tpu.dot_dimension_numbers<[1], [0], [0], [1], [0, 0, 1, 1], [], []>} : vector<16x64xbf16>, vector<64x32xbf16>, vector<16x32xf32> -> vector<16x32xf32>
    %29 = arith.mulf %28, %28 : vector<16x32xf32>
    %cst_13 = arith.constant dense<0.000000e+00> : vector<16xf32>
    %30 = vector.multi_reduction <add>, %29, %cst_13 [1] : vector<16x32xf32> to vector<16xf32>
    %31 = vector.shape_cast %30 : vector<16xf32> to vector<16x1xf32>
    %cst_14 = arith.constant 9.99999996E-13 : f32
    %32 = vector.broadcast %cst_14 : f32 to vector<16x1xf32>
    %33 = arith.addf %31, %32 : vector<16x1xf32>
    %34 = math.rsqrt %33 : vector<16x1xf32>
    %35 = vector.broadcast %34 : vector<16x1xf32> to vector<16x32xf32>
    %36 = arith.mulf %28, %35 : vector<16x32xf32>
    %37 = vector.shape_cast %36 : vector<16x32xf32> to vector<2x8x32xf32>
    %c0_15 = arith.constant 0 : index
    %c0_16 = arith.constant 0 : index
    %38 = vector.load %arg6[%c0_15, %c0_16] : memref<2x32xf32, #tpu.memory_space<vmem>>, vector<2x32xf32>
    %39 = vector.shape_cast %38 : vector<2x32xf32> to vector<2x1x32xf32>
    %40 = vector.broadcast %39 : vector<2x1x32xf32> to vector<2x8x32xf32>
    %41 = arith.mulf %37, %40 : vector<2x8x32xf32>
    %cst_17 = arith.constant dense<0.000000e+00> : vector<2x8xf32>
    %42 = vector.multi_reduction <add>, %41, %cst_17 [2] : vector<2x8x32xf32> to vector<2x8xf32>
    %43 = vector.broadcast %0 : f32 to vector<2x8xf32>
    %44 = arith.mulf %42, %43 : vector<2x8xf32>
    %45 = tpu.iota {dimensions = array<i32: 1>} : vector<2x8xi32>
    %46 = tpu.iota {dimensions = array<i32: 0>} : vector<2x8xi32>
    %c0_i32 = arith.constant 0 : i32
    %47 = vector.broadcast %c0_i32 : i32 to vector<2x8xi32>
    %c0_i32_18 = arith.constant 0 : i32
    %48 = vector.broadcast %c0_i32_18 : i32 to vector<2x8xi32>
    %49 = arith.cmpi eq, %46, %48 : vector<2x8xi32>
    %c0_19 = arith.constant 0 : index
    %50 = memref.load %arg0[%c0_19] : memref<2xi32, #tpu.memory_space<smem>>
    %51 = vector.broadcast %50 : i32 to vector<2x8xi32>
    %52 = arith.select %49, %51, %47 : vector<2x8xi1>, vector<2x8xi32>
    %c1_i32 = arith.constant 1 : i32
    %53 = vector.broadcast %c1_i32 : i32 to vector<2x8xi32>
    %54 = arith.cmpi eq, %46, %53 : vector<2x8xi32>
    %c1_20 = arith.constant 1 : index
    %55 = memref.load %arg0[%c1_20] : memref<2xi32, #tpu.memory_space<smem>>
    %56 = vector.broadcast %55 : i32 to vector<2x8xi32>
    %57 = arith.select %54, %56, %52 : vector<2x8xi1>, vector<2x8xi32>
    %58 = arith.cmpi slt, %45, %57 : vector<2x8xi32>
    %cst_21 = arith.constant -1.000000e+30 : f32
    %59 = vector.broadcast %cst_21 : f32 to vector<2x8xf32>
    %60 = arith.select %58, %44, %59 : vector<2x8xi1>, vector<2x8xf32>
    %61 = arith.negf %60 : vector<2x8xf32>
    %62 = math.exp %61 : vector<2x8xf32>
    %cst_22 = arith.constant 1.000000e+00 : f32
    %63 = vector.broadcast %cst_22 : f32 to vector<2x8xf32>
    %64 = arith.addf %63, %62 : vector<2x8xf32>
    %65 = arith.divf %63, %64 : vector<2x8xf32>
    %66 = vector.shape_cast %65 : vector<2x8xf32> to vector<2x8x1xf32>
    %67 = vector.broadcast %66 : vector<2x8x1xf32> to vector<2x8x32xf32>
    %68 = arith.mulf %67, %37 : vector<2x8x32xf32>
    %69 = arith.truncf %38 : vector<2x32xf32> to vector<2x32xbf16>
    %c0_23 = arith.constant 0 : index
    %c0_24 = arith.constant 0 : index
    %70 = vector.load %arg11[%c0_23, %c0_24] : memref<32x32xbf16, #tpu.memory_space<vmem>>, vector<32x32xbf16>
    %cst_25 = arith.constant dense<0.000000e+00> : vector<2x32xf32>
    %71 = tpu.matmul %69, %70, %cst_25 {dimension_numbers = #tpu.dot_dimension_numbers<[1], [0], [0], [1], [0, 0, 1, 1], [], []>} : vector<2x32xbf16>, vector<32x32xbf16>, vector<2x32xf32> -> vector<2x32xf32>
    %c0_26 = arith.constant 0 : index
    %c0_27 = arith.constant 0 : index
    %72 = vector.load %arg12[%c0_26, %c0_27] : memref<1x32xf32, #tpu.memory_space<vmem>>, vector<1x32xf32>
    %73 = vector.broadcast %72 : vector<1x32xf32> to vector<2x32xf32>
    %74 = arith.addf %71, %73 : vector<2x32xf32>
    %cst_28 = arith.constant 0.000000e+00 : f32
    %75 = vector.broadcast %cst_28 : f32 to vector<2x32xf32>
    %76 = arith.maximumf %74, %75 : vector<2x32xf32>
    %c0_29 = arith.constant 0 : index
    %c0_30 = arith.constant 0 : index
    %77 = vector.load %arg13[%c0_29, %c0_30] : memref<1x32xf32, #tpu.memory_space<vmem>>, vector<1x32xf32>
    %78 = vector.broadcast %77 : vector<1x32xf32> to vector<2x32xf32>
    %79 = arith.mulf %76, %78 : vector<2x32xf32>
    %cst_31 = arith.constant dense<0.000000e+00> : vector<2xf32>
    %80 = vector.multi_reduction <add>, %79, %cst_31 [1] : vector<2x32xf32> to vector<2xf32>
    %81 = vector.shape_cast %80 : vector<2xf32> to vector<2x1xf32>
    %82 = vector.broadcast %2 : f32 to vector<2x1xf32>
    %83 = arith.addf %81, %82 : vector<2x1xf32>
    %84 = arith.negf %83 : vector<2x1xf32>
    %85 = math.exp %84 : vector<2x1xf32>
    %cst_32 = arith.constant 1.000000e+00 : f32
    %86 = vector.broadcast %cst_32 : f32 to vector<2x1xf32>
    %87 = arith.addf %86, %85 : vector<2x1xf32>
    %88 = arith.divf %86, %87 : vector<2x1xf32>
    %89 = vector.shape_cast %68 : vector<2x8x32xf32> to vector<16x32xf32>
    %90 = arith.truncf %89 : vector<16x32xf32> to vector<16x32xbf16>
    %c0_33 = arith.constant 0 : index
    %c0_34 = arith.constant 0 : index
    %91 = vector.load %arg7[%c0_33, %c0_34] : memref<32x32xbf16, #tpu.memory_space<vmem>>, vector<32x32xbf16>
    %cst_35 = arith.constant dense<0.000000e+00> : vector<16x32xf32>
    %92 = tpu.matmul %90, %91, %cst_35 {dimension_numbers = #tpu.dot_dimension_numbers<[1], [0], [0], [1], [0, 0, 1, 1], [], []>} : vector<16x32xbf16>, vector<32x32xbf16>, vector<16x32xf32> -> vector<16x32xf32>
    %93 = vector.shape_cast %92 : vector<16x32xf32> to vector<2x8x32xf32>
    %94 = arith.truncf %38 : vector<2x32xf32> to vector<2x32xbf16>
    %c0_36 = arith.constant 0 : index
    %c0_37 = arith.constant 0 : index
    %95 = vector.load %arg8[%c0_36, %c0_37] : memref<32x32xbf16, #tpu.memory_space<vmem>>, vector<32x32xbf16>
    %cst_38 = arith.constant dense<0.000000e+00> : vector<2x32xf32>
    %96 = tpu.matmul %94, %95, %cst_38 {dimension_numbers = #tpu.dot_dimension_numbers<[1], [0], [0], [1], [0, 0, 1, 1], [], []>} : vector<2x32xbf16>, vector<32x32xbf16>, vector<2x32xf32> -> vector<2x32xf32>
    %c0_39 = arith.constant 0 : index
    %c0_40 = arith.constant 0 : index
    %97 = vector.load %arg9[%c0_39, %c0_40] : memref<1x32xf32, #tpu.memory_space<vmem>>, vector<1x32xf32>
    %98 = vector.broadcast %97 : vector<1x32xf32> to vector<2x32xf32>
    %99 = arith.addf %96, %98 : vector<2x32xf32>
    %100 = vector.shape_cast %99 : vector<2x32xf32> to vector<2x1x32xf32>
    %101 = vector.broadcast %100 : vector<2x1x32xf32> to vector<2x8x32xf32>
    %102 = arith.addf %93, %101 : vector<2x8x32xf32>
    %cst_41 = arith.constant 0.000000e+00 : f32
    %103 = vector.broadcast %cst_41 : f32 to vector<2x8x32xf32>
    %104 = arith.maximumf %102, %103 : vector<2x8x32xf32>
    %c0_42 = arith.constant 0 : index
    %c0_43 = arith.constant 0 : index
    %105 = vector.load %arg10[%c0_42, %c0_43] : memref<1x32xf32, #tpu.memory_space<vmem>>, vector<1x32xf32>
    %106 = vector.shape_cast %105 : vector<1x32xf32> to vector<1x1x32xf32>
    %107 = vector.broadcast %106 : vector<1x1x32xf32> to vector<2x8x32xf32>
    %108 = arith.mulf %104, %107 : vector<2x8x32xf32>
    %cst_44 = arith.constant dense<0.000000e+00> : vector<2x8xf32>
    %109 = vector.multi_reduction <add>, %108, %cst_44 [2] : vector<2x8x32xf32> to vector<2x8xf32>
    %110 = vector.broadcast %1 : f32 to vector<2x8xf32>
    %111 = arith.addf %109, %110 : vector<2x8xf32>
    %112 = arith.negf %111 : vector<2x8xf32>
    %113 = math.exp %112 : vector<2x8xf32>
    %cst_45 = arith.constant 1.000000e+00 : f32
    %114 = vector.broadcast %cst_45 : f32 to vector<2x8xf32>
    %115 = arith.addf %114, %113 : vector<2x8xf32>
    %116 = arith.divf %114, %115 : vector<2x8xf32>
    %c1_i32_46 = arith.constant 1 : i32
    %117 = vector.broadcast %c1_i32_46 : i32 to vector<2x8xi32>
    %118 = arith.subi %57, %117 : vector<2x8xi32>
    %119 = arith.cmpi slt, %45, %118 : vector<2x8xi32>
    %120 = arith.extui %119 : vector<2x8xi1> to vector<2x8xi32>
    %121 = arith.sitofp %120 : vector<2x8xi32> to vector<2x8xf32>
    %122 = arith.mulf %116, %121 : vector<2x8xf32>
    %cst_47 = arith.constant dense<0.000000e+00> : vector<2xf32>
    %123 = vector.multi_reduction <add>, %122, %cst_47 [1] : vector<2x8xf32> to vector<2xf32>
    %124 = vector.shape_cast %123 : vector<2xf32> to vector<2x1xf32>
    %125 = arith.subf %124, %88 : vector<2x1xf32>
    %126 = arith.mulf %125, %125 : vector<2x1xf32>
    %cst_48 = arith.constant dense<0.000000e+00> : vector<1xf32>
    %127 = vector.multi_reduction <add>, %126, %cst_48 [0] : vector<2x1xf32> to vector<1xf32>
    %128 = vector.shape_cast %127 : vector<1xf32> to vector<1x1xf32>
    %cst_49 = arith.constant 2.000000e+00 : f32
    %129 = vector.broadcast %cst_49 : f32 to vector<1x1xf32>
    %130 = arith.divf %128, %129 : vector<1x1xf32>
    %cst_50 = arith.constant dense<0xFF800000> : vector<2xf32>
    %131 = vector.multi_reduction <maximumf>, %60, %cst_50 [1] : vector<2x8xf32> to vector<2xf32>
    %132 = vector.shape_cast %131 : vector<2xf32> to vector<2x1xf32>
    %133 = vector.broadcast %132 : vector<2x1xf32> to vector<2x8xf32>
    %134 = arith.subf %60, %133 : vector<2x8xf32>
    %135 = math.exp %134 : vector<2x8xf32>
    %cst_51 = arith.constant dense<0.000000e+00> : vector<2xf32>
    %136 = vector.multi_reduction <add>, %135, %cst_51 [1] : vector<2x8xf32> to vector<2xf32>
    %137 = vector.shape_cast %136 : vector<2xf32> to vector<2x1xf32>
    %138 = math.log %137 : vector<2x1xf32>
    %139 = arith.addf %138, %132 : vector<2x1xf32>
    %c1_i32_52 = arith.constant 1 : i32
    %140 = vector.broadcast %c1_i32_52 : i32 to vector<2x8xi32>
    %141 = arith.subi %57, %140 : vector<2x8xi32>
    %142 = arith.cmpi eq, %45, %141 : vector<2x8xi32>
    %143 = arith.extui %142 : vector<2x8xi1> to vector<2x8xi32>
    %144 = arith.sitofp %143 : vector<2x8xi32> to vector<2x8xf32>
    %145 = arith.mulf %60, %144 : vector<2x8xf32>
    %cst_53 = arith.constant dense<0.000000e+00> : vector<2xf32>
    %146 = vector.multi_reduction <add>, %145, %cst_53 [1] : vector<2x8xf32> to vector<2xf32>
    %147 = vector.shape_cast %146 : vector<2xf32> to vector<2x1xf32>
    %148 = arith.subf %139, %147 : vector<2x1xf32>
    %cst_54 = arith.constant dense<0.000000e+00> : vector<1xf32>
    %149 = vector.multi_reduction <add>, %148, %cst_54 [0] : vector<2x1xf32> to vector<1xf32>
    %150 = vector.shape_cast %149 : vector<1xf32> to vector<1x1xf32>
    %cst_55 = arith.constant 2.000000e+00 : f32
    %151 = vector.broadcast %cst_55 : f32 to vector<1x1xf32>
    %152 = arith.divf %150, %151 : vector<1x1xf32>
    %153 = arith.addf %130, %152 : vector<1x1xf32>
    %c0_56 = arith.constant 0 : index
    %c0_57 = arith.constant 0 : index
    %154 = vector.load %arg15[%c0_56, %c0_57] : memref<1x1xf32, #tpu.memory_space<vmem>>, vector<1x1xf32>
    tpu.vector_store %arg15[%c0_56, %c0_57], %153 {strides = array<i32>} : memref<1x1xf32, #tpu.memory_space<vmem>>, vector<1x1xf32>,
    %155 = vector.shape_cast %144 : vector<2x8xf32> to vector<2x8x1xf32>
    %156 = vector.broadcast %155 : vector<2x8x1xf32> to vector<2x8x32xf32>
    %157 = arith.mulf %37, %156 : vector<2x8x32xf32>
    %cst_58 = arith.constant dense<0.000000e+00> : vector<2x32xf32>
    %158 = vector.multi_reduction <add>, %157, %cst_58 [1] : vector<2x8x32xf32> to vector<2x32xf32>
    %159 = vector.broadcast %0 : f32 to vector<2x32xf32>
    %160 = arith.mulf %158, %159 : vector<2x32xf32>
    %cst_59 = arith.constant dense<0.000000e+00> : vector<2x2xf32>
    %161 = tpu.matmul %160, %38, %cst_59 {dimension_numbers = #tpu.dot_dimension_numbers<[1], [1], [0], [0], [0, 0, 1, 0], [], []>} : vector<2x32xf32>, vector<2x32xf32>, vector<2x2xf32> -> vector<2x2xf32>
    %c0_60 = arith.constant 0 : index
    %c0_61 = arith.constant 0 : index
    %162 = vector.load %arg14[%c0_60, %c0_61] : memref<2x2xf32, #tpu.memory_space<vmem>>, vector<2x2xf32>
    tpu.vector_store %arg14[%c0_60, %c0_61], %161 {strides = array<i32>} : memref<2x2xf32, #tpu.memory_space<vmem>>, vector<2x2xf32>,
    return
  }
}

</mosaic_0001>

<bundles_post_ra>
// kernel: _lambda_.5
= control target key start
LH: loop header
LB: loop body
LE: loop exit
PB: predicated region body
PF: predicated region fallthrough
CT: control target
= control target key end

     0   :  { %14 = vsyncpa [#allocation3], 0  ;;  %s788_s0 = inlined_call_operand.vmem [shape: f32[16,256], index: 0, kind: input, shape index: {}]   ;;  %s789_s1 = inlined_call_operand.vmem [shape: f32[16,4], index: 1, kind: input, shape index: {}]   ;;  %s790_s2 = inlined_call_operand.hbm [shape: bf16[256,64], index: 2, kind: input, shape index: {}]   ;;  %s791_s3 = inlined_call_operand.vmem [shape: f32[1,64], index: 3, kind: input, shape index: {}]   ;;  %s792_s4 = inlined_call_operand.hbm [shape: bf16[64,48], index: 4, kind: input, shape index: {}]   ;;  %s793_s5 = inlined_call_operand.vmem [shape: f32[1,48], index: 5, kind: input, shape index: {}]   ;;  %s794_s6 = inlined_call_operand.hbm [shape: bf16[4,16], index: 6, kind: input, shape index: {}]   ;;  %s795_s7 = inlined_call_operand.vmem [shape: f32[1,16], index: 7, kind: input, shape index: {}]   ;;  %s796_s8 = inlined_call_operand.hbm [shape: f32[8,64], index: 8, kind: input, shape index: {}]   ;;  %s797_s9 = inlined_call_operand.vmem [shape: f32[16,64], index: 9, kind: output, shape index: {}]  }
   0x1   :  { %15 = vsyncpa [#allocation5], 0 }
   0x2   :  { %16 = vsyncpa [#allocation8], 0  ;;  %s629_s30 = smov [#allocation4]   ;;  %s630_s11 = smov [#allocation2]  }
   0x3   :  { %s40_s10 = sshll.u32 %s629_s30, 4  ;;  %s26_s12 = sshll.u32 %s630_s11, 4  ;;  %s41_s10 = int_to_ptr.vmem [resolvable:$true] %s40_s10  ;;  %s688_s12 = int_to_ptr.vmem [resolvable:$true] %s26_s12 }
   0x4   :  { %s535_s15 = scalar_lea.hbm %s792_s4, 512 }
   0x5   :  { %p536_p0 = scmp.ne.s32.totalorder %s792_s4, %s535_s15  ;;  %p539_p1 = scmp.lt.u32.totalorder %s535_s15, %s792_s4 }
   0x7   :  { %p541_p2 = pnand %p539_p1, %p536_p0 }
   0x9   :  { %544 = shalt.err (!%p541_p2)
}
   0xa   :  { %s545_s20 = scalar_lea.vmem %s41_s10, 512  ;;  %p550_p4 = scmp.lt.s32.totalorder %s41_s10, %s41_s10 }
   0xb   :  { %p546_p3 = scmp.ne.s32.totalorder %s41_s10, %s545_s20  ;;  %p551_p5 = scmp.lt.s32.totalorder %s545_s20, %s545_s20 }
   0xd   :  { %p552_p6 = por %p551_p5, %p550_p4 }
   0xf   :  { %p553_p7 = pnand %p552_p6, %p546_p3 }
  0x11   :  { %556 = shalt.err (!%p553_p7)
}
  0x12   :  { %s631_s21 = smov 64   ;;  %s632_s22 = smov 4  }
  0x13   :  { %46 = dma.hbm_to_vmem [thread:$0]  %s792_s4, 512, %s41_s10, [#allocation5], %s631_s21, %s631_s21, %s632_s22  }
  0x14   :  { %s557_s27 = scalar_lea.hbm %s790_s2, 2048 }
  0x15   :  { %p558_p8 = scmp.ne.s32.totalorder %s790_s2, %s557_s27  ;;  %p561_p9 = scmp.lt.u32.totalorder %s557_s27, %s790_s2 }
  0x17   :  { %p563_p10 = pnand %p561_p9, %p558_p8 }
  0x19   :  { %566 = shalt.err (!%p563_p10)
}
  0x1a   :  { %s567_s13 = scalar_lea.vmem %s688_s12, 2048  ;;  %p572_p12 = scmp.lt.s32.totalorder %s688_s12, %s688_s12 }
  0x1b   :  { %p568_p11 = scmp.ne.s32.totalorder %s688_s12, %s567_s13  ;;  %p573_p13 = scmp.lt.s32.totalorder %s567_s13, %s567_s13 }
  0x1d   :  { %p574_p0 = por %p573_p13, %p572_p12 }
  0x1f   :  { %p575_p1 = pnand %p574_p0, %p568_p11 }
  0x21   :  { %578 = shalt.err (!%p575_p1)
}
  0x22   :  { %32 = dma.hbm_to_vmem [thread:$0]  %s790_s2, 2048, %s688_s12, [#allocation3], %s631_s21, %s631_s21, %s632_s22  }
  0x23   :  { %s633_s14 = smov [#allocation6]   ;;  %s634_s16 = smov [#allocation7]  }
  0x24   :  { %s55_s15 = sshll.u32 %s633_s14, 4  ;;  %s67_s17 = sshll.u32 %s634_s16, 4  ;;  %s56_s15 = int_to_ptr.vmem [resolvable:$true] %s55_s15  ;;  %s68_s17 = int_to_ptr.vmem [resolvable:$true] %s67_s17 }
  0x25   :  { %s579_s20 = scalar_lea.hbm %s794_s6, 32 }
  0x26   :  { %p580_p2 = scmp.ne.s32.totalorder %s794_s6, %s579_s20  ;;  %p583_p3 = scmp.lt.u32.totalorder %s579_s20, %s794_s6 }
  0x28   :  { %p585_p4 = pnand %p583_p3, %p580_p2 }
  0x2a   :  { %588 = shalt.err (!%p585_p4)
}
  0x2b   :  { %s589_s2 = scalar_lea.vmem %s56_s15, 32  ;;  %p594_p6 = scmp.lt.s32.totalorder %s56_s15, %s56_s15 }
  0x2c   :  { %p590_p5 = scmp.ne.s32.totalorder %s56_s15, %s589_s2  ;;  %p595_p7 = scmp.lt.s32.totalorder %s589_s2, %s589_s2 }
  0x2e   :  { %p596_p8 = por %p595_p7, %p594_p6 }
  0x30   :  { %p597_p9 = pnand %p596_p8, %p590_p5 }
  0x32   :  { %600 = shalt.err (!%p597_p9)
}
  0x33   :  { %58 = dma.hbm_to_vmem [thread:$0]  %s794_s6, 32, %s56_s15, [#allocation5]  }
  0x34   :  { %s601_s28 = scalar_lea.hbm %s796_s8, 128 }
  0x35   :  { %p602_p10 = scmp.ne.s32.totalorder %s796_s8, %s601_s28  ;;  %p605_p11 = scmp.lt.u32.totalorder %s601_s28, %s796_s8 }
  0x37   :  { %p607_p12 = pnand %p605_p11, %p602_p10 }
  0x39   :  { %610 = shalt.err (!%p607_p12)
}
  0x3a   :  { %s611_s4 = scalar_lea.vmem %s68_s17, 128  ;;  %p616_p0 = scmp.lt.s32.totalorder %s68_s17, %s68_s17 }
  0x3b   :  { %p612_p13 = scmp.ne.s32.totalorder %s68_s17, %s611_s4  ;;  %p617_p1 = scmp.lt.s32.totalorder %s611_s4, %s611_s4 }
  0x3d   :  { %p618_p2 = por %p617_p1, %p616_p0 }
  0x3f   :  { %p619_p3 = pnand %p618_p2, %p612_p13 }
  0x41   :  { %622 = shalt.err (!%p619_p3)
}
  0x42   :  { %70 = dma.hbm_to_vmem [thread:$0]  %s796_s8, 128, %s68_s17, [#allocation8]  }
  0x43   :  { %623 = dma.done.wait [#allocation3], 2048  }
  0x44   :  { %624 = vsyncadd [#allocation3], 4294965248 }
  0x45   :  { %625 = dma.done.wait [#allocation5], 544  }
  0x46   :  { %626 = vsyncadd [#allocation5], 4294966752 }
  0x47   :  { %627 = dma.done.wait [#allocation8], 128  }
  0x48   :  { %628 = vsyncadd [#allocation8], 4294967168  ;;  %v635_v0 = vmov 0.0   ;;  %v515_v1 = vld [vmem:[#allocation2 + $0x40] sm:$0xff]   ;;  %v517_v3 = vld [vmem:[#allocation2 + $0x48] sm:$0xff]   ;;  %vm636_vm0 = vmmov 0  }
  0x49   :  { %488 = vmatprep.subr.bf16.mxu1 %v635_v0  ;;  %v516_v2 = vld [vmem:[#allocation2] sm:$0xff]   ;;  %459 = vmatprep.subr.bf16.mxu0 %v515_v1  ;;  %v518_v4 = vld [vmem:[#allocation2 + $0x8] sm:$0xff]   ;;  %v519_v5 = vld [vmem:[#allocation2 + $0x50] sm:$0xff]   ;;  %vm366_vm1 = vcmask 1041408   ;;  %vm306_vm2 = vcmask 523264   ;;  %vm362_vm3 = vcmask 31744  }
  0x4a   :  { %460 = vmatpush3.bf16.msra.mxu0 %v516_v2  ;;  %v520_v6 = vld [vmem:[#allocation2 + $0x10] sm:$0xff]   ;;  %v521_v7 = vld [vmem:[#allocation2 + $0x58] sm:$0xff]   ;;  %v523_v9 = vld [vmem:[#allocation2 + $0x60] sm:$0xff]   ;;  %496 = vmatprep.mubr.msk.bf16.mxu1 %vm636_vm0, %v635_v0  ;;  %s637_s21 = smov 48   ;;  %vm419_vm4 = vcmask 392192  }
  0x4b   :  { %461 = vmatprep.subr.bf16.mxu0 %v517_v3  ;;  %v522_v8 = vld [vmem:[#allocation2 + $0x18] sm:$0xff]   ;;  %v524_v10 = vld [vmem:[#allocation2 + $0x20] sm:$0xff]   ;;  %v525_v11 = vld [vmem:[#allocation2 + $0x68] sm:$0xff]  }
  0x4c   :  { %v85_v12 = vld [vmem:[%s788_s0 + $0x8] sm:$0xff]  ;;  %v87_v13 = vld [vmem:[%s788_s0 + $0x18] sm:$0xff]  ;;  %v531_v16 = vld [vmem:[#allocation4] sm:$0xff]  }
  0x4d   :  { %v526_v14 = vld [vmem:[#allocation2 + $0x28] sm:$0xff]   ;;  %v89_v15 = vpack.c.bf16 %v87_v13, %v85_v12  ;;  %v527_v17 = vld [vmem:[#allocation2 + $0x70] sm:$0xff]   ;;  %489 = vmatpush3.bf16.msra.mxu1 %v531_v16  ;;  %v529_v20 = vld [vmem:[#allocation2 + $0x78] sm:$0xff]  }
  0x4e   :  { %462 = vmatpush3.bf16.msra.mxu0 %v518_v4  ;;  %v532_v18 = vld [vmem:[#allocation4 + $0x8] sm:$0xff]   ;;  %490 = vmatprep.subr.bf16.mxu1 %v635_v0  ;;  %v528_v19 = vld [vmem:[#allocation2 + $0x30] sm:$0xff]   ;;  %v530_v21 = vld [vmem:[#allocation2 + $0x38] sm:$0xff]  }
  0x4f   :  { %463 = vmatprep.subr.bf16.mxu0 %v519_v5  ;;  %257 = vmatprep.mubr.bf16.mxu0 %v89_v15  ;;  %v84_v22 = vld [vmem:[%s788_s0] sm:$0xff]  ;;  %v86_v23 = vld [vmem:[%s788_s0 + $0x10] sm:$0xff]  ;;  %v534_v26 = vld [vmem:[#allocation4 + $0x18] sm:$0xff]  }
  0x50   :  { %v88_v24 = vpack.c.bf16 %v86_v23, %v84_v22  ;;  %v533_v25 = vld [vmem:[#allocation4 + $0x10] sm:$0xff]   ;;  %v434_v31 = vld [vmem:[%s791_s3] ss:$0 sm:$0xff]  ;;  %v352_v40 = vld [vmem:[%s789_s1 + $0x8] sm:$0xff] }
  0x51   :  { %491 = vmatpush3.bf16.msra.mxu1 %v532_v18  ;;  %v354_v34 = vld [vmem:[#allocation6] sm:$0x3]  ;;  %v422_v55 = vld [vmem:[#allocation7] sm:$0xff] }
  0x52   :  { %464 = vmatpush3.bf16.msra.mxu0 %v520_v6  ;;  %492 = vmatprep.subr.bf16.mxu1 %v635_v0  ;;  %v368_v38 = vsel %vm366_vm1, %v354_v34, 0  ;;  %v351_v39 = vld [vmem:[%s789_s1] sm:$0xff] }
  0x53   :  { %465 = vmatprep.subr.bf16.mxu0 %v521_v7  ;;  %v353_v41 = vpack.c.bf16 %v352_v40, %v351_v39  ;;  %v457_v46 = vld [vmem:[%s795_s7] ss:$0 sm:$0xff] }
  0x54   :  { %v451_v53 = vld [vmem:[%s793_s5] ss:$0 sm:$0xff] }
  0x55   :  { %493 = vmatpush3.bf16.msra.mxu1 %v533_v25 }
  0x56   :  { %466 = vmatpush3.bf16.msra.mxu0 %v522_v8  ;;  %494 = vmatprep.subr.bf16.mxu1 %v635_v0 }
  0x57   :  { %467 = vmatprep.subr.bf16.mxu0 %v523_v9 }
  0x59   :  { %495 = vmatpush3.bf16.msra.mxu1 %v534_v26 }
  0x5a   :  { %468 = vmatpush3.bf16.msra.mxu0 %v524_v10  ;;  %500 = vmatprep.subr.bf16.mxu1 %v635_v0 }
  0x5b   :  { %469 = vmatprep.subr.bf16.mxu0 %v525_v11 }
  0x5e   :  { %470 = vmatpush3.bf16.msra.mxu0 %v526_v14 }
  0x5f   :  { %471 = vmatprep.subr.bf16.mxu0 %v527_v17 }
  0x62   :  { %472 = vmatpush3.bf16.msra.mxu0 %v528_v19 }
  0x63   :  { %473 = vmatprep.subr.bf16.mxu0 %v529_v20 }
  0x66   :  { %474 = vmatpush3.bf16.msra.mxu0 %v530_v21 }
  0x69   :  { %258 = vmatmul.mubr.bf16.vlgmr.msra.gmra.mrb[0].mxu0 %v88_v24 }
 0x13c   :  { %v475_v27 = vpop.f32.mrb[0].mxu0 }
 0x13d   :  { %v476_v28 = vpop.f32.mrb[1].mxu0 }
 0x13e   :  { %v477_v29 = vadd.f32 %v476_v28, %v475_v27  ;;  %v478_v30 = vpop.f32.mrb[2].mxu0 }
 0x13f   :  { %v479_v32 = vpop.f32.mrb[3].mxu0 }
 0x140   :  { %v480_v33 = vadd.f32 %v479_v32, %v478_v30  ;;  %v260_v35 = vadd.f32 %v477_v29, %v434_v31 }
 0x142   :  { %v263_v36 = vadd.f32 %v480_v33, %v434_v31 }
 0x144   :  { %v266_v37 = vpack.c.bf16 %v263_v36, %v260_v35 }
 0x146   :  { %497 = vmatmul.mubr.msk.bf16.vlgmr.msra.gmra.mrb[0].mxu1 %vm306_vm2, %v266_v37 }
 0x147   :  { %501 = vmatpush3.bf16.msra.mxu1 %v368_v38  ;;  %502 = vmatprep.mubr.msk.bf16.mxu1 %vm636_vm0, %v635_v0 }
 0x14e   :  { %503 = vmatmul.mubr.msk.bf16.vlgmr.msra.gmra.mrb[4].mxu1 %vm362_vm3, %v353_v41 }
 0x219   :  { %v344_v42 = vpop.f32.mrb[0].mxu1 }
 0x21a   :  { %v498_v43 = vpop.f32.mrb[1].mxu1  ;;  %v345_v54 = vadd.f32 %v451_v53, %v344_v42 }
 0x21b   :  { %v347_v44 = vpop.f32.mrb[2].mxu1 }
 0x21c   :  { %v499_v45 = vpop.f32.mrb[3].mxu1  ;;  %v348_v59 = vadd.f32 %v451_v53, %v347_v44 }
 0x221   :  { %v404_v47 = vpop.f32.mrb[4].mxu1 }
 0x222   :  { %v405_v48 = vadd.f32 %v457_v46, %v404_v47  ;;  %v504_v49 = vpop.f32.mrb[5].mxu1 }
 0x223   :  { %v407_v50 = vpop.f32.mrb[6].mxu1 }
 0x224   :  { %413 = vrot.lane.b32.xlu0 %v405_v48, %s637_s21  ;;  %v505_v51 = vpop.f32.mrb[7].mxu1  ;;  %v408_v52 = vadd.f32 %v457_v46, %v407_v50 }
 0x228   :  { %415 = vrot.lane.b32.xlu0 %v408_v52, %s637_s21 }
 0x296   :  { %v414_v56 = vpop.permute.xlu0 %413 }
 0x297   :  { %v420_v57 = vsel %vm419_vm4, %v345_v54, %v414_v56 }
 0x298   :  { %v423_v58 = vadd.f32 %v422_v55, %v420_v57 }
 0x29a   :  { %425 = vst.msk [vmem:[%s797_s9] sm:$0xff] %vm306_vm2, %v423_v58  ;;  %v416_v60 = vpop.permute.xlu0 %415 }
 0x29b   :  { %v421_v61 = vsel %vm419_vm4, %v348_v59, %v416_v60 }
 0x29c   :  { %v424_v62 = vadd.f32 %v422_v55, %v421_v61 }
 0x29e   :  { %426 = vst.msk [vmem:[%s797_s9 + $0x8] sm:$0xff] %vm306_vm2, %v424_v62 }
 0x29f   :  { %431 = vsyncpa [#allocation3], 1 }
 0x2a0   :  { %432 = vsyncpa [#allocation5], 1 }
 0x2a1   :  { %433 = vsyncpa [#allocation8], 1 }

// kernel: _lambda_.6
= control target key start
LH: loop header
LB: loop body
LE: loop exit
PB: predicated region body
PF: predicated region fallthrough
CT: control target
= control target key end

     0   :  { %19 = vsyncpa [#allocation3], 0  ;;  %s2508_s0 = inlined_call_operand.vmem [shape: f32[16,64], index: 0, kind: input, shape index: {}]   ;;  %s2509_s1 = inlined_call_operand.hbm [shape: f32[8,8], index: 1, kind: input, shape index: {}]   ;;  %s2510_s2 = inlined_call_operand.vmem [shape: f32[1,64], index: 2, kind: input, shape index: {}, may-alias: {2,8}]   ;;  %s2511_s3 = inlined_call_operand.vmem [shape: f32[1,64], index: 3, kind: input, shape index: {}, may-alias: {3,7,9,13}]   ;;  %s2512_s4 = inlined_call_operand.vmem [shape: bf16[64,192], index: 4, kind: input, shape index: {}]   ;;  %s2513_s5 = inlined_call_operand.vmem [shape: f32[1,192], index: 5, kind: input, shape index: {}]   ;;  %s2514_s6 = inlined_call_operand.hbm [shape: bf16[64,64], index: 6, kind: input, shape index: {}]   ;;  %s2515_s7 = inlined_call_operand.vmem [shape: f32[1,64], index: 7, kind: input, shape index: {}, may-alias: {3,7,9,13}]   ;;  %s2516_s8 = inlined_call_operand.vmem [shape: f32[1,64], index: 8, kind: input, shape index: {}, may-alias: {2,8}]   ;;  %s2517_s9 = inlined_call_operand.vmem [shape: f32[1,64], index: 9, kind: input, shape index: {}, may-alias: {3,7,9,13}]   ;;  %s2518_s10 = inlined_call_operand.vmem [shape: bf16[64,256], index: 10, kind: input, shape index: {}]   ;;  %s2519_s11 = inlined_call_operand.vmem [shape: f32[1,256], index: 11, kind: input, shape index: {}]   ;;  %s2520_s12 = inlined_call_operand.hbm [shape: bf16[256,64], index: 12, kind: input, shape index: {}]   ;;  %s2521_s13 = inlined_call_operand.vmem [shape: f32[1,64], index: 13, kind: input, shape index: {}, may-alias: {3,7,9,13}]   ;;  %s2522_s14 = inlined_call_operand.vmem [shape: f32[16,64], index: 14, kind: output, shape index: {}]  }
   0x1   :  { %20 = vsyncpa [#allocation5], 0  ;;  %s2062_s29 = smov [#allocation4]   ;;  %s1992_s17 = scalar_lea.hbm %s2514_s6, 512 }
   0x2   :  { %s46_s30 = sshll.u32 %s2062_s29, 4  ;;  %p1993_p0 = scmp.ne.s32.totalorder %s2514_s6, %s1992_s17  ;;  %s47_s30 = int_to_ptr.vmem [resolvable:$true] %s46_s30 }
   0x3   :  { %p1996_p1 = scmp.lt.u32.totalorder %s1992_s17, %s2514_s6 }
   0x5   :  { %p1998_p2 = pnand %p1996_p1, %p1993_p0 }
   0x7   :  { %2001 = shalt.err (!%p1998_p2)
}
   0x8   :  { %s2002_s22 = scalar_lea.vmem %s47_s30, 512  ;;  %p2007_p4 = scmp.lt.s32.totalorder %s47_s30, %s47_s30 }
   0x9   :  { %p2003_p3 = scmp.ne.s32.totalorder %s47_s30, %s2002_s22  ;;  %p2008_p5 = scmp.lt.s32.totalorder %s2002_s22, %s2002_s22 }
   0xb   :  { %p2009_p6 = por %p2008_p5, %p2007_p4 }
   0xd   :  { %p2010_p7 = pnand %p2009_p6, %p2003_p3 }
   0xf   :  { %2013 = shalt.err (!%p2010_p7)
}
  0x10   :  { %s2063_s23 = smov 64   ;;  %s2064_s24 = smov 4  }
  0x11   :  { %52 = dma.hbm_to_vmem [thread:$0]  %s2514_s6, 512, %s47_s30, [#allocation5], %s2063_s23, %s2063_s23, %s2064_s24  }
  0x12   :  { %s2065_s27 = smov [#allocation2]   ;;  %s2066_s29 = smov [#allocation6]  }
  0x13   :  { %s29_s28 = sshll.u32 %s2065_s27, 4  ;;  %s68_s15 = sshll.u32 %s2066_s29, 4  ;;  %s30_s28 = int_to_ptr.vmem [resolvable:$true] %s29_s28  ;;  %s69_s15 = int_to_ptr.vmem [resolvable:$true] %s68_s15 }
  0x14   :  { %s2014_s18 = scalar_lea.hbm %s2509_s1, 128 }
  0x15   :  { %p2015_p8 = scmp.ne.s32.totalorder %s2509_s1, %s2014_s18  ;;  %p2018_p9 = scmp.lt.u32.totalorder %s2014_s18, %s2509_s1 }
  0x17   :  { %p2020_p10 = pnand %p2018_p9, %p2015_p8 }
  0x19   :  { %2023 = shalt.err (!%p2020_p10)
}
  0x1a   :  { %s2024_s6 = scalar_lea.vmem %s30_s28, 128  ;;  %p2029_p12 = scmp.lt.s32.totalorder %s30_s28, %s30_s28 }
  0x1b   :  { %p2025_p11 = scmp.ne.s32.totalorder %s30_s28, %s2024_s6  ;;  %p2030_p13 = scmp.lt.s32.totalorder %s2024_s6, %s2024_s6 }
  0x1d   :  { %p2031_p0 = por %p2030_p13, %p2029_p12 }
  0x1f   :  { %p2032_p1 = pnand %p2031_p0, %p2025_p11 }
  0x21   :  { %2035 = shalt.err (!%p2032_p1)
}
  0x22   :  { %32 = dma.hbm_to_vmem [thread:$0]  %s2509_s1, 128, %s30_s28, [#allocation3]  }
  0x23   :  { %s2036_s29 = scalar_lea.hbm %s2520_s12, 2048 }
  0x24   :  { %p2037_p2 = scmp.ne.s32.totalorder %s2520_s12, %s2036_s29  ;;  %p2040_p3 = scmp.lt.u32.totalorder %s2036_s29, %s2520_s12 }
  0x26   :  { %p2042_p4 = pnand %p2040_p3, %p2037_p2 }
  0x28   :  { %2045 = shalt.err (!%p2042_p4)
}
  0x29   :  { %s2046_s20 = scalar_lea.vmem %s69_s15, 2048  ;;  %p2051_p6 = scmp.lt.s32.totalorder %s69_s15, %s69_s15 }
  0x2a   :  { %p2047_p5 = scmp.ne.s32.totalorder %s69_s15, %s2046_s20  ;;  %p2052_p7 = scmp.lt.s32.totalorder %s2046_s20, %s2046_s20 }
  0x2c   :  { %p2053_p8 = por %p2052_p7, %p2051_p6 }
  0x2e   :  { %p2054_p9 = pnand %p2053_p8, %p2047_p5 }
  0x30   :  { %2057 = shalt.err (!%p2054_p9)
}
  0x31   :  { %74 = dma.hbm_to_vmem [thread:$0]  %s2520_s12, 2048, %s69_s15, [#allocation5], %s2063_s23, %s2063_s23, %s2064_s24  }
  0x32   :  { %2058 = dma.done.wait [#allocation3], 128  }
  0x33   :  { %2059 = vsyncadd [#allocation3], 4294967168 }
  0x34   :  { %2060 = dma.done.wait [#allocation5], 2560  }
  0x35   :  { %2061 = vsyncadd [#allocation5], 4294964736  ;;  %vm91_vm0 = vcmask 523264   ;;  %v2196_v0 = vld [vmem:[%s2508_s0] sm:$0xff]  ;;  %v2201_v1 = vld [vmem:[%s2508_s0 + $0x8] sm:$0xff]  ;;  %v2067_v22 = vmov 0   ;;  %v146_v41 = vlaneseq }
  0x36   :  { %v92_v2 = vsel %vm91_vm0, %v2196_v0, 0.0  ;;  %v95_v3 = vsel %vm91_vm0, %v2201_v1, 0.0  ;;  %v1892_v14 = vld [vmem:[%s2512_s4 + $0x4] ss:$8 sps:$4 sm:$0xff]   ;;  %v1894_v15 = vld [vmem:[%s2512_s4] ss:$8 sps:$4 sm:$0xff]   ;;  %231 = vmatprep.mubr.bf16.mxu1 %v2067_v22 }
  0x37   :  { %93 = vadd.xlane.f32.xlu0 %v92_v2  ;;  %199 = vmatprep.subr.bf16.mxu1 %v1892_v14  ;;  %v1895_v16 = vld [vmem:[%s2512_s4 + $0x14] ss:$8 sps:$4 sm:$0xff]   ;;  %v1897_v17 = vld [vmem:[%s2512_s4 + $0x10] ss:$8 sps:$4 sm:$0xff]   ;;  %v1898_v18 = vld [vmem:[%s2512_s4 + $0x24] ss:$8 sps:$4 sm:$0xff]  }
  0x38   :  { %200 = vmatpush1.bf16.msra.mxu1 %v1894_v15  ;;  %v1900_v19 = vld [vmem:[%s2512_s4 + $0x20] ss:$8 sps:$4 sm:$0xff]   ;;  %v1901_v20 = vld [vmem:[%s2512_s4 + $0x34] ss:$8 sps:$4 sm:$0xff]   ;;  %v1903_v21 = vld [vmem:[%s2512_s4 + $0x30] ss:$8 sps:$4 sm:$0xff]  }
  0x39   :  { %201 = vmatprep.subr.bf16.mxu1 %v1895_v16  ;;  %v1631_v31 = vld [vmem:[%s2510_s2] ss:$0 sm:$0xff]  ;;  %v2068_v40 = vmov 0.0   ;;  %v2245_v42 = vshrl.u32 %v146_v41, 7  ;;  %vm2069_vm1 = vmmov 0   ;;  %vm378_vm2 = vcmask 1043456  }
  0x3a   :  { %v1632_v35 = vld [vmem:[%s2511_s3] ss:$0 sm:$0xff]  ;;  %1767 = vmatprep.subr.bf16.mxu0 %v2068_v40  ;;  %1769 = vmatprep.mubr.msk.bf16.mxu0 %vm2069_vm1, %v2068_v40  ;;  %vm250_vm3 = vcmask 130048   ;;  %vm350_vm4 = vcmask 64512   ;;  %s2070_s3 = smov 48   ;;  %s2073_s12 = smov 96  }
  0x3b   :  { %96 = vadd.xlane.f32.xlu0 %v95_v3  ;;  %v148_v43 = vsub.s32 0, %v2245_v42  ;;  %v144_v44 = vld [vmem:[%s2513_s5] sm:$0x3]  ;;  %v152_v45 = vsub.s32 1, %v2245_v42  ;;  %s2071_s5 = smov 112   ;;  %s2074_s24 = smov 16  }
  0x3c   :  { %202 = vmatpush1.bf16.msra.mxu1 %v1897_v17  ;;  %s2075_s15 = smov 80   ;;  %vm1168_vm5 = vcmask 261120   ;;  %vm1171_vm6 = vcmask 392192  }
  0x3d   :  { %203 = vmatprep.subr.bf16.mxu1 %v1898_v18  ;;  %v149_v46 = vrot.slane %v144_v44, %v148_v43  ;;  %v153_v47 = vrot.slane %v144_v44, %v152_v45 }
  0x40   :  { %204 = vmatpush1.bf16.msra.mxu1 %v1900_v19 }
  0x41   :  { %205 = vmatprep.subr.bf16.mxu1 %v1901_v20 }
  0x44   :  { %206 = vmatpush1.bf16.msra.mxu1 %v1903_v21 }
  0x45   :  { %1755 = vmatprep.subr.bf16.mxu1 %v2068_v40 }
  0xc4   :  { %v94_v4 = vpop.xlane.xlu0 %93 }
  0xc5   :  { %v99_v5 = vmul.f32 0.015625, %v94_v4 }
  0xc7   :  { %v101_v6 = vsub.f32 %v2196_v0, %v99_v5  ;;  %v2290_v5 = vld [vmem:[#allocation2] sm:$0xff] }
  0xc8   :  { %v97_v7 = vpop.xlane.xlu0 %96 }
  0xc9   :  { %v100_v8 = vmul.f32 0.015625, %v97_v7  ;;  %v103_v9 = vmul.f32 %v101_v6, %v101_v6 }
  0xcb   :  { %v102_v10 = vsub.f32 %v2201_v1, %v100_v8  ;;  %v105_v11 = vsel %vm91_vm0, %v103_v9, 0.0 }
  0xcc   :  { %106 = vadd.xlane.f32.xlu1 %v105_v11 }
  0xcd   :  { %v104_v12 = vmul.f32 %v102_v10, %v102_v10 }
  0xcf   :  { %v108_v13 = vsel %vm91_vm0, %v104_v12, 0.0 }
  0xd0   :  { %109 = vadd.xlane.f32.xlu1 %v108_v13 }
 0x159   :  { %v107_v23 = vpop.xlane.xlu1 %106 }
 0x15a   :  { %v111_v24 = vmul.f32 0.015625, %v107_v23 }
 0x15c   :  { %v113_v25 = vadd.f32 1e-05, %v111_v24 }
 0x15d   :  { %v110_v26 = vpop.xlane.xlu1 %109 }
 0x15e   :  { %1936 = vrsqrt.f32 %v113_v25  ;;  %v112_v27 = vmul.f32 0.015625, %v110_v26 }
 0x160   :  { %v114_v28 = vadd.f32 1e-05, %v112_v27 }
 0x162   :  { %1938 = vrsqrt.f32 %v114_v28 }
 0x168   :  { %v1937_v29 = vpop.eup %1936 }
 0x169   :  { %v117_v30 = vmul.f32 %v1937_v29, %v101_v6 }
 0x16b   :  { %v125_v34 = vmul.f32 %v1631_v31, %v117_v30 }
 0x16c   :  { %v1939_v32 = vpop.eup %1938 }
 0x16d   :  { %v118_v33 = vmul.f32 %v1939_v32, %v102_v10  ;;  %v133_v37 = vadd.f32 %v1632_v35, %v125_v34 }
 0x16f   :  { %v126_v36 = vmul.f32 %v1631_v31, %v118_v33 }
 0x171   :  { %v134_v38 = vadd.f32 %v1632_v35, %v126_v36 }
 0x173   :  { %v135_v39 = vpack.c.bf16 %v134_v38, %v133_v37 }
 0x175   :  { %1641 = vmatmul.mubr.msk.bf16.vlgmr.msra.gmra.mrb[0].mxu1 %vm91_vm0, %v135_v39 }
 0x176   :  { %1757 = vmatprep.mubr.msk.bf16.mxu1 %vm2069_vm1, %v2068_v40 }
 0x248   :  { %v233_v48 = vpop.f32.mrb[0].mxu1 }
 0x249   :  { %v234_v49 = vadd.f32 %v233_v48, %v149_v46  ;;  %v235_v50 = vpop.f32.mrb[1].mxu1 }
 0x24a   :  { %v236_v51 = vadd.f32 %v235_v50, %v153_v47  ;;  %v237_v52 = vpop.f32.mrb[2].mxu1 }
 0x24b   :  { %v2260_v53 = vpack.c.bf16 %v234_v49, %v234_v49  ;;  %v238_v54 = vadd.f32 %v237_v52, %v149_v46  ;;  %v239_v55 = vpop.f32.mrb[3].mxu1 }
 0x24c   :  { %v2262_v56 = vpack.c.bf16 %v236_v51, %v236_v51  ;;  %v240_v57 = vadd.f32 %v239_v55, %v153_v47 }
 0x24d   :  { %v2264_v58 = vpack.c.bf16 %v238_v54, %v238_v54  ;;  %248 = vrot.lane.b32.xlu0 %v2260_v53, %s2063_s23 }
 0x24e   :  { %v380_v59 = vsel %vm378_vm2, %v2262_v56, 0  ;;  %v2281_v2 = vpack.c.bf16 %v240_v57, %v240_v57 }
 0x24f   :  { %298 = vrot.lane.b32.xlu1 %v2264_v58, %s2063_s23  ;;  %1768 = vmatpush3.bf16.msra.mxu0 %v380_v59  ;;  %s2072_s23 = smov 32  }
 0x250   :  { %1779 = vmatprep.subr.bf16.mxu0 %v2068_v40  ;;  %v426_v3 = vsel %vm378_vm2, %v2281_v2, 0 }
 0x2bf   :  { %v249_v60 = vpop.permute.xlu0 %248 }
 0x2c0   :  { %v255_v61 = vsel %vm250_vm3, %v249_v60, 0 }
 0x2c1   :  { %1756 = vmatpush3.bf16.xpose.msra.mxu1 %v255_v61  ;;  %v299_v62 = vpop.permute.xlu1 %298 }
 0x2c2   :  { %1761 = vmatprep.subr.bf16.mxu1 %v2068_v40  ;;  %v304_v63 = vsel %vm250_vm3, %v299_v62, 0 }
 0x2c8   :  { %1758 = vmatmul.mubr.msk.bf16.vlgmr.msra.gmra.mrb[4].mxu1 %vm250_vm3, %v2260_v53 }
 0x2c9   :  { %1762 = vmatpush3.bf16.xpose.msra.mxu1 %v304_v63  ;;  %1763 = vmatprep.mubr.msk.bf16.mxu1 %vm2069_vm1, %v2068_v40 }
 0x2ca   :  { %1773 = vmatprep.subr.bf16.mxu1 %v2068_v40 }
 0x2d0   :  { %1764 = vmatmul.mubr.msk.bf16.vlgmr.msra.gmra.mrb[8].mxu1 %vm250_vm3, %v2264_v58 }
 0x2d1   :  { %1774 = vmatpush3.bf16.msra.mxu1 %v426_v3  ;;  %1775 = vmatprep.mubr.msk.bf16.mxu1 %vm2069_vm1, %v2068_v40 }
 0x2d2   :  { %1785 = vmatprep.subr.bf16.mxu1 %v2068_v40 }
 0x39b   :  { %v291_v4 = vpop.f32.mrb[4].mxu1 }
 0x39c   :  { %v346_v6 = vmul.f32 0.25, %v291_v4  ;;  %v1759_v7 = vpop.f32.mrb[5].mxu1 }
 0x39d   :  { %v294_v8 = vpop.f32.mrb[6].mxu1 }
 0x39e   :  { %v1760_v9 = vpop.f32.mrb[7].mxu1  ;;  %v348_v10 = vadd.f32 %v346_v6, %v2290_v5 }
 0x3a0   :  { %v351_v11 = vsel %vm350_vm4, %v348_v10, -inf }
 0x3a1   :  { %352 = vmax.xlane.f32.xlu1 %v351_v11 }
 0x3a3   :  { %v340_v12 = vpop.f32.mrb[8].mxu1 }
 0x3a4   :  { %v347_v13 = vmul.f32 0.25, %v340_v12  ;;  %v1765_v14 = vpop.f32.mrb[9].mxu1 }
 0x3a5   :  { %v343_v15 = vpop.f32.mrb[10].mxu1 }
 0x3a6   :  { %v1766_v16 = vpop.f32.mrb[11].mxu1  ;;  %v349_v17 = vadd.f32 %v347_v13, %v2290_v5 }
 0x3a8   :  { %v354_v18 = vsel %vm350_vm4, %v349_v17, -inf }
 0x3a9   :  { %355 = vmax.xlane.f32.xlu0 %v354_v18 }
 0x3b2   :  { %520 = vrot.lane.b32.xlu1 %v2264_v58, %s2070_s3 }
 0x42e   :  { %v353_v19 = vpop.xlane.xlu1 %352 }
 0x42f   :  { %v357_v20 = vsub.f32 %v348_v10, %v353_v19 }
 0x431   :  { %v359_v21 = vmul.f32 1.442695, %v357_v20 }
 0x432   :  { %v521_v31 = vpop.permute.xlu1 %520 }
 0x433   :  { %1940 = vpow2.f32 %v359_v21  ;;  %v526_v46 = vsel %vm250_vm3, %v521_v31, 0 }
 0x436   :  { %v356_v23 = vpop.xlane.xlu0 %355 }
 0x437   :  { %v358_v24 = vsub.f32 %v349_v17, %v356_v23 }
 0x439   :  { %v361_v25 = vmul.f32 1.442695, %v358_v24 }
 0x43b   :  { %1942 = vpow2.f32 %v361_v25 }
 0x43d   :  { %v1941_v26 = vpop.eup %1940 }
 0x43e   :  { %v363_v27 = vsel %vm350_vm4, %v1941_v26, 0.0 }
 0x43f   :  { %364 = vadd.xlane.f32.xlu0 %v363_v27 }
 0x445   :  { %v1943_v28 = vpop.eup %1942 }
 0x446   :  { %v366_v29 = vsel %vm350_vm4, %v1943_v28, 0.0 }
 0x447   :  { %367 = vadd.xlane.f32.xlu1 %v366_v29 }
 0x455   :  { %470 = vrot.lane.b32.xlu0 %v2260_v53, %s2070_s3 }
 0x458   :  { %468 = vrot.lane.b32.xlu1 %v2260_v53, %s2071_s5 }
 0x45c   :  { %518 = vrot.lane.b32.xlu1 %v2264_v58, %s2071_s5 }
 0x4cc   :  { %v365_v30 = vpop.xlane.xlu0 %364 }
 0x4cd   :  { %1944 = vrcp.f32 %v365_v30 }
 0x4d0   :  { %v471_v35 = vpop.permute.xlu0 %470 }
 0x4d1   :  { %v476_v37 = vsel %vm250_vm3, %v471_v35, 0 }
 0x4d4   :  { %v368_v32 = vpop.xlane.xlu1 %367 }
 0x4d5   :  { %1946 = vrcp.f32 %v368_v32 }
 0x4d7   :  { %v1945_v33 = vpop.eup %1944 }
 0x4d8   :  { %v371_v34 = vmul.f32 %v1945_v33, %v1941_v26  ;;  %v469_v44 = vpop.permute.xlu1 %468 }
 0x4da   :  { %v373_v36 = vpack.c.bf16 %v371_v34, %v371_v34 }
 0x4dc   :  { %1770 = vmatmul.mubr.msk.bf16.vlgmr.msra.gmra.mrb[0].mxu0 %vm350_vm4, %v373_v36  ;;  %v519_v47 = vpop.permute.xlu1 %518 }
 0x4dd   :  { %1780 = vmatpush3.bf16.xpose.msra.mxu0 %v476_v37  ;;  %1781 = vmatprep.mubr.msk.bf16.mxu0 %vm2069_vm1, %v2068_v40 }
 0x4de   :  { %1791 = vmatprep.subr.bf16.mxu0 %v2068_v40 }
 0x4df   :  { %v1947_v38 = vpop.eup %1946 }
 0x4e0   :  { %v372_v39 = vmul.f32 %v1947_v38, %v1943_v28 }
 0x4e2   :  { %v374_v41 = vpack.c.bf16 %v372_v39, %v372_v39 }
 0x4e4   :  { %1776 = vmatmul.mubr.msk.bf16.vlgmr.msra.gmra.mrb[12].mxu1 %vm350_vm4, %v374_v41  ;;  %1782 = vmatmul.mubr.msk.bf16.vlgmr.msra.gmra.mrb[4].mxu0 %vm250_vm3, %v469_v44 }
 0x4e5   :  { %1786 = vmatpush3.bf16.xpose.msra.mxu1 %v526_v46  ;;  %1787 = vmatprep.mubr.msk.bf16.mxu1 %vm2069_vm1, %v2068_v40 }
 0x4e6   :  { %1797 = vmatprep.subr.bf16.mxu1 %v2068_v40  ;;  %1793 = vmatprep.mubr.msk.bf16.mxu0 %vm2069_vm1, %v2068_v40 }
 0x4ec   :  { %1788 = vmatmul.mubr.msk.bf16.vlgmr.msra.gmra.mrb[16].mxu1 %vm250_vm3, %v519_v47 }
 0x4ed   :  { %1799 = vmatprep.mubr.msk.bf16.mxu1 %vm2069_vm1, %v2068_v40 }
 0x5af   :  { %v2322_v48 = vpop.f32.mrb[0].mxu0 }
 0x5b0   :  { %v1771_v49 = vpop.f32.mrb[1].mxu0 }
 0x5b1   :  { %v419_v50 = vpop.f32.mrb[2].mxu0 }
 0x5b2   :  { %v1772_v51 = vpop.f32.mrb[3].mxu0 }
 0x5b7   :  { %v2324_v52 = vpop.f32.mrb[12].mxu1  ;;  %v512_v54 = vpop.f32.mrb[4].mxu0 }
 0x5b8   :  { %v568_v55 = vmul.f32 0.25, %v512_v54  ;;  %v1777_v57 = vpop.f32.mrb[13].mxu1  ;;  %v1783_v59 = vpop.f32.mrb[5].mxu0 }
 0x5b9   :  { %v465_v60 = vpop.f32.mrb[14].mxu1  ;;  %v515_v61 = vpop.f32.mrb[6].mxu0 }
 0x5ba   :  { %v1778_v62 = vpop.f32.mrb[15].mxu1  ;;  %v1784_v63 = vpop.f32.mrb[7].mxu0  ;;  %v570_v3 = vadd.f32 %v568_v55, %v2290_v5 }
 0x5bc   :  { %v572_v4 = vsel %vm350_vm4, %v570_v3, -inf }
 0x5bd   :  { %573 = vmax.xlane.f32.xlu0 %v572_v4 }
 0x5bf   :  { %v562_v6 = vpop.f32.mrb[16].mxu1 }
 0x5c0   :  { %v569_v7 = vmul.f32 0.25, %v562_v6  ;;  %v1789_v8 = vpop.f32.mrb[17].mxu1 }
 0x5c1   :  { %v565_v9 = vpop.f32.mrb[18].mxu1 }
 0x5c2   :  { %v1790_v10 = vpop.f32.mrb[19].mxu1  ;;  %v571_v11 = vadd.f32 %v569_v7, %v2290_v5 }
 0x5c4   :  { %v575_v12 = vsel %vm350_vm4, %v571_v11, -inf }
 0x5c5   :  { %576 = vmax.xlane.f32.xlu1 %v575_v12 }
 0x5d6   :  { %646 = vrot.lane.b32.xlu1 %v2281_v2, %s2071_s5 }
 0x5da   :  { %696 = vrot.lane.b32.xlu1 %v2260_v53, %s2072_s23 }
 0x5de   :  { %746 = vrot.lane.b32.xlu1 %v2264_v58, %s2072_s23 }
 0x5e2   :  { %744 = vrot.lane.b32.xlu1 %v2264_v58, %s2073_s12 }
 0x64a   :  { %v574_v13 = vpop.xlane.xlu0 %573 }
 0x64b   :  { %v578_v14 = vsub.f32 %v570_v3, %v574_v13 }
 0x64d   :  { %v580_v15 = vmul.f32 1.442695, %v578_v14 }
 0x64f   :  { %1948 = vpow2.f32 %v580_v15 }
 0x652   :  { %v577_v16 = vpop.xlane.xlu1 %576 }
 0x653   :  { %v579_v17 = vsub.f32 %v571_v11, %v577_v16 }
 0x655   :  { %v582_v18 = vmul.f32 1.442695, %v579_v17 }
 0x656   :  { %v647_v19 = vpop.permute.xlu1 %646 }
 0x657   :  { %1950 = vpow2.f32 %v582_v18  ;;  %v652_v20 = vsel %vm378_vm2, %v647_v19, 0 }
 0x658   :  { %1798 = vmatpush3.bf16.msra.mxu1 %v652_v20 }
 0x659   :  { %v1949_v21 = vpop.eup %1948  ;;  %1809 = vmatprep.subr.bf16.mxu1 %v2068_v40 }
 0x65a   :  { %v584_v23 = vsel %vm350_vm4, %v1949_v21, 0.0  ;;  %v697_v33 = vpop.permute.xlu1 %696 }
 0x65b   :  { %585 = vadd.xlane.f32.xlu0 %v584_v23  ;;  %v702_v37 = vsel %vm250_vm3, %v697_v33, 0 }
 0x65e   :  { %v747_v36 = vpop.permute.xlu1 %746 }
 0x65f   :  { %v752_v39 = vsel %vm250_vm3, %v747_v36, 0 }
 0x661   :  { %v1951_v24 = vpop.eup %1950 }
 0x662   :  { %v587_v25 = vsel %vm350_vm4, %v1951_v24, 0.0  ;;  %v745_v44 = vpop.permute.xlu1 %744 }
 0x663   :  { %588 = vadd.xlane.f32.xlu0 %v587_v25 }
 0x679   :  { %597 = vrot.lane.b32.xlu0 %v2262_v56, %s2071_s5 }
 0x67d   :  { %694 = vrot.lane.b32.xlu0 %v2260_v53, %s2073_s12 }
 0x6e8   :  { %v586_v26 = vpop.xlane.xlu0 %585 }
 0x6e9   :  { %1952 = vrcp.f32 %v586_v26 }
 0x6f0   :  { %v589_v27 = vpop.xlane.xlu0 %588 }
 0x6f1   :  { %1954 = vrcp.f32 %v589_v27 }
 0x6f3   :  { %v1953_v28 = vpop.eup %1952 }
 0x6f4   :  { %v592_v29 = vmul.f32 %v1953_v28, %v1949_v21  ;;  %v598_v30 = vpop.permute.xlu0 %597 }
 0x6f5   :  { %v603_v31 = vsel %vm378_vm2, %v598_v30, 0 }
 0x6f6   :  { %1792 = vmatpush3.bf16.msra.mxu0 %v603_v31  ;;  %v594_v32 = vpack.c.bf16 %v592_v29, %v592_v29 }
 0x6f7   :  { %1803 = vmatprep.subr.bf16.mxu0 %v2068_v40 }
 0x6f8   :  { %v695_v41 = vpop.permute.xlu0 %694 }
 0x6f9   :  { %1794 = vmatmul.mubr.msk.bf16.vlgmr.msra.gmra.mrb[8].mxu0 %vm350_vm4, %v594_v32 }
 0x6fa   :  { %1805 = vmatprep.mubr.msk.bf16.mxu0 %vm2069_vm1, %v2068_v40 }
 0x6fb   :  { %v1955_v34 = vpop.eup %1954 }
 0x6fc   :  { %v593_v35 = vmul.f32 %v1955_v34, %v1951_v24 }
 0x6fe   :  { %v595_v38 = vpack.c.bf16 %v593_v35, %v593_v35 }
 0x6ff   :  { %1804 = vmatpush3.bf16.xpose.msra.mxu0 %v702_v37 }
 0x700   :  { %1800 = vmatmul.mubr.msk.bf16.vlgmr.msra.gmra.mrb[20].mxu1 %vm350_vm4, %v595_v38  ;;  %1815 = vmatprep.subr.bf16.mxu0 %v2068_v40 }
 0x701   :  { %1810 = vmatpush3.bf16.xpose.msra.mxu1 %v752_v39  ;;  %1811 = vmatprep.mubr.msk.bf16.mxu1 %vm2069_vm1, %v2068_v40 }
 0x702   :  { %1821 = vmatprep.subr.bf16.mxu1 %v2068_v40 }
 0x706   :  { %1806 = vmatmul.mubr.msk.bf16.vlgmr.msra.gmra.mrb[12].mxu0 %vm250_vm3, %v695_v41 }
 0x707   :  { %1817 = vmatprep.mubr.msk.bf16.mxu0 %vm2069_vm1, %v2068_v40 }
 0x708   :  { %1812 = vmatmul.mubr.msk.bf16.vlgmr.msra.gmra.mrb[24].mxu1 %vm250_vm3, %v745_v44 }
 0x709   :  { %1823 = vmatprep.mubr.msk.bf16.mxu1 %vm2069_vm1, %v2068_v40 }
 0x7cc   :  { %v2364_v46 = vpop.f32.mrb[8].mxu0 }
 0x7cd   :  { %v1795_v47 = vpop.f32.mrb[9].mxu0 }
 0x7ce   :  { %v642_v49 = vpop.f32.mrb[10].mxu0 }
 0x7cf   :  { %v1796_v50 = vpop.f32.mrb[11].mxu0 }
 0x7d3   :  { %v2366_v51 = vpop.f32.mrb[20].mxu1 }
 0x7d4   :  { %v1877_v54 = vpack.i.bf16 %v2366_v51, %v2364_v46  ;;  %v1801_v55 = vpop.f32.mrb[21].mxu1 }
 0x7d5   :  { %v691_v57 = vpop.f32.mrb[22].mxu1 }
 0x7d6   :  { %v1802_v59 = vpop.f32.mrb[23].mxu1 }
 0x7d9   :  { %v738_v60 = vpop.f32.mrb[12].mxu0 }
 0x7da   :  { %v794_v61 = vmul.f32 0.25, %v738_v60  ;;  %v1807_v62 = vpop.f32.mrb[13].mxu0 }
 0x7db   :  { %v741_v63 = vpop.f32.mrb[14].mxu0  ;;  %v788_v3 = vpop.f32.mrb[24].mxu1 }
 0x7dc   :  { %v795_v4 = vmul.f32 0.25, %v788_v3  ;;  %v1808_v6 = vpop.f32.mrb[15].mxu0  ;;  %v1813_v7 = vpop.f32.mrb[25].mxu1  ;;  %v796_v8 = vadd.f32 %v794_v61, %v2290_v5 }
 0x7dd   :  { %v791_v9 = vpop.f32.mrb[26].mxu1 }
 0x7de   :  { %v1814_v10 = vpop.f32.mrb[27].mxu1  ;;  %v798_v11 = vsel %vm350_vm4, %v796_v8, -inf  ;;  %v797_v12 = vadd.f32 %v795_v4, %v2290_v5 }
 0x7df   :  { %799 = vmax.xlane.f32.xlu0 %v798_v11 }
 0x7e0   :  { %v801_v13 = vsel %vm350_vm4, %v797_v12, -inf }
 0x7e1   :  { %802 = vmax.xlane.f32.xlu1 %v801_v13 }
 0x7f2   :  { %870 = vrot.lane.b32.xlu1 %v2281_v2, %s2073_s12 }
 0x7f6   :  { %920 = vrot.lane.b32.xlu1 %v2260_v53, %s2074_s24 }
 0x7fa   :  { %970 = vrot.lane.b32.xlu1 %v2264_v58, %s2074_s24 }
 0x7fe   :  { %968 = vrot.lane.b32.xlu1 %v2264_v58, %s2075_s15 }
 0x86c   :  { %v800_v14 = vpop.xlane.xlu0 %799 }
 0x86d   :  { %v804_v15 = vsub.f32 %v796_v8, %v800_v14 }
 0x86e   :  { %v803_v16 = vpop.xlane.xlu1 %802 }
 0x86f   :  { %v806_v17 = vmul.f32 1.442695, %v804_v15  ;;  %v805_v18 = vsub.f32 %v797_v12, %v803_v16 }
 0x871   :  { %1956 = vpow2.f32 %v806_v17  ;;  %v808_v19 = vmul.f32 1.442695, %v805_v18 }
 0x872   :  { %v871_v20 = vpop.permute.xlu1 %870 }
 0x873   :  { %1958 = vpow2.f32 %v808_v19  ;;  %v876_v21 = vsel %vm378_vm2, %v871_v20, 0 }
 0x874   :  { %1822 = vmatpush3.bf16.msra.mxu1 %v876_v21 }
 0x875   :  { %1833 = vmatprep.subr.bf16.mxu1 %v2068_v40 }
 0x876   :  { %v921_v31 = vpop.permute.xlu1 %920 }
 0x87a   :  { %v971_v36 = vpop.permute.xlu1 %970 }
 0x87b   :  { %v1957_v23 = vpop.eup %1956  ;;  %v976_v38 = vsel %vm250_vm3, %v971_v36, 0 }
 0x87c   :  { %v810_v24 = vsel %vm350_vm4, %v1957_v23, 0.0 }
 0x87d   :  { %v1959_v25 = vpop.eup %1958  ;;  %811 = vadd.xlane.f32.xlu0 %v810_v24 }
 0x87e   :  { %v813_v58 = vsel %vm350_vm4, %v1959_v25, 0.0  ;;  %v969_v41 = vpop.permute.xlu1 %968 }
 0x881   :  { %814 = vadd.xlane.f32.xlu0 %v813_v58 }
 0x897   :  { %822 = vrot.lane.b32.xlu0 %v2262_v56, %s2073_s12 }
 0x89b   :  { %918 = vrot.lane.b32.xlu0 %v2260_v53, %s2075_s15  ;;  %v926_v53 = vsel %vm250_vm3, %v921_v31, 0 }
 0x90a   :  { %v812_v26 = vpop.xlane.xlu0 %811 }
 0x90b   :  { %1960 = vrcp.f32 %v812_v26 }
 0x90e   :  { %v815_v27 = vpop.xlane.xlu0 %814 }
 0x90f   :  { %1962 = vrcp.f32 %v815_v27 }
 0x912   :  { %v823_v28 = vpop.permute.xlu0 %822 }
 0x913   :  { %v828_v29 = vsel %vm378_vm2, %v823_v28, 0 }
 0x914   :  { %1816 = vmatpush3.bf16.msra.mxu0 %v828_v29 }
 0x915   :  { %v1961_v30 = vpop.eup %1960  ;;  %1827 = vmatprep.subr.bf16.mxu0 %v2068_v40 }
 0x916   :  { %v818_v32 = vmul.f32 %v1961_v30, %v1957_v23  ;;  %v919_v39 = vpop.permute.xlu0 %918 }
 0x918   :  { %v820_v33 = vpack.c.bf16 %v818_v32, %v818_v32  ;;  %v1904_v32 = vld [vmem:[#allocation4] sm:$0xff]  }
 0x919   :  { %v1963_v34 = vpop.eup %1962 }
 0x91a   :  { %v819_v35 = vmul.f32 %v1963_v34, %v1959_v25  ;;  %1818 = vmatmul.mubr.msk.bf16.vlgmr.msra.gmra.mrb[16].mxu0 %vm350_vm4, %v820_v33  ;;  %v1905_v33 = vld [vmem:[#allocation4 + $0x8] sm:$0xff]   ;;  %v1906_v34 = vld [vmem:[#allocation4 + $0x10] sm:$0xff]  }
 0x91b   :  { %1829 = vmatprep.mubr.msk.bf16.mxu0 %vm2069_vm1, %v2068_v40 }
 0x91c   :  { %v821_v37 = vpack.c.bf16 %v819_v35, %v819_v35  ;;  %v1907_v35 = vld [vmem:[#allocation4 + $0x18] sm:$0xff]  }
 0x91d   :  { %1828 = vmatpush3.bf16.xpose.msra.mxu0 %v926_v53 }
 0x91e   :  { %1824 = vmatmul.mubr.msk.bf16.vlgmr.msra.gmra.mrb[28].mxu1 %vm350_vm4, %v821_v37  ;;  %1839 = vmatprep.subr.bf16.mxu0 %v2068_v40 }
 0x91f   :  { %1834 = vmatpush3.bf16.xpose.msra.mxu1 %v976_v38  ;;  %1835 = vmatprep.mubr.msk.bf16.mxu1 %vm2069_vm1, %v2068_v40 }
 0x920   :  { %1845 = vmatprep.subr.bf16.mxu1 %v2068_v40 }
 0x924   :  { %1830 = vmatmul.mubr.msk.bf16.vlgmr.msra.gmra.mrb[20].mxu0 %vm250_vm3, %v919_v39 }
 0x925   :  { %1841 = vmatprep.mubr.msk.bf16.mxu0 %vm2069_vm1, %v2068_v40 }
 0x926   :  { %1836 = vmatmul.mubr.msk.bf16.vlgmr.msra.gmra.mrb[32].mxu1 %vm250_vm3, %v969_v41 }
 0x927   :  { %1847 = vmatprep.mubr.msk.bf16.mxu1 %vm2069_vm1, %v2068_v40 }
 0x9ed   :  { %v864_v44 = vpop.f32.mrb[16].mxu0 }
 0x9ee   :  { %v1819_v47 = vpop.f32.mrb[17].mxu0 }
 0x9ef   :  { %v867_v49 = vpop.f32.mrb[18].mxu0 }
 0x9f0   :  { %v1820_v50 = vpop.f32.mrb[19].mxu0 }
 0x9f1   :  { %v912_v55 = vpop.f32.mrb[28].mxu1 }
 0x9f2   :  { %v1882_v57 = vpack.i.bf16 %v912_v55, %v864_v44  ;;  %v1825_v59 = vpop.f32.mrb[29].mxu1 }
 0x9f3   :  { %v915_v60 = vpop.f32.mrb[30].mxu1 }
 0x9f4   :  { %v1826_v61 = vpop.f32.mrb[31].mxu1 }
 0x9f7   :  { %v962_v62 = vpop.f32.mrb[20].mxu0 }
 0x9f8   :  { %v1018_v63 = vmul.f32 0.25, %v962_v62  ;;  %v1831_v3 = vpop.f32.mrb[21].mxu0 }
 0x9f9   :  { %v965_v4 = vpop.f32.mrb[22].mxu0  ;;  %v1012_v6 = vpop.f32.mrb[32].mxu1 }
 0x9fa   :  { %v1019_v7 = vmul.f32 0.25, %v1012_v6  ;;  %v1832_v8 = vpop.f32.mrb[23].mxu0  ;;  %v1837_v9 = vpop.f32.mrb[33].mxu1  ;;  %v1020_v10 = vadd.f32 %v1018_v63, %v2290_v5 }
 0x9fb   :  { %v1015_v11 = vpop.f32.mrb[34].mxu1 }
 0x9fc   :  { %v1838_v12 = vpop.f32.mrb[35].mxu1  ;;  %v1022_v13 = vsel %vm350_vm4, %v1020_v10, -inf  ;;  %v1021_v14 = vadd.f32 %v1019_v7, %v2290_v5 }
 0x9fd   :  { %1023 = vmax.xlane.f32.xlu0 %v1022_v13 }
 0x9fe   :  { %v1025_v15 = vsel %vm350_vm4, %v1021_v14, -inf }
 0x9ff   :  { %1026 = vmax.xlane.f32.xlu1 %v1025_v15 }
 0xa10   :  { %1094 = vrot.lane.b32.xlu1 %v2281_v2, %s2075_s15 }
 0xa14   :  { %1878 = vrot.lane.b32.xlu1 %v1877_v54, %s2074_s24 }
 0xa18   :  { %1883 = vrot.lane.b32.xlu1 %v1882_v57, %s2072_s23 }
 0xa8a   :  { %v1024_v16 = vpop.xlane.xlu0 %1023 }
 0xa8b   :  { %v1028_v17 = vsub.f32 %v1020_v10, %v1024_v16  ;;  %v1658_v10 = vld [vmem:[%s2515_s7] ss:$0 sm:$0xff] }
 0xa8c   :  { %v1027_v18 = vpop.xlane.xlu1 %1026 }
 0xa8d   :  { %v1030_v19 = vmul.f32 1.442695, %v1028_v17  ;;  %v1029_v20 = vsub.f32 %v1021_v14, %v1027_v18 }
 0xa8f   :  { %1964 = vpow2.f32 %v1030_v19  ;;  %v1032_v5 = vmul.f32 1.442695, %v1029_v20 }
 0xa90   :  { %v1095_v21 = vpop.permute.xlu1 %1094 }
 0xa91   :  { %1966 = vpow2.f32 %v1032_v5  ;;  %v1100_v23 = vsel %vm378_vm2, %v1095_v21, 0 }
 0xa92   :  { %1846 = vmatpush3.bf16.msra.mxu1 %v1100_v23 }
 0xa94   :  { %v1879_v49 = vpop.permute.xlu1 %1878 }
 0xa95   :  { %v1881_v55 = vunpack.i.h.bf16 %v1879_v49  ;;  %v1880_v57 = vunpack.i.l.bf16 %v1879_v49 }
 0xa97   :  { %v1167_v61 = vsel %vm250_vm3, %v2324_v52, %v1881_v55  ;;  %v1166_v62 = vsel %vm250_vm3, %v2322_v48, %v1880_v57  ;;  %v1921_v55 = vld [vmem:[#allocation6] sm:$0xff]   ;;  %v1922_v57 = vld [vmem:[#allocation6 + $0x48] sm:$0xff]  }
 0xa98   :  { %v1884_v50 = vpop.permute.xlu1 %1883 }
 0xa99   :  { %v1965_v2 = vpop.eup %1964  ;;  %v1886_v59 = vunpack.i.h.bf16 %v1884_v50  ;;  %v1885_v60 = vunpack.i.l.bf16 %v1884_v50  ;;  %v1920_v50 = vld [vmem:[#allocation6 + $0x40] sm:$0xff]  }
 0xa9a   :  { %v1034_v24 = vsel %vm350_vm4, %v1965_v2, 0.0 }
 0xa9b   :  { %v1967_v25 = vpop.eup %1966  ;;  %1035 = vadd.xlane.f32.xlu0 %v1034_v24  ;;  %v1169_v4 = vsel %vm1168_vm5, %v1166_v62, %v1885_v60  ;;  %v1170_v6 = vsel %vm1168_vm5, %v1167_v61, %v1886_v59  ;;  %v1923_v59 = vld [vmem:[#allocation6 + $0x8] sm:$0xff]   ;;  %v1924_v60 = vld [vmem:[#allocation6 + $0x50] sm:$0xff]   ;;  %v1926_v61 = vld [vmem:[#allocation6 + $0x58] sm:$0xff]  }
 0xa9c   :  { %v1037_v46 = vsel %vm350_vm4, %v1967_v25, 0.0  ;;  %v1927_v62 = vld [vmem:[#allocation6 + $0x18] sm:$0xff]  }
 0xa9f   :  { %1038 = vadd.xlane.f32.xlu0 %v1037_v46  ;;  %v1910_v46 = vld [vmem:[%s2518_s10 + $0x4] ss:$8 sps:$4 sm:$0xff]  }
 0xaa0   :  { %1368 = vmatprep.subr.bf16.mxu1 %v1910_v46 }
 0xab5   :  { %1046 = vrot.lane.b32.xlu0 %v2262_v56, %s2075_s15 }
 0xb28   :  { %v1036_v51 = vpop.xlane.xlu0 %1035 }
 0xb29   :  { %1968 = vrcp.f32 %v1036_v51  ;;  %v1908_v51 = vld [vmem:[%s2518_s10] ss:$8 sps:$4 sm:$0xff]  }
 0xb2c   :  { %v1039_v54 = vpop.xlane.xlu0 %1038 }
 0xb2d   :  { %1970 = vrcp.f32 %v1039_v54  ;;  %v1913_v54 = vld [vmem:[%s2518_s10 + $0x14] ss:$8 sps:$4 sm:$0xff]  }
 0xb30   :  { %v1047_v58 = vpop.permute.xlu0 %1046 }
 0xb31   :  { %v1052_v26 = vsel %vm378_vm2, %v1047_v58, 0  ;;  %v1911_v58 = vld [vmem:[%s2518_s10 + $0x10] ss:$8 sps:$4 sm:$0xff]  }
 0xb32   :  { %1840 = vmatpush3.bf16.msra.mxu0 %v1052_v26  ;;  %v1916_v26 = vld [vmem:[%s2518_s10 + $0x24] ss:$8 sps:$4 sm:$0xff]  }
 0xb33   :  { %v1969_v27 = vpop.eup %1968  ;;  %1851 = vmatprep.subr.bf16.mxu0 %v2068_v40 }
 0xb34   :  { %v1042_v28 = vmul.f32 %v1969_v27, %v1965_v2  ;;  %v1914_v27 = vld [vmem:[%s2518_s10 + $0x20] ss:$8 sps:$4 sm:$0xff]  }
 0xb36   :  { %v1044_v29 = vpack.c.bf16 %v1042_v28, %v1042_v28  ;;  %v1917_v28 = vld [vmem:[%s2518_s10 + $0x30] ss:$8 sps:$4 sm:$0xff]  }
 0xb37   :  { %v1971_v30 = vpop.eup %1970 }
 0xb38   :  { %v1043_v31 = vmul.f32 %v1971_v30, %v1967_v25  ;;  %1842 = vmatmul.mubr.msk.bf16.vlgmr.msra.gmra.mrb[24].mxu0 %vm350_vm4, %v1044_v29  ;;  %v1919_v29 = vld [vmem:[%s2518_s10 + $0x34] ss:$8 sps:$4 sm:$0xff]  }
 0xb39   :  { %1859 = vmatprep.mubr.msk.bf16.mxu0 %vm2069_vm1, %v2068_v40  ;;  %1852 = vmatpush3.bf16.msra.mxu0 %v1904_v32 }
 0xb3a   :  { %v1045_v56 = vpack.c.bf16 %v1043_v31, %v1043_v31  ;;  %1853 = vmatprep.subr.bf16.mxu0 %v2068_v40 }
 0xb3c   :  { %1848 = vmatmul.mubr.msk.bf16.vlgmr.msra.gmra.mrb[36].mxu1 %vm350_vm4, %v1045_v56 }
 0xb3d   :  { %1400 = vmatprep.mubr.bf16.mxu1 %v2067_v22  ;;  %1854 = vmatpush3.bf16.msra.mxu0 %v1905_v33 }
 0xb3e   :  { %1855 = vmatprep.subr.bf16.mxu0 %v2068_v40  ;;  %1369 = vmatpush1.bf16.msra.mxu1 %v1908_v51 }
 0xb3f   :  { %1370 = vmatprep.subr.bf16.mxu1 %v1913_v54 }
 0xb41   :  { %1856 = vmatpush3.bf16.msra.mxu0 %v1906_v34 }
 0xb42   :  { %1857 = vmatprep.subr.bf16.mxu0 %v2068_v40  ;;  %1371 = vmatpush1.bf16.msra.mxu1 %v1911_v58 }
 0xb43   :  { %1372 = vmatprep.subr.bf16.mxu1 %v1916_v26 }
 0xb45   :  { %1858 = vmatpush3.bf16.msra.mxu0 %v1907_v35 }
 0xb46   :  { %1373 = vmatpush1.bf16.msra.mxu1 %v1914_v27  ;;  %1733 = vmatprep.subr.bf16.mxu0 %v1920_v50 }
 0xb47   :  { %1374 = vmatprep.subr.bf16.mxu1 %v1919_v29 }
 0xb4a   :  { %1375 = vmatpush1.bf16.msra.mxu1 %v1917_v28 }
 0xc0b   :  { %v1088_v36 = vpop.f32.mrb[24].mxu0 }
 0xc0c   :  { %v1843_v53 = vpop.f32.mrb[25].mxu0 }
 0xc0d   :  { %v1091_v37 = vpop.f32.mrb[26].mxu0  ;;  %v1664_v53 = vld [vmem:[%s2516_s8] ss:$0 sm:$0xff] }
 0xc0e   :  { %v1844_v38 = vpop.f32.mrb[27].mxu0 }
 0xc0f   :  { %v1136_v39 = vpop.f32.mrb[36].mxu1 }
 0xc10   :  { %v1887_v22 = vpack.i.bf16 %v1136_v39, %v1088_v36  ;;  %v1849_v41 = vpop.f32.mrb[37].mxu1 }
 0xc11   :  { %v1139_v44 = vpop.f32.mrb[38].mxu1 }
 0xc12   :  { %1888 = vrot.lane.b32.xlu0 %v1887_v22, %s2070_s3  ;;  %v1850_v47 = vpop.f32.mrb[39].mxu1  ;;  %v1665_v22 = vld [vmem:[%s2517_s9] ss:$0 sm:$0xff] }
 0xc84   :  { %v1889_v40 = vpop.permute.xlu0 %1888 }
 0xc85   :  { %v1891_v63 = vunpack.i.h.bf16 %v1889_v40  ;;  %v1890_v3 = vunpack.i.l.bf16 %v1889_v40  ;;  %v1925_v40 = vld [vmem:[#allocation6 + $0x10] sm:$0xff]  }
 0xc87   :  { %v1173_v7 = vsel %vm1171_vm6, %v1170_v6, %v1891_v63  ;;  %v1172_v8 = vsel %vm1171_vm6, %v1169_v4, %v1890_v3  ;;  %v1928_v63 = vld [vmem:[#allocation6 + $0x60] sm:$0xff]   ;;  %v1930_v4 = vld [vmem:[#allocation6 + $0x68] sm:$0xff]  }
 0xc88   :  { %v1174_v9 = vpack.c.bf16 %v1173_v7, %v1172_v8  ;;  %v1929_v3 = vld [vmem:[#allocation6 + $0x20] sm:$0xff]   ;;  %v1931_v6 = vld [vmem:[#allocation6 + $0x28] sm:$0xff]   ;;  %v1932_v7 = vld [vmem:[#allocation6 + $0x70] sm:$0xff]  }
 0xc89   :  { %v1933_v8 = vld [vmem:[#allocation6 + $0x30] sm:$0xff]  }
 0xc8a   :  { %1860 = vmatmul.mubr.msk.bf16.vlgmr.msra.gmra.mrb[28].mxu0 %vm91_vm0, %v1174_v9  ;;  %v1934_v9 = vld [vmem:[#allocation6 + $0x78] sm:$0xff]  }
 0xc8b   :  { %1734 = vmatpush3.bf16.msra.mxu0 %v1921_v55 }
 0xc8c   :  { %1735 = vmatprep.subr.bf16.mxu0 %v1922_v57 }
 0xc8f   :  { %1736 = vmatpush3.bf16.msra.mxu0 %v1923_v59 }
 0xc90   :  { %1737 = vmatprep.subr.bf16.mxu0 %v1924_v60 }
 0xc93   :  { %1738 = vmatpush3.bf16.msra.mxu0 %v1925_v40 }
 0xc94   :  { %1739 = vmatprep.subr.bf16.mxu0 %v1926_v61 }
 0xc97   :  { %1740 = vmatpush3.bf16.msra.mxu0 %v1927_v62 }
 0xc98   :  { %1741 = vmatprep.subr.bf16.mxu0 %v1928_v63 }
 0xc9b   :  { %1742 = vmatpush3.bf16.msra.mxu0 %v1929_v3 }
 0xc9c   :  { %1743 = vmatprep.subr.bf16.mxu0 %v1930_v4 }
 0xc9f   :  { %1744 = vmatpush3.bf16.msra.mxu0 %v1931_v6 }
 0xca0   :  { %1745 = vmatprep.subr.bf16.mxu0 %v1932_v7 }
 0xca3   :  { %1746 = vmatpush3.bf16.msra.mxu0 %v1933_v8 }
 0xca4   :  { %1747 = vmatprep.subr.bf16.mxu0 %v1934_v9 }
 0xd5d   :  { %v1251_v11 = vpop.f32.mrb[28].mxu0 }
 0xd5e   :  { %v1252_v12 = vadd.f32 %v1658_v10, %v1251_v11  ;;  %v1861_v13 = vpop.f32.mrb[29].mxu0  ;;  %v1313_v11 = vld [vmem:[%s2519_s11] sm:$0x3] }
 0xd5f   :  { %v1254_v52 = vpop.f32.mrb[30].mxu0  ;;  %v1322_v13 = vrot.slane %v1313_v11, %v152_v45 }
 0xd60   :  { %v2444_v14 = vadd.f32 %v1252_v12, %v2196_v0  ;;  %v1255_v48 = vadd.f32 %v1658_v10, %v1254_v52  ;;  %v1862_v15 = vpop.f32.mrb[31].mxu0  ;;  %v1935_v10 = vld [vmem:[#allocation6 + $0x38] sm:$0xff]   ;;  %v1318_v12 = vrot.slane %v1313_v11, %v148_v43 }
 0xd61   :  { %1748 = vmatpush3.bf16.msra.mxu0 %v1935_v10 }
 0xd62   :  { %v2447_v16 = vadd.f32 %v1255_v48, %v2201_v1  ;;  %v1262_v17 = vsel %vm91_vm0, %v2444_v14, 0.0 }
 0xd63   :  { %1263 = vadd.xlane.f32.xlu1 %v1262_v17 }
 0xd64   :  { %v1265_v18 = vsel %vm91_vm0, %v2447_v16, 0.0 }
 0xd65   :  { %1266 = vadd.xlane.f32.xlu0 %v1265_v18 }
 0xdf0   :  { %v1264_v19 = vpop.xlane.xlu1 %1263 }
 0xdf1   :  { %v1268_v20 = vmul.f32 0.015625, %v1264_v19 }
 0xdf2   :  { %v1267_v5 = vpop.xlane.xlu0 %1266 }
 0xdf3   :  { %v1270_v21 = vsub.f32 %v2444_v14, %v1268_v20  ;;  %v1269_v0 = vmul.f32 0.015625, %v1267_v5 }
 0xdf5   :  { %v1271_v23 = vsub.f32 %v2447_v16, %v1269_v0  ;;  %v1272_v2 = vmul.f32 %v1270_v21, %v1270_v21 }
 0xdf7   :  { %v1274_v1 = vsel %vm91_vm0, %v1272_v2, 0.0  ;;  %v1273_v24 = vmul.f32 %v1271_v23, %v1271_v23 }
 0xdf8   :  { %1275 = vadd.xlane.f32.xlu0 %v1274_v1 }
 0xdf9   :  { %v1277_v25 = vsel %vm91_vm0, %v1273_v24, 0.0 }
 0xdfc   :  { %1278 = vadd.xlane.f32.xlu0 %v1277_v25 }
 0xe85   :  { %v1276_v30 = vpop.xlane.xlu0 %1275 }
 0xe86   :  { %v1280_v31 = vmul.f32 0.015625, %v1276_v30 }
 0xe88   :  { %v1282_v56 = vadd.f32 1e-05, %v1280_v31 }
 0xe89   :  { %v1279_v32 = vpop.xlane.xlu0 %1278 }
 0xe8a   :  { %1972 = vrsqrt.f32 %v1282_v56  ;;  %v1281_v33 = vmul.f32 0.015625, %v1279_v32 }
 0xe8c   :  { %v1283_v34 = vadd.f32 1e-05, %v1281_v33 }
 0xe8e   :  { %1974 = vrsqrt.f32 %v1283_v34 }
 0xe94   :  { %v1973_v35 = vpop.eup %1972 }
 0xe95   :  { %v1286_v36 = vmul.f32 %v1973_v35, %v1270_v21 }
 0xe97   :  { %v1294_v38 = vmul.f32 %v1664_v53, %v1286_v36 }
 0xe98   :  { %v1975_v37 = vpop.eup %1974 }
 0xe99   :  { %v1287_v39 = vmul.f32 %v1975_v37, %v1271_v23  ;;  %v1302_v44 = vadd.f32 %v1665_v22, %v1294_v38  ;;  %v1679_v37 = vld [vmem:[%s2521_s13] ss:$0 sm:$0xff] }
 0xe9b   :  { %v1295_v41 = vmul.f32 %v1664_v53, %v1287_v39 }
 0xe9d   :  { %v1303_v47 = vadd.f32 %v1665_v22, %v1295_v41 }
 0xe9f   :  { %v1304_v49 = vpack.c.bf16 %v1303_v47, %v1302_v44 }
 0xea1   :  { %1674 = vmatmul.mubr.msk.bf16.vlgmr.msra.gmra.mrb[40].mxu1 %vm91_vm0, %v1304_v49 }
 0xf74   :  { %v1402_v52 = vpop.f32.mrb[40].mxu1 }
 0xf75   :  { %v1403_v48 = vadd.f32 %v1402_v52, %v1318_v12  ;;  %v1404_v15 = vpop.f32.mrb[41].mxu1 }
 0xf76   :  { %v1405_v17 = vadd.f32 %v1404_v15, %v1322_v13  ;;  %v1406_v18 = vpop.f32.mrb[42].mxu1 }
 0xf77   :  { %v1675_v19 = vmul.f32 -1.702, %v1403_v48  ;;  %v1407_v20 = vadd.f32 %v1406_v18, %v1318_v12  ;;  %v1408_v5 = vpop.f32.mrb[43].mxu1 }
 0xf78   :  { %v1676_v21 = vmul.f32 -1.702, %v1405_v17  ;;  %v1409_v0 = vadd.f32 %v1408_v5, %v1322_v13 }
 0xf79   :  { %v1419_v23 = vmul.f32 1.442695, %v1675_v19  ;;  %v1677_v2 = vmul.f32 -1.702, %v1407_v20 }
 0xf7a   :  { %v1421_v1 = vmul.f32 1.442695, %v1676_v21  ;;  %v1678_v24 = vmul.f32 -1.702, %v1409_v0 }
 0xf7b   :  { %1976 = vpow2.f32 %v1419_v23  ;;  %v1423_v25 = vmul.f32 1.442695, %v1677_v2 }
 0xf7c   :  { %1978 = vpow2.f32 %v1421_v1  ;;  %v1425_v43 = vmul.f32 1.442695, %v1678_v24 }
 0xf7d   :  { %1980 = vpow2.f32 %v1423_v25 }
 0xf7e   :  { %1982 = vpow2.f32 %v1425_v43 }
 0xf85   :  { %v1977_v42 = vpop.eup %1976 }
 0xf86   :  { %v1979_v45 = vpop.eup %1978  ;;  %v1427_v46 = vadd.f32 1.0, %v1977_v42 }
 0xf87   :  { %v1981_v51 = vpop.eup %1980  ;;  %v1428_v54 = vadd.f32 1.0, %v1979_v45 }
 0xf88   :  { %v1983_v58 = vpop.eup %1982  ;;  %1984 = vrcp.f32 %v1427_v46  ;;  %v1429_v26 = vadd.f32 1.0, %v1981_v51 }
 0xf89   :  { %1986 = vrcp.f32 %v1428_v54  ;;  %v1430_v27 = vadd.f32 1.0, %v1983_v58 }
 0xf8a   :  { %1988 = vrcp.f32 %v1429_v26 }
 0xf8b   :  { %1990 = vrcp.f32 %v1430_v27 }
 0xf92   :  { %v1985_v28 = vpop.eup %1984 }
 0xf93   :  { %v1987_v29 = vpop.eup %1986  ;;  %v1439_v56 = vmul.f32 %v1985_v28, %v1403_v48 }
 0xf94   :  { %v1989_v30 = vpop.eup %1988  ;;  %v1440_v33 = vmul.f32 %v1987_v29, %v1405_v17 }
 0xf95   :  { %v1991_v31 = vpop.eup %1990  ;;  %v1441_v32 = vmul.f32 %v1989_v30, %v1407_v20 }
 0xf96   :  { %v1442_v34 = vmul.f32 %v1991_v31, %v1409_v0 }
 0xf97   :  { %v1443_v35 = vpack.c.bf16 %v1441_v32, %v1439_v56 }
 0xf98   :  { %v1444_v36 = vpack.c.bf16 %v1442_v34, %v1440_v33 }
 0xf9a   :  { %1612 = vmatprep.mubr.bf16.mxu0 %v1444_v36 }
 0xf9b   :  { %1613 = vmatmul.mubr.bf16.vlgmr.msra.gmra.mrb[32].mxu0 %v1443_v35 }
0x106e   :  { %v1749_v53 = vpop.f32.mrb[32].mxu0 }
0x106f   :  { %v1750_v38 = vpop.f32.mrb[33].mxu0 }
0x1070   :  { %v1751_v39 = vadd.f32 %v1750_v38, %v1749_v53  ;;  %v1752_v22 = vpop.f32.mrb[34].mxu0 }
0x1071   :  { %v1753_v41 = vpop.f32.mrb[35].mxu0 }
0x1072   :  { %v1615_v44 = vadd.f32 %v1751_v39, %v1679_v37  ;;  %v1754_v47 = vadd.f32 %v1753_v41, %v1752_v22 }
0x1074   :  { %v1621_v49 = vadd.f32 %v1615_v44, %v2444_v14  ;;  %v1618_v50 = vadd.f32 %v1754_v47, %v1679_v37 }
0x1076   :  { %1623 = vst.msk [vmem:[%s2522_s14] sm:$0xff] %vm91_vm0, %v1621_v49  ;;  %v1622_v55 = vadd.f32 %v1618_v50, %v2447_v16 }
0x1078   :  { %1624 = vst.msk [vmem:[%s2522_s14 + $0x8] sm:$0xff] %vm91_vm0, %v1622_v55 }
0x1079   :  { %1629 = vsyncpa [#allocation3], 1 }
0x107a   :  { %1630 = vsyncpa [#allocation5], 1 }

// kernel: _lambda_.9
= control target key start
LH: loop header
LB: loop body
LE: loop exit
PB: predicated region body
PF: predicated region fallthrough
CT: control target
= control target key end

     0   :  { %21 = vsyncpa [#allocation4], 0  ;;  %s1340_s0 = inlined_call_operand.vmem [shape: s32[2], index: 0, kind: input, shape index: {}]   ;;  %s1341_s1 = inlined_call_operand.vmem [shape: f32[3], index: 1, kind: input, shape index: {}]   ;;  %s1342_s2 = inlined_call_operand.vmem [shape: f32[16,64], index: 2, kind: input, shape index: {}]   ;;  %s1343_s3 = inlined_call_operand.vmem [shape: f32[1,64], index: 3, kind: input, shape index: {}]   ;;  %s1344_s4 = inlined_call_operand.vmem [shape: f32[1,64], index: 4, kind: input, shape index: {}]   ;;  %s1345_s5 = inlined_call_operand.vmem [shape: bf16[64,32], index: 5, kind: input, shape index: {}]   ;;  %s1346_s6 = inlined_call_operand.vmem [shape: f32[2,32], index: 6, kind: input, shape index: {}]   ;;  %s1347_s7 = inlined_call_operand.vmem [shape: bf16[32,32], index: 7, kind: input, shape index: {}]   ;;  %s1348_s8 = inlined_call_operand.vmem [shape: bf16[32,32], index: 8, kind: input, shape index: {}]   ;;  %s1349_s9 = inlined_call_operand.vmem [shape: f32[1,32], index: 9, kind: input, shape index: {}, may-alias: {9,12}]   ;;  %s1350_s10 = inlined_call_operand.vmem [shape: f32[1,32], index: 10, kind: input, shape index: {}]   ;;  %s1351_s11 = inlined_call_operand.vmem [shape: bf16[32,32], index: 11, kind: input, shape index: {}]   ;;  %s1352_s12 = inlined_call_operand.vmem [shape: f32[1,32], index: 12, kind: input, shape index: {}, may-alias: {9,12}]   ;;  %s1353_s13 = inlined_call_operand.vmem [shape: f32[1,32], index: 13, kind: input, shape index: {}]   ;;  %s1354_s14 = inlined_call_operand.hbm [shape: f32[2,2], index: 14, kind: output, shape index: {0}]   ;;  %s1355_s15 = inlined_call_operand.hbm [shape: f32[1,1], index: 15, kind: output, shape index: {1}]  }
   0x1   :  { %22 = vsyncpa [#allocation6], 0 }
   0x2   :  { %23 = vsyncpa [#allocation3], 0 }
   0x3   :  { %24 = vsyncpa [#allocation9], 0  ;;  %s31_s20 = sshll.u32 %s1340_s0, 4  ;;  %s41_s23 = sshll.u32 %s1341_s1, 4  ;;  %s32_s20 = int_to_ptr.vmem [resolvable:$true] %s31_s20  ;;  %s42_s23 = int_to_ptr.vmem [resolvable:$true] %s41_s23 }
   0x4   :  { %s959_s24 = scalar_lea.vmem %s32_s20, 16  ;;  %p964_p1 = scmp.lt.s32.totalorder %s32_s20, %s32_s20 }
   0x5   :  { %p960_p0 = scmp.ne.s32.totalorder %s32_s20, %s959_s24  ;;  %p965_p2 = scmp.lt.s32.totalorder %s959_s24, %s959_s24 }
   0x7   :  { %p966_p3 = por %p965_p2, %p964_p1 }
   0x9   :  { %p967_p4 = pnand %p966_p3, %p960_p0 }
   0xb   :  { %970 = shalt.err (!%p967_p4)
}
   0xc   :  { %s1035_s25 = smov [#allocation2]   ;;  %s971_s26 = scalar_lea.vmem %s42_s23, 16 }
   0xd   :  { %34 = dma.vmem_to_smem %s32_s20, 16, %s1035_s25, [#allocation4]  }
   0xe   :  { %p972_p5 = scmp.ne.s32.totalorder %s42_s23, %s971_s26  ;;  %p976_p6 = scmp.lt.s32.totalorder %s42_s23, %s42_s23 }
   0xf   :  { %p977_p7 = scmp.lt.s32.totalorder %s971_s26, %s971_s26 }
  0x11   :  { %p978_p8 = por %p977_p7, %p976_p6 }
  0x13   :  { %p979_p9 = pnand %p978_p8, %p972_p5 }
  0x15   :  { %982 = shalt.err (!%p979_p9)
}
  0x16   :  { %s1036_s0 = smov [#allocation5]  }
  0x17   :  { %44 = dma.vmem_to_smem %s42_s23, 16, %s1036_s0, [#allocation6]  }
  0x18   :  { %1027 = dma.done.wait [#allocation4], 16  }
  0x19   :  { %1028 = vsyncadd [#allocation4], 4294967280 }
  0x1a   :  { %1029 = dma.done.wait [#allocation6], 16  }
  0x1b   :  { %1030 = vsyncadd [#allocation6], 4294967280 }
  0x1c   :  { %75 = sfence }
  0x1d   :  { %v80_v0 = vld [vmem:[%s1342_s2] sm:$0xff]  ;;  %vm84_vm0 = vcmask 523264   ;;  %v81_v1 = vld [vmem:[%s1342_s2 + $0x8] sm:$0xff]  ;;  %v1037_v15 = vmov 0.0   ;;  %v923_v17 = vld [vmem:[%s1345_s5 + $0x10] sm:$0xff]   ;;  %vm1038_vm1 = vmmov 0   ;;  %v225_v46 = vlaneseq }
  0x1e   :  { %v85_v2 = vsel %vm84_vm0, %v80_v0, 0.0  ;;  %v88_v3 = vsel %vm84_vm0, %v81_v1, 0.0  ;;  %v921_v14 = vld [vmem:[%s1345_s5] sm:$0xff]   ;;  %870 = vmatprep.subr.bf16.mxu0 %v1037_v15  ;;  %882 = vmatprep.subr.bf16.mxu1 %v1037_v15  ;;  %v922_v16 = vld [vmem:[%s1345_s5 + $0x8] sm:$0xff]   ;;  %v924_v18 = vld [vmem:[%s1345_s5 + $0x18] sm:$0xff]   ;;  %vm207_vm2 = vcmask 261120  }
  0x1f   :  { %86 = vadd.xlane.f32.xlu0 %v85_v2  ;;  %871 = vmatpush3.bf16.msra.mxu0 %v921_v14  ;;  %v824_v27 = vld [vmem:[%s1343_s3] ss:$0 sm:$0xff]  ;;  %v1039_v44 = vmov 1966171168   ;;  %v1172_v48 = vshrl.u32 %v225_v46, 7  ;;  %s831_s16 = sld [smem:[#allocation2 + $0x1]] }
  0x20   :  { %872 = vmatprep.subr.bf16.mxu0 %v1037_v15  ;;  %878 = vmatprep.mubr.msk.bf16.mxu0 %vm1038_vm1, %v1037_v15  ;;  %v825_v31 = vld [vmem:[%s1344_s4] ss:$0 sm:$0xff]  ;;  %v223_v45 = vunpack.c.l.s4 %v1039_v44  ;;  %vm288_vm5 = vcmask 1041409   ;;  %vm790_vm9 = vcmask 9216   ;;  %vm634_vm10 = vcmask 58368  }
  0x21   :  { %886 = vmatprep.mubr.msk.bf16.mxu1 %vm1038_vm1, %v1037_v15  ;;  %v1180_v50 = vld [vmem:[%s1346_s6] sm:$0x3]  ;;  %v1186_v58 = vsub.s32 0, %v1172_v48  ;;  %vm269_vm3 = vcmp.eq.s32.totalorder %v1172_v48, 0  ;;  %vm273_vm4 = vcmp.eq.s32.totalorder %v1172_v48, 1  ;;  %vm390_vm11 = vcmask 254976  }
  0x22   :  { %v224_v47 = vunpack.c.0.s8 %v223_v45 }
  0x23   :  { %89 = vadd.xlane.f32.xlu0 %v88_v3  ;;  %873 = vmatpush3.bf16.msra.mxu0 %v922_v16 }
  0x24   :  { %874 = vmatprep.subr.bf16.mxu0 %v1037_v15  ;;  %v1175_v49 = vsub.s32 %v224_v47, %v1172_v48 }
  0x26   :  { %v228_v54 = vrot.slane %v1180_v50, %v1175_v49 }
  0x27   :  { %875 = vmatpush3.bf16.msra.mxu0 %v923_v17 }
  0x28   :  { %876 = vmatprep.subr.bf16.mxu0 %v1037_v15  ;;  %v229_v56 = vcombine.high %v228_v54, %v228_v54  ;;  %v236_v57 = vrot.slane %v228_v54, %v1175_v49 }
  0x2a   :  { %v243_v59 = vrot.slane %v229_v56, %v1175_v49  ;;  %v247_v60 = vrot.slane %v236_v57, %v1186_v58 }
  0x2b   :  { %877 = vmatpush3.bf16.msra.mxu0 %v924_v18 }
  0x2c   :  { %898 = vmatprep.subr.bf16.mxu0 %v1037_v15  ;;  %v251_v63 = vrot.slane %v243_v59, %v1186_v58 }
  0xac   :  { %v87_v4 = vpop.xlane.xlu0 %86 }
  0xad   :  { %v92_v5 = vmul.f32 0.015625, %v87_v4 }
  0xaf   :  { %v94_v6 = vsub.f32 %v80_v0, %v92_v5 }
  0xb0   :  { %v90_v7 = vpop.xlane.xlu0 %89 }
  0xb1   :  { %v93_v8 = vmul.f32 0.015625, %v90_v7  ;;  %v96_v9 = vmul.f32 %v94_v6, %v94_v6  ;;  %v926_v7 = vld [vmem:[%s1348_s8] sm:$0xff]  }
  0xb3   :  { %v95_v10 = vsub.f32 %v81_v1, %v93_v8  ;;  %v98_v11 = vsel %vm84_vm0, %v96_v9, 0.0  ;;  %v927_v8 = vld [vmem:[%s1351_s11 + $0x8] sm:$0xff]  }
  0xb4   :  { %99 = vadd.xlane.f32.xlu1 %v98_v11  ;;  %v928_v9 = vld [vmem:[%s1348_s8 + $0x8] sm:$0xff]   ;;  %v929_v11 = vld [vmem:[%s1347_s7] sm:$0xff]   ;;  %s77_s8 = sld [smem:[#allocation5]] }
  0xb5   :  { %v97_v12 = vmul.f32 %v95_v10, %v95_v10 }
  0xb7   :  { %v101_v13 = vsel %vm84_vm0, %v97_v12, 0.0  ;;  %v1224_v12 = vand.u32 127, %v225_v46 }
  0xb8   :  { %102 = vadd.xlane.f32.xlu1 %v101_v13 }
  0xb9   :  { %v1231_v16 = vsub.s32 %v1224_v12, %v1172_v48 }
  0xba   :  { %v1226_v13 = vstv %s77_s8 }
 0x141   :  { %v100_v19 = vpop.xlane.xlu1 %99 }
 0x142   :  { %v104_v20 = vmul.f32 0.015625, %v100_v19 }
 0x144   :  { %v106_v21 = vadd.f32 1e-05, %v104_v20  ;;  %v275_v20 = vstv %s831_s16 }
 0x145   :  { %v103_v22 = vpop.xlane.xlu1 %102 }
 0x146   :  { %931 = vrsqrt.f32 %v106_v21  ;;  %v105_v23 = vmul.f32 0.015625, %v103_v22 }
 0x148   :  { %v107_v24 = vadd.f32 1e-05, %v105_v23 }
 0x14a   :  { %933 = vrsqrt.f32 %v107_v24 }
 0x150   :  { %v932_v25 = vpop.eup %931 }
 0x151   :  { %v110_v26 = vmul.f32 %v932_v25, %v94_v6  ;;  %v925_v6 = vld [vmem:[%s1351_s11] sm:$0xff]   ;;  %s270_s11 = sld [smem:[#allocation2]] }
 0x152   :  { %883 = vmatpush3.bf16.msra.mxu1 %v925_v6 }
 0x153   :  { %v118_v30 = vmul.f32 %v824_v27, %v110_v26  ;;  %884 = vmatprep.subr.bf16.mxu1 %v1037_v15 }
 0x154   :  { %v934_v28 = vpop.eup %933 }
 0x155   :  { %v111_v29 = vmul.f32 %v934_v28, %v95_v10  ;;  %v126_v33 = vadd.f32 %v825_v31, %v118_v30  ;;  %v314_v10 = vpack.c.bf16 %v1180_v50, %v1180_v50 }
 0x156   :  { %885 = vmatpush3.bf16.msra.mxu1 %v927_v8 }
 0x157   :  { %v119_v32 = vmul.f32 %v824_v27, %v111_v29  ;;  %890 = vmatprep.subr.bf16.mxu1 %v1037_v15  ;;  %v271_v14 = vstv %s270_s11 }
 0x158   :  { %v272_v19 = vsel %vm269_vm3, %v271_v14, 0 }
 0x159   :  { %v127_v34 = vadd.f32 %v825_v31, %v119_v32  ;;  %887 = vmatmul.mubr.msk.bf16.vlgmr.msra.gmra.mrb[0].mxu1 %vm207_vm2, %v314_v10  ;;  %v276_v23 = vsel %vm273_vm4, %v275_v20, %v272_v19  ;;  %v930_v31 = vld [vmem:[%s1347_s7 + $0x8] sm:$0xff]  }
 0x15a   :  { %891 = vmatpush3.bf16.msra.mxu1 %v929_v11  ;;  %894 = vmatprep.mubr.msk.bf16.mxu1 %vm1038_vm1, %v1037_v15  ;;  %vm277_vm6 = vcmp.lt.s32.totalorder %v1224_v12, %v276_v23  ;;  %v1247_v32 = vadd.s32 4294967295, %v276_v23 }
 0x15b   :  { %v128_v35 = vpack.c.bf16 %v127_v34, %v126_v33  ;;  %892 = vmatprep.subr.bf16.mxu1 %v1037_v15  ;;  %v1250_v33 = vsub.s32 1, %v1172_v48 }
 0x15c   :  { %vm662_vm7 = vcmp.eq.s32.totalorder %v1224_v12, %v1247_v32  ;;  %vm594_vm8 = vcmp.lt.s32.totalorder %v1224_v12, %v1247_v32 }
 0x15d   :  { %879 = vmatmul.mubr.msk.bf16.vlgmr.msra.gmra.mrb[0].mxu0 %vm84_vm0, %v128_v35 }
 0x15e   :  { %902 = vmatprep.mubr.msk.bf16.mxu0 %vm1038_vm1, %v1037_v15  ;;  %899 = vmatpush3.bf16.msra.mxu0 %v926_v7 }
 0x15f   :  { %900 = vmatprep.subr.bf16.mxu0 %v1037_v15  ;;  %893 = vmatpush3.bf16.msra.mxu1 %v930_v31 }
 0x160   :  { %906 = vmatprep.subr.mxu1 %v1037_v15 }
 0x162   :  { %901 = vmatpush3.bf16.msra.mxu0 %v928_v9 }
 0x165   :  { %903 = vmatmul.mubr.msk.bf16.vlgmr.msra.gmra.mrb[4].mxu0 %vm207_vm2, %v314_v10 }
 0x230   :  { %v198_v36 = vpop.f32.mrb[0].mxu0 }
 0x231   :  { %v205_v37 = vmul.f32 %v198_v36, %v198_v36  ;;  %v880_v38 = vpop.f32.mrb[1].mxu0 }
 0x232   :  { %v201_v39 = vpop.f32.mrb[2].mxu0 }
 0x233   :  { %v206_v40 = vmul.f32 %v201_v39, %v201_v39  ;;  %v881_v41 = vpop.f32.mrb[3].mxu0  ;;  %v208_v42 = vsel %vm207_vm2, %v205_v37, 0.0  ;;  %v1257_v37 = vsel %vm662_vm7, 1.0, %v1037_v15 }
 0x234   :  { %209 = vadd.xlane.f32.xlu0 %v208_v42  ;;  %v684_v38 = vrot.slane %v1257_v37, %v1186_v58 }
 0x235   :  { %v211_v43 = vsel %vm207_vm2, %v206_v40, 0.0  ;;  %v1263_v40 = vpop.f32.mrb[0].mxu1 }
 0x236   :  { %212 = vadd.xlane.f32.xlu1 %v211_v43  ;;  %v888_v42 = vpop.f32.mrb[1].mxu1 }
 0x237   :  { %v378_v44 = vpop.f32.mrb[2].mxu1 }
 0x238   :  { %v520_v41 = vpop.f32.mrb[4].mxu0  ;;  %v889_v46 = vpop.f32.mrb[3].mxu1 }
 0x239   :  { %v904_v43 = vpop.f32.mrb[5].mxu0 }
 0x23a   :  { %v523_v45 = vpop.f32.mrb[6].mxu0 }
 0x23b   :  { %v905_v47 = vpop.f32.mrb[7].mxu0  ;;  %v1040_v45 = vmov 0  }
 0x23c   :  { %919 = vset.pattern.permute.xlu1 %v1040_v45  ;;  %920 = vset.pattern.permute.xlu0 %v1040_v45 }
 0x2c1   :  { %v210_v51 = vpop.xlane.xlu0 %209 }
 0x2c2   :  { %v214_v52 = vadd.f32 1e-12, %v210_v51 }
 0x2c3   :  { %v213_v53 = vpop.xlane.xlu1 %212 }
 0x2c4   :  { %935 = vrsqrt.f32 %v214_v52  ;;  %v215_v55 = vadd.f32 1e-12, %v213_v53 }
 0x2c6   :  { %937 = vrsqrt.f32 %v215_v55 }
 0x2ce   :  { %v936_v61 = vpop.eup %935 }
 0x2cf   :  { %v1190_v62 = vmul.f32 %v936_v61, %v198_v36 }
 0x2d0   :  { %v938_v0 = vpop.eup %937 }
 0x2d1   :  { %v254_v1 = vmul.f32 %v247_v60, %v1190_v62  ;;  %v1194_v2 = vmul.f32 %v938_v0, %v201_v39  ;;  %v691_v39 = vrot.slane %v1257_v37, %v1250_v33 }
 0x2d3   :  { %v256_v3 = vsel %vm207_vm2, %v254_v1, 0.0  ;;  %v255_v4 = vmul.f32 %v251_v63, %v1194_v2 }
 0x2d4   :  { %257 = vadd.xlane.f32.xlu0 %v256_v3 }
 0x2d5   :  { %v259_v5 = vsel %vm207_vm2, %v255_v4, 0.0 }
 0x2d6   :  { %260 = vadd.xlane.f32.xlu1 %v259_v5 }
 0x361   :  { %v258_v17 = vpop.xlane.xlu0 %257 }
 0x362   :  { %v263_v18 = vmul.f32 %v1226_v13, %v258_v17 }
 0x363   :  { %v261_v21 = vpop.xlane.xlu1 %260 }
 0x364   :  { %v264_v22 = vmul.f32 %v1226_v13, %v261_v21  ;;  %v283_v24 = vrot.slane %v263_v18, %v1231_v16 }
 0x366   :  { %v287_v25 = vrot.slane %v264_v22, %v1231_v16 }
 0x368   :  { %v289_v26 = vsel %vm288_vm5, %v287_v25, %v283_v24 }
 0x369   :  { %v1240_v27 = vsel %vm277_vm6, %v289_v26, -1e+30 }
 0x36a   :  { %v832_v28 = vmul.f32 -1.442695, %v1240_v27  ;;  %v650_v46 = vsel %vm634_vm10, %v1240_v27, -inf }
 0x36c   :  { %939 = vpow2.f32 %v832_v28  ;;  %v846_v28 = vld [vmem:[%s1350_s10] ss:$0 sm:$0xff] }
 0x376   :  { %v940_v29 = vpop.eup %939 }
 0x377   :  { %v295_v30 = vadd.f32 1.0, %v940_v29 }
 0x379   :  { %941 = vrcp.f32 %v295_v30 }
 0x383   :  { %v942_v34 = vpop.eup %941 }
 0x384   :  { %v308_v35 = vrot.slane %v942_v34, %v1250_v33  ;;  %v301_v36 = vrot.slane %v942_v34, %v1186_v58 }
 0x386   :  { %310 = vbcast.lane.b32.xlu1 %v308_v35, 256  ;;  %303 = vbcast.lane.b32.xlu0 %v301_v36, 256 }
 0x38a   :  { %686 = vbcast.lane.b32.xlu1 %v684_v38, 256 }
 0x38e   :  { %693 = vbcast.lane.b32.xlu1 %v691_v39, 256 }
 0x3f8   :  { %v311_v48 = vpop.permute.xlu1 %310  ;;  %v304_v51 = vpop.permute.xlu0 %303 }
 0x3f9   :  { %v313_v52 = vmul.f32 %v311_v48, %v1194_v2  ;;  %v312_v53 = vmul.f32 %v304_v51, %v1190_v62 }
 0x3fb   :  { %v402_v54 = vpack.c.bf16 %v313_v52, %v312_v53 }
 0x3fc   :  { %v687_v55 = vpop.permute.xlu1 %686 }
 0x3fd   :  { %v695_v56 = vmul.f32 %v687_v55, %v1190_v62  ;;  %895 = vmatmul.mubr.msk.bf16.vlgmr.msra.gmra.mrb[4].mxu1 %vm207_vm2, %v402_v54 }
 0x3fe   :  { %907 = vmatpush3.xpose.msk.msra.mxu1 %vm207_vm2, %v1180_v50  ;;  %908 = vmatprep.mubr.msk.f32.mxu1 %vm1038_vm1, %v1037_v15 }
 0x3ff   :  { %v697_v57 = vsel %vm207_vm2, %v695_v56, 0.0 }
 0x400   :  { %v698_v59 = vrot.slane %v697_v57, 4  ;;  %v694_v60 = vpop.permute.xlu1 %693 }
 0x401   :  { %v696_v61 = vmul.f32 %v694_v60, %v1194_v2  ;;  %v842_v2 = vld [vmem:[%s1349_s9] ss:$0 sm:$0xff]  ;;  %s822_s9 = sld [smem:[#allocation5 + $0x1]] }
 0x402   :  { %v699_v63 = vadd.f32 %v698_v59, %v697_v57  ;;  %v521_v17 = vadd.f32 %v842_v2, %v520_v41  ;;  %v850_v41 = vsel %vm594_vm8, 1.0, %v1037_v15 }
 0x403   :  { %v704_v0 = vsel %vm207_vm2, %v696_v61, 0.0  ;;  %v608_v43 = vrot.slane %v850_v41, %v1250_v33  ;;  %v601_v44 = vrot.slane %v850_v41, %v1186_v58 }
 0x404   :  { %v700_v1 = vrot.slane %v699_v63, 2  ;;  %v705_v3 = vrot.slane %v704_v0, 4  ;;  %v533_v18 = vrot.slane %v521_v17, %v1175_v49  ;;  %v665_v17 = vmul.f32 %v1257_v37, %v1240_v27 }
 0x406   :  { %v701_v62 = vadd.f32 %v700_v1, %v699_v63  ;;  %v706_v4 = vadd.f32 %v705_v3, %v704_v0  ;;  %v534_v19 = vcombine.high %v533_v18, %v533_v18  ;;  %v541_v20 = vrot.slane %v533_v18, %v1175_v49  ;;  %v833_v1 = vld [vmem:[%s1352_s12] ss:$0 sm:$0xff]  ;;  %s1041_s12 = smov [#allocation7]  }
 0x407   :  { %v578_v12 = vstv %s822_s9  ;;  %v666_v18 = vsel %vm634_vm10, %v665_v17, 0.0 }
 0x408   :  { %v702_v5 = vrot.slane %v701_v62, 1  ;;  %v707_v6 = vrot.slane %v706_v4, 2  ;;  %v548_v21 = vrot.slane %v534_v19, %v1175_v49  ;;  %v552_v22 = vrot.slane %v541_v20, %v1186_v58 }
 0x40a   :  { %v708_v7 = vadd.f32 %v707_v6, %v706_v4  ;;  %v703_v50 = vadd.f32 %v702_v5, %v701_v62  ;;  %v376_v62 = vadd.f32 %v833_v1, %v1263_v40  ;;  %v837_v5 = vld [vmem:[%s1353_s13] ss:$0 sm:$0xff]  ;;  %s798_s13 = sshll.u32 %s1041_s12, 4  ;;  %s799_s13 = int_to_ptr.vmem [resolvable:$true] %s798_s13 }
 0x40b   :  { %s983_s24 = scalar_lea.vmem %s799_s13, 32  ;;  %p988_p11 = scmp.lt.s32.totalorder %s799_s13, %s799_s13 }
 0x40c   :  { %v709_v8 = vrot.slane %v708_v7, 1  ;;  %v711_v10 = vmul.f32 %v703_v50, %v1226_v13  ;;  %v381_v4 = vmax.f32 %v376_v62, 0.0  ;;  %p984_p10 = scmp.ne.s32.totalorder %s799_s13, %s983_s24  ;;  %p989_p12 = scmp.lt.s32.totalorder %s983_s24, %s983_s24 }
 0x40e   :  { %v710_v9 = vadd.f32 %v709_v8, %v708_v7  ;;  %v389_v6 = vmul.f32 %v837_v5, %v381_v4  ;;  %p990_p13 = por %p989_p12, %p988_p11 }
 0x410   :  { %v712_v11 = vmul.f32 %v710_v9, %v1226_v13  ;;  %v556_v13 = vrot.slane %v548_v21, %v1186_v58  ;;  %v391_v8 = vsel %vm390_vm11, %v389_v6, 0.0  ;;  %p991_p0 = pnand %p990_p13, %p984_p10 }
 0x412   :  { %v715_v14 = vsel %vm288_vm5, %v712_v11, %v711_v10 }
 0x413   :  { %909 = vmatmul.mubr.msk.f32.vlgmr.msra.gmra.mrb[8].mxu1 %vm207_vm2, %v715_v14 }
 0x4d0   :  { %v456_v23 = vpop.f32.mrb[4].mxu1 }
 0x4d1   :  { %v559_v24 = vadd.f32 %v552_v22, %v456_v23  ;;  %v896_v25 = vpop.f32.mrb[5].mxu1 }
 0x4d2   :  { %v459_v26 = vpop.f32.mrb[6].mxu1 }
 0x4d3   :  { %v561_v29 = vmax.f32 %v559_v24, 0.0  ;;  %v560_v30 = vadd.f32 %v556_v13, %v459_v26  ;;  %v897_v31 = vpop.f32.mrb[7].mxu1 }
 0x4d5   :  { %v562_v34 = vmax.f32 %v560_v30, 0.0  ;;  %v570_v35 = vmul.f32 %v846_v28, %v561_v29 }
 0x4d7   :  { %v572_v36 = vsel %vm207_vm2, %v570_v35, 0.0  ;;  %v571_v49 = vmul.f32 %v846_v28, %v562_v34 }
 0x4d8   :  { %573 = vadd.xlane.f32.xlu0 %v572_v36 }
 0x4d9   :  { %v575_v38 = vsel %vm207_vm2, %v571_v49, 0.0 }
 0x4da   :  { %576 = vadd.xlane.f32.xlu1 %v575_v38 }
 0x4e6   :  { %v786_v39 = vpop.f32.mrb[8].mxu1 }
 0x4e7   :  { %v910_v42 = vpop.f32.mrb[9].mxu1  ;;  %791 = vst.msk [vmem:[#allocation7] sm:$0x3] %vm790_vm9, %v786_v39 }
 0x4eb   :  { %610 = vbcast.lane.b32.xlu1 %v608_v43, 256 }
 0x4ee   :  { %603 = vbcast.lane.b32.xlu0 %v601_v44, 256 }
 0x50d   :  { %651 = vmax.xlane.f32.xlu0 %v650_v46 }
 0x565   :  { %v574_v32 = vpop.xlane.xlu0 %573 }
 0x566   :  { %v579_v15 = vadd.f32 %v578_v12, %v574_v32 }
 0x567   :  { %v577_v47 = vpop.xlane.xlu1 %576 }
 0x568   :  { %v847_v48 = vmul.f32 -1.442695, %v579_v15  ;;  %v580_v33 = vadd.f32 %v578_v12, %v577_v47 }
 0x569   :  { %v604_v55 = vpop.permute.xlu0 %603 }
 0x56a   :  { %943 = vpow2.f32 %v847_v48  ;;  %v848_v51 = vmul.f32 -1.442695, %v580_v33 }
 0x56b   :  { %v611_v60 = vpop.permute.xlu1 %610 }
 0x56c   :  { %945 = vpow2.f32 %v848_v51 }
 0x574   :  { %v944_v58 = vpop.eup %943 }
 0x575   :  { %v587_v52 = vadd.f32 1.0, %v944_v58 }
 0x576   :  { %v946_v53 = vpop.eup %945 }
 0x577   :  { %947 = vrcp.f32 %v587_v52  ;;  %v588_v54 = vadd.f32 1.0, %v946_v53 }
 0x579   :  { %949 = vrcp.f32 %v588_v54 }
 0x581   :  { %v948_v56 = vpop.eup %947 }
 0x582   :  { %v614_v57 = vmul.f32 %v948_v56, %v604_v55 }
 0x583   :  { %v950_v59 = vpop.eup %949 }
 0x584   :  { %619 = vperm.xlu1 %919, %v614_v57   ;;  %v615_v61 = vmul.f32 %v950_v59, %v611_v60 }
 0x588   :  { %622 = vperm.xlu1 %919, %v615_v61  }
 0x59a   :  { %v652_v63 = vpop.xlane.xlu0 %651 }
 0x59b   :  { %v653_v0 = vsub.f32 %v1240_v27, %v652_v63 }
 0x59d   :  { %v654_v3 = vmul.f32 1.442695, %v653_v0 }
 0x59f   :  { %951 = vpow2.f32 %v654_v3 }
 0x5a9   :  { %v952_v7 = vpop.eup %951 }
 0x5aa   :  { %v656_v50 = vsel %vm634_vm10, %v952_v7, 0.0 }
 0x5ab   :  { %657 = vadd.xlane.f32.xlu0 %v656_v50 }
 0x5ac   :  { %392 = vadd.xlane.f32.xlu1 %v391_v8 }
 0x603   :  { %v620_v9 = vpop.permute.xlu1 %619 }
 0x604   :  { %v627_v11 = vrot.slane %v620_v9, %v1231_v16 }
 0x607   :  { %v623_v10 = vpop.permute.xlu1 %622 }
 0x608   :  { %v631_v40 = vrot.slane %v623_v10, %v1231_v16 }
 0x60a   :  { %v632_v14 = vsel %vm288_vm5, %v631_v40, %v627_v11 }
 0x60b   :  { %v635_v2 = vsel %vm634_vm10, %v632_v14, 0.0 }
 0x60c   :  { %636 = vadd.xlane.f32.xlu0 %v635_v2 }
 0x610   :  { %667 = vadd.xlane.f32.xlu0 %v666_v18 }
 0x611   :  { %994 = shalt.err (!%p991_p0)
}
 0x612   :  { %s995_s6 = scalar_lea.hbm %s1354_s14, 32 }
 0x613   :  { %p996_p1 = scmp.ne.s32.totalorder %s1354_s14, %s995_s6  ;;  %p999_p2 = scmp.lt.u32.totalorder %s995_s6, %s1354_s14 }
 0x615   :  { %p1001_p3 = pnand %p999_p2, %p996_p1 }
 0x617   :  { %1004 = shalt.err (!%p1001_p3)
}
 0x618   :  { %801 = dma.vmem_to_hbm [thread:$0]  %s799_s13, 32, %s1354_s14, [#allocation3]   ;;  %vm640_vm12 = vcmask 1041408   ;;  %vm679_vm13 = vcmask 0  }
 0x619   :  { %s823_s29 = sld [smem:[#allocation5 + $0x2]]  ;;  %s1042_s14 = smov [#allocation8]  }
 0x61a   :  { %s808_s2 = sshll.u32 %s1042_s14, 4  ;;  %s809_s2 = int_to_ptr.vmem [resolvable:$true] %s808_s2 }
 0x61b   :  { %s1005_s30 = scalar_lea.vmem %s809_s2, 16  ;;  %s1009_s8 = scalar_lea.vmem %s809_s2, 32 }
 0x61c   :  { %p1006_p4 = scmp.ne.s32.totalorder %s809_s2, %s1005_s30  ;;  %p1010_p5 = scmp.lt.s32.totalorder %s809_s2, %s809_s2 }
 0x61d   :  { %p1011_p6 = scmp.lt.s32.totalorder %s1009_s8, %s1005_s30 }
 0x61f   :  { %v394_v16 = vstv %s823_s29  ;;  %p1012_p7 = por %p1011_p6, %p1010_p5 }
 0x621   :  { %p1013_p8 = pnand %p1012_p7, %p1006_p4 }
 0x638   :  { %v658_v21 = vpop.xlane.xlu0 %657 }
 0x639   :  { %v393_v27 = vpop.xlane.xlu1 %392 }
 0x63a   :  { %v395_v37 = vadd.f32 %v394_v16, %v393_v27 }
 0x63c   :  { %v838_v19 = vmul.f32 -1.442695, %v395_v37 }
 0x63e   :  { %953 = vpow2.f32 %v838_v19 }
 0x63f   :  { %955 = vlog2.f32 %v658_v21 }
 0x648   :  { %v954_v20 = vpop.eup %953 }
 0x649   :  { %v399_v22 = vadd.f32 1.0, %v954_v20  ;;  %v956_v13 = vpop.eup %955 }
 0x64a   :  { %v660_v23 = vmul.f32 0.6931472, %v956_v13 }
 0x64b   :  { %957 = vrcp.f32 %v399_v22 }
 0x64c   :  { %v661_v29 = vadd.f32 %v660_v23, %v652_v63 }
 0x655   :  { %v958_v24 = vpop.eup %957 }
 0x699   :  { %v637_v25 = vpop.xlane.xlu0 %636 }
 0x69a   :  { %v638_v26 = vsub.f32 %v637_v25, %v958_v24 }
 0x69c   :  { %v639_v28 = vmul.f32 %v638_v26, %v638_v26 }
 0x69d   :  { %v668_v30 = vpop.xlane.xlu0 %667 }
 0x69e   :  { %v641_v31 = vsel %vm640_vm12, %v639_v28, 0.0  ;;  %v669_v34 = vsub.f32 %v661_v29, %v668_v30 }
 0x69f   :  { %v642_v35 = vrot.slane %v641_v31, 4 }
 0x6a0   :  { %v670_v36 = vsel %vm640_vm12, %v669_v34, 0.0 }
 0x6a1   :  { %v643_v49 = vadd.f32 %v642_v35, %v641_v31  ;;  %v671_v38 = vrot.slane %v670_v36, 4 }
 0x6a3   :  { %v644_v39 = vrot.slane %v643_v49, 2  ;;  %v672_v41 = vadd.f32 %v671_v38, %v670_v36 }
 0x6a5   :  { %v645_v42 = vadd.f32 %v644_v39, %v643_v49  ;;  %v673_v43 = vrot.slane %v672_v41, 2 }
 0x6a7   :  { %v674_v44 = vadd.f32 %v673_v43, %v672_v41  ;;  %v646_v45 = vrot.slane %v645_v42, 1 }
 0x6a9   :  { %v647_v46 = vadd.f32 %v646_v45, %v645_v42  ;;  %v675_v12 = vrot.slane %v674_v44, 1 }
 0x6ab   :  { %v676_v32 = vadd.f32 %v675_v12, %v674_v44  ;;  %v649_v15 = vmul.f32 0.5, %v647_v46 }
 0x6ad   :  { %v677_v47 = vmul.f32 0.5, %v676_v32 }
 0x6af   :  { %v678_v48 = vadd.f32 %v677_v47, %v649_v15 }
 0x6b1   :  { %680 = vst.msk [vmem:[#allocation8] sm:$0x1] %vm679_vm13, %v678_v48 }
 0x6b2   :  { %1016 = shalt.err (!%p1013_p8)
}
 0x6b3   :  { %s1017_s17 = scalar_lea.hbm %s1355_s15, 16 }
 0x6b4   :  { %p1018_p9 = scmp.ne.s32.totalorder %s1355_s15, %s1017_s17  ;;  %p1021_p10 = scmp.lt.u32.totalorder %s1017_s17, %s1355_s15 }
 0x6b6   :  { %p1023_p11 = pnand %p1021_p10, %p1018_p9 }
 0x6b8   :  { %1026 = shalt.err (!%p1023_p11)
}
 0x6b9   :  { %811 = dma.vmem_to_hbm [thread:$0]  %s809_s2, 16, %s1355_s15, [#allocation9]  }
 0x6ba   :  { %1031 = dma.done.wait [#allocation3], 32  }
 0x6bb   :  { %1032 = vsyncadd [#allocation3], 4294967264 }
 0x6bc   :  { %1033 = dma.done.wait [#allocation9], 16  }
 0x6bd   :  { %1034 = vsyncadd [#allocation9], 4294967280 }
 0x6be   :  { %818 = vsyncpa [#allocation3], 1 }
 0x6bf   :  { %819 = vsyncpa [#allocation9], 1 }
 0x6c0   :  { %820 = vsyncpa [#allocation4], 1 }
 0x6c1   :  { %821 = vsyncpa [#allocation6], 1 }

// kernel: _lambda_.8
= control target key start
LH: loop header
LB: loop body
LE: loop exit
PB: predicated region body
PF: predicated region fallthrough
CT: control target
= control target key end

     0   :  { %vm132_vm0 = vcmask 58368   ;;  %v34_v0 = vlaneseq  ;;  %vm512_vm1 = vcmask 1041409   ;;  %vm2862_vm2 = vcmask 254976   ;;  %s4953_s1 = inlined_call_operand.vmem [shape: f32[2,8], index: 1, kind: input, shape index: {}]   ;;  %s4954_s2 = inlined_call_operand.vmem [shape: bf16[768,768], index: 2, kind: input, shape index: {}]   ;;  %s4955_s0 = inlined_call_operand.vmem [shape: f32[2,8,768], index: 0, kind: input, shape index: {}]   ;;  %s4956_s4 = inlined_call_operand.vmem [shape: bf16[768,32], index: 4, kind: input, shape index: {}]   ;;  %s4957_s3 = inlined_call_operand.vmem [shape: f32[1,768], index: 3, kind: input, shape index: {}]   ;;  %s4958_s5 = inlined_call_operand.vmem [shape: f32[2,32], index: 5, kind: output, shape index: {}]  }
   0x1   :  { %v33_v1 = vld [vmem:[%s4953_s1] sm:$0x3]  ;;  %v3304_v4 = vld [vmem:[%s4954_s2 + $0x4] ss:$24 sps:$4 sm:$0xff]   ;;  %v3310_v9 = vld [vmem:[%s4954_s2 + $0x34] ss:$24 sps:$4 sm:$0xff]  }
   0x2   :  { %v133_v2 = vsel %vm132_vm0, %v33_v1, 0.0  ;;  %v3835_v3 = vshrl.u32 %v34_v0, 7  ;;  %v3306_v5 = vld [vmem:[%s4954_s2 + $0x304] ss:$24 sps:$4 sm:$0xff]   ;;  %v3308_v6 = vld [vmem:[%s4954_s2] ss:$24 sps:$4 sm:$0xff]   ;;  %1976 = vmatprep.subr.bf16.mxu1 %v3304_v4 }
   0x3   :  { %134 = vadd.xlane.f32.xlu0 %v133_v2  ;;  %v3309_v7 = vld [vmem:[%s4954_s2 + $0x300] ss:$24 sps:$4 sm:$0xff]   ;;  %2017 = vmatprep.subr.bf16.mxu0 %v3306_v5  ;;  %v3312_v10 = vld [vmem:[%s4954_s2 + $0x334] ss:$24 sps:$4 sm:$0xff]   ;;  %v3314_v12 = vld [vmem:[%s4954_s2 + $0x30] ss:$24 sps:$4 sm:$0xff]  }
   0x4   :  { %v36_v8 = vsub.s32 0, %v3835_v3  ;;  %1977 = vmatpush1.bf16.msra.mxu1 %v3308_v6  ;;  %2018 = vmatpush1.bf16.msra.mxu0 %v3309_v7  ;;  %v3315_v13 = vld [vmem:[%s4954_s2 + $0x330] ss:$24 sps:$4 sm:$0xff]   ;;  %v3316_v14 = vld [vmem:[%s4954_s2 + $0x64] ss:$24 sps:$4 sm:$0xff]   ;;  %v43_v25 = vsub.s32 1, %v3835_v3 }
   0x5   :  { %1978 = vmatprep.subr.bf16.mxu1 %v3310_v9  ;;  %2019 = vmatprep.subr.bf16.mxu0 %v3312_v10  ;;  %v3318_v15 = vld [vmem:[%s4954_s2 + $0x364] ss:$24 sps:$4 sm:$0xff]   ;;  %v3320_v16 = vld [vmem:[%s4954_s2 + $0x60] ss:$24 sps:$4 sm:$0xff]   ;;  %v3322_v18 = vld [vmem:[%s4954_s2 + $0x94] ss:$24 sps:$4 sm:$0xff]  }
   0x6   :  { %v37_v11 = vrot.slane %v33_v1, %v36_v8  ;;  %v3321_v17 = vld [vmem:[%s4954_s2 + $0x360] ss:$24 sps:$4 sm:$0xff]   ;;  %v3324_v19 = vld [vmem:[%s4954_s2 + $0x394] ss:$24 sps:$4 sm:$0xff]   ;;  %v3326_v20 = vld [vmem:[%s4954_s2 + $0x90] ss:$24 sps:$4 sm:$0xff]   ;;  %v44_v29 = vrot.slane %v33_v1, %v43_v25 }
   0x7   :  { %v3327_v21 = vld [vmem:[%s4954_s2 + $0x390] ss:$24 sps:$4 sm:$0xff]   ;;  %v3328_v22 = vld [vmem:[%s4954_s2 + $0xc4] ss:$24 sps:$4 sm:$0xff]   ;;  %v3332_v24 = vld [vmem:[%s4954_s2 + $0xc0] ss:$24 sps:$4 sm:$0xff]  }
   0x8   :  { %39 = vbcast.lane.b32.xlu1 %v37_v11, 256  ;;  %1979 = vmatpush1.bf16.msra.mxu1 %v3314_v12  ;;  %v3330_v23 = vld [vmem:[%s4954_s2 + $0x3c4] ss:$24 sps:$4 sm:$0xff]   ;;  %v3333_v26 = vld [vmem:[%s4954_s2 + $0x3c0] ss:$24 sps:$4 sm:$0xff]   ;;  %v22_v12 = vld [vmem:[%s4955_s0 + $0x8] sm:$0xff] }
   0x9   :  { %2020 = vmatpush1.bf16.msra.mxu0 %v3315_v13  ;;  %1980 = vmatprep.subr.bf16.mxu1 %v3316_v14  ;;  %v3334_v27 = vld [vmem:[%s4954_s2 + $0xf4] ss:$24 sps:$4 sm:$0xff]   ;;  %v3338_v30 = vld [vmem:[%s4954_s2 + $0xf0] ss:$24 sps:$4 sm:$0xff]   ;;  %v3340_v32 = vld [vmem:[%s4954_s2 + $0x124] ss:$24 sps:$4 sm:$0xff]  }
   0xa   :  { %2021 = vmatprep.subr.bf16.mxu0 %v3318_v15  ;;  %v3336_v28 = vld [vmem:[%s4954_s2 + $0x3f4] ss:$24 sps:$4 sm:$0xff]   ;;  %v3339_v31 = vld [vmem:[%s4954_s2 + $0x3f0] ss:$24 sps:$4 sm:$0xff]   ;;  %v3342_v33 = vld [vmem:[%s4954_s2 + $0x424] ss:$24 sps:$4 sm:$0xff]  }
   0xb   :  { %v3344_v34 = vld [vmem:[%s4954_s2 + $0x120] ss:$24 sps:$4 sm:$0xff]   ;;  %v3346_v36 = vld [vmem:[%s4954_s2 + $0x154] ss:$24 sps:$4 sm:$0xff]   ;;  %v3350_v38 = vld [vmem:[%s4954_s2 + $0x150] ss:$24 sps:$4 sm:$0xff]  }
   0xc   :  { %1981 = vmatpush1.bf16.msra.mxu1 %v3320_v16  ;;  %v3345_v35 = vld [vmem:[%s4954_s2 + $0x420] ss:$24 sps:$4 sm:$0xff]   ;;  %v3348_v37 = vld [vmem:[%s4954_s2 + $0x454] ss:$24 sps:$4 sm:$0xff]   ;;  %v3351_v39 = vld [vmem:[%s4954_s2 + $0x450] ss:$24 sps:$4 sm:$0xff]  }
   0xd   :  { %2022 = vmatpush1.bf16.msra.mxu0 %v3321_v17  ;;  %1982 = vmatprep.subr.bf16.mxu1 %v3322_v18  ;;  %v3352_v40 = vld [vmem:[%s4954_s2 + $0x184] ss:$24 sps:$4 sm:$0xff]   ;;  %v3356_v42 = vld [vmem:[%s4954_s2 + $0x180] ss:$24 sps:$4 sm:$0xff]   ;;  %v3358_v44 = vld [vmem:[%s4954_s2 + $0x1b4] ss:$24 sps:$4 sm:$0xff]  }
   0xe   :  { %2023 = vmatprep.subr.bf16.mxu0 %v3324_v19  ;;  %v3354_v41 = vld [vmem:[%s4954_s2 + $0x484] ss:$24 sps:$4 sm:$0xff]   ;;  %v3357_v43 = vld [vmem:[%s4954_s2 + $0x480] ss:$24 sps:$4 sm:$0xff]   ;;  %v3360_v45 = vld [vmem:[%s4954_s2 + $0x4b4] ss:$24 sps:$4 sm:$0xff]  }
   0xf   :  { %v3362_v46 = vld [vmem:[%s4954_s2 + $0x1b0] ss:$24 sps:$4 sm:$0xff]   ;;  %v3364_v48 = vld [vmem:[%s4954_s2 + $0x1e4] ss:$24 sps:$4 sm:$0xff]   ;;  %v3368_v50 = vld [vmem:[%s4954_s2 + $0x1e0] ss:$24 sps:$4 sm:$0xff]  }
  0x10   :  { %1983 = vmatpush1.bf16.msra.mxu1 %v3326_v20  ;;  %v3363_v47 = vld [vmem:[%s4954_s2 + $0x4b0] ss:$24 sps:$4 sm:$0xff]   ;;  %v3366_v49 = vld [vmem:[%s4954_s2 + $0x4e4] ss:$24 sps:$4 sm:$0xff]   ;;  %v3369_v51 = vld [vmem:[%s4954_s2 + $0x4e0] ss:$24 sps:$4 sm:$0xff]  }
  0x11   :  { %2024 = vmatpush1.bf16.msra.mxu0 %v3327_v21  ;;  %1984 = vmatprep.subr.bf16.mxu1 %v3328_v22  ;;  %v3370_v52 = vld [vmem:[%s4954_s2 + $0x214] ss:$24 sps:$4 sm:$0xff]   ;;  %v3374_v54 = vld [vmem:[%s4954_s2 + $0x210] ss:$24 sps:$4 sm:$0xff]   ;;  %v3376_v56 = vld [vmem:[%s4954_s2 + $0x244] ss:$24 sps:$4 sm:$0xff]  }
  0x12   :  { %2025 = vmatprep.subr.bf16.mxu0 %v3330_v23  ;;  %v3372_v53 = vld [vmem:[%s4954_s2 + $0x514] ss:$24 sps:$4 sm:$0xff]   ;;  %v3375_v55 = vld [vmem:[%s4954_s2 + $0x510] ss:$24 sps:$4 sm:$0xff]   ;;  %v3378_v57 = vld [vmem:[%s4954_s2 + $0x544] ss:$24 sps:$4 sm:$0xff]  }
  0x13   :  { %v3380_v58 = vld [vmem:[%s4954_s2 + $0x240] ss:$24 sps:$4 sm:$0xff]   ;;  %v3382_v60 = vld [vmem:[%s4954_s2 + $0x274] ss:$24 sps:$4 sm:$0xff]   ;;  %v3386_v62 = vld [vmem:[%s4954_s2 + $0x270] ss:$24 sps:$4 sm:$0xff]  }
  0x14   :  { %1985 = vmatpush1.bf16.msra.mxu1 %v3332_v24  ;;  %v3381_v59 = vld [vmem:[%s4954_s2 + $0x540] ss:$24 sps:$4 sm:$0xff]   ;;  %v3384_v61 = vld [vmem:[%s4954_s2 + $0x574] ss:$24 sps:$4 sm:$0xff]   ;;  %v3387_v63 = vld [vmem:[%s4954_s2 + $0x570] ss:$24 sps:$4 sm:$0xff]  }
  0x15   :  { %2026 = vmatpush1.bf16.msra.mxu0 %v3333_v26  ;;  %1986 = vmatprep.subr.bf16.mxu1 %v3334_v27  ;;  %v3388_v0 = vld [vmem:[%s4954_s2 + $0x2a4] ss:$24 sps:$4 sm:$0xff]   ;;  %v3392_v2 = vld [vmem:[%s4954_s2 + $0x2a0] ss:$24 sps:$4 sm:$0xff]   ;;  %v3394_v5 = vld [vmem:[%s4954_s2 + $0x2d4] ss:$24 sps:$4 sm:$0xff]  }
  0x16   :  { %2027 = vmatprep.subr.bf16.mxu0 %v3336_v28  ;;  %v3390_v1 = vld [vmem:[%s4954_s2 + $0x5a4] ss:$24 sps:$4 sm:$0xff]   ;;  %v3393_v4 = vld [vmem:[%s4954_s2 + $0x5a0] ss:$24 sps:$4 sm:$0xff]   ;;  %v3396_v6 = vld [vmem:[%s4954_s2 + $0x5d4] ss:$24 sps:$4 sm:$0xff]  }
  0x17   :  { %v3398_v7 = vld [vmem:[%s4954_s2 + $0x2d0] ss:$24 sps:$4 sm:$0xff]   ;;  %v3402_v10 = vld [vmem:[%s4954_s2 + $0x604] ss:$24 sps:$4 sm:$0xff]  }
  0x18   :  { %1987 = vmatpush1.bf16.msra.mxu1 %v3338_v30  ;;  %v3399_v9 = vld [vmem:[%s4954_s2 + $0x5d0] ss:$24 sps:$4 sm:$0xff]   ;;  %v3405_v11 = vld [vmem:[%s4954_s2 + $0xc] ss:$24 sps:$4 sm:$0xff]   ;;  %v24_v15 = vld [vmem:[%s4955_s0 + $0x18] sm:$0xff] }
  0x19   :  { %46 = vbcast.lane.b32.xlu0 %v44_v29, 256  ;;  %2028 = vmatpush1.bf16.msra.mxu0 %v3339_v31  ;;  %v21_v14 = vld [vmem:[%s4955_s0] sm:$0xff]  ;;  %v23_v16 = vld [vmem:[%s4955_s0 + $0x10] sm:$0xff]  ;;  %v26_v17 = vld [vmem:[%s4955_s0 + $0x28] sm:$0xff] }
  0x1a   :  { %1988 = vmatprep.subr.bf16.mxu1 %v3340_v32  ;;  %2029 = vmatprep.subr.bf16.mxu0 %v3342_v33  ;;  %v25_v23 = vld [vmem:[%s4955_s0 + $0x20] sm:$0xff] }
  0x1c   :  { %1989 = vmatpush1.bf16.msra.mxu1 %v3344_v34 }
  0x1d   :  { %2030 = vmatpush1.bf16.msra.mxu0 %v3345_v35  ;;  %1990 = vmatprep.subr.bf16.mxu1 %v3346_v36 }
  0x1e   :  { %2031 = vmatprep.subr.bf16.mxu0 %v3348_v37 }
  0x20   :  { %1991 = vmatpush1.bf16.msra.mxu1 %v3350_v38 }
  0x21   :  { %2032 = vmatpush1.bf16.msra.mxu0 %v3351_v39  ;;  %1992 = vmatprep.subr.bf16.mxu1 %v3352_v40 }
  0x22   :  { %2033 = vmatprep.subr.bf16.mxu0 %v3354_v41 }
  0x24   :  { %1993 = vmatpush1.bf16.msra.mxu1 %v3356_v42 }
  0x25   :  { %2034 = vmatpush1.bf16.msra.mxu0 %v3357_v43  ;;  %1994 = vmatprep.subr.bf16.mxu1 %v3358_v44 }
  0x26   :  { %2035 = vmatprep.subr.bf16.mxu0 %v3360_v45  ;;  %v27_v45 = vld [vmem:[%s4955_s0 + $0x30] sm:$0xff] }
  0x28   :  { %1995 = vmatpush1.bf16.msra.mxu1 %v3362_v46  ;;  %v28_v46 = vld [vmem:[%s4955_s0 + $0x38] sm:$0xff] }
  0x29   :  { %2036 = vmatpush1.bf16.msra.mxu0 %v3363_v47  ;;  %1996 = vmatprep.subr.bf16.mxu1 %v3364_v48 }
  0x2a   :  { %2037 = vmatprep.subr.bf16.mxu0 %v3366_v49 }
  0x2c   :  { %1997 = vmatpush1.bf16.msra.mxu1 %v3368_v50  ;;  %v29_v50 = vld [vmem:[%s4955_s0 + $0x40] sm:$0xff] }
  0x2d   :  { %2038 = vmatpush1.bf16.msra.mxu0 %v3369_v51  ;;  %1998 = vmatprep.subr.bf16.mxu1 %v3370_v52  ;;  %v30_v51 = vld [vmem:[%s4955_s0 + $0x48] sm:$0xff] }
  0x2e   :  { %2039 = vmatprep.subr.bf16.mxu0 %v3372_v53  ;;  %v31_v53 = vld [vmem:[%s4955_s0 + $0x50] sm:$0xff] }
  0x30   :  { %1999 = vmatpush1.bf16.msra.mxu1 %v3374_v54  ;;  %v32_v54 = vld [vmem:[%s4955_s0 + $0x58] sm:$0xff] }
  0x31   :  { %2040 = vmatpush1.bf16.msra.mxu0 %v3375_v55  ;;  %2000 = vmatprep.subr.bf16.mxu1 %v3376_v56 }
  0x32   :  { %2041 = vmatprep.subr.bf16.mxu0 %v3378_v57 }
  0x34   :  { %2001 = vmatpush1.bf16.msra.mxu1 %v3380_v58 }
  0x35   :  { %2042 = vmatpush1.bf16.msra.mxu0 %v3381_v59  ;;  %2002 = vmatprep.subr.bf16.mxu1 %v3382_v60 }
  0x36   :  { %2043 = vmatprep.subr.bf16.mxu0 %v3384_v61 }
  0x38   :  { %2003 = vmatpush1.bf16.msra.mxu1 %v3386_v62 }
  0x39   :  { %2044 = vmatpush1.bf16.msra.mxu0 %v3387_v63  ;;  %2004 = vmatprep.subr.bf16.mxu1 %v3388_v0 }
  0x3a   :  { %2045 = vmatprep.subr.bf16.mxu0 %v3390_v1 }
  0x3c   :  { %2005 = vmatpush1.bf16.msra.mxu1 %v3392_v2 }
  0x3d   :  { %2046 = vmatpush1.bf16.msra.mxu0 %v3393_v4  ;;  %2006 = vmatprep.subr.bf16.mxu1 %v3394_v5 }
  0x3e   :  { %2047 = vmatprep.subr.bf16.mxu0 %v3396_v6 }
  0x40   :  { %2007 = vmatpush1.bf16.msra.mxu1 %v3398_v7 }
  0x41   :  { %2048 = vmatpush1.bf16.msra.mxu0 %v3399_v9  ;;  %2099 = vmatprep.subr.bf16.mxu1 %v3405_v11 }
  0x42   :  { %2058 = vmatprep.subr.bf16.mxu0 %v3402_v10 }
  0x7a   :  { %v40_v13 = vpop.permute.xlu1 %39 }
  0x7b   :  { %v49_v18 = vmul.f32 %v40_v13, %v22_v12  ;;  %v48_v19 = vmul.f32 %v40_v13, %v21_v14  ;;  %v51_v20 = vmul.f32 %v40_v13, %v24_v15  ;;  %v50_v21 = vmul.f32 %v40_v13, %v23_v16 }
  0x7c   :  { %v53_v22 = vmul.f32 %v40_v13, %v26_v17  ;;  %v52_v30 = vmul.f32 %v40_v13, %v25_v23 }
  0x7d   :  { %v66_v24 = vrot.slane %v49_v18, 4  ;;  %v60_v26 = vrot.slane %v48_v19, 4  ;;  %v78_v27 = vrot.slane %v51_v20, 4  ;;  %v72_v28 = vrot.slane %v50_v21, 4 }
  0x7e   :  { %v90_v29 = vrot.slane %v53_v22, 4  ;;  %v84_v36 = vrot.slane %v52_v30, 4 }
  0x7f   :  { %v67_v31 = vadd.f32 %v66_v24, %v49_v18  ;;  %v61_v32 = vadd.f32 %v60_v26, %v48_v19  ;;  %v79_v33 = vadd.f32 %v78_v27, %v51_v20  ;;  %v73_v34 = vadd.f32 %v72_v28, %v50_v21 }
  0x80   :  { %v91_v35 = vadd.f32 %v90_v29, %v53_v22  ;;  %v85_v42 = vadd.f32 %v84_v36, %v52_v30 }
  0x81   :  { %v68_v37 = vrot.slane %v67_v31, 2  ;;  %v80_v38 = vrot.slane %v79_v33, 2  ;;  %v62_v39 = vrot.slane %v61_v32, 2  ;;  %v74_v40 = vrot.slane %v73_v34, 2 }
  0x82   :  { %v92_v41 = vrot.slane %v91_v35, 2  ;;  %v86_v56 = vrot.slane %v85_v42, 2 }
  0x83   :  { %v69_v43 = vadd.f32 %v68_v37, %v67_v31  ;;  %v81_v47 = vadd.f32 %v80_v38, %v79_v33  ;;  %v63_v48 = vadd.f32 %v62_v39, %v61_v32  ;;  %v75_v52 = vadd.f32 %v74_v40, %v73_v34 }
  0x84   :  { %v4077_v55 = vadd.f32 %v92_v41, %v91_v35  ;;  %v87_v7 = vadd.f32 %v86_v56, %v85_v42 }
  0x85   :  { %v70_v57 = vrot.slane %v69_v43, 1  ;;  %v82_v60 = vrot.slane %v81_v47, 1  ;;  %v64_v61 = vrot.slane %v63_v48, 1  ;;  %v76_v1 = vrot.slane %v75_v52, 1 }
  0x86   :  { %v94_v6 = vrot.slane %v4077_v55, 1  ;;  %v88_v35 = vrot.slane %v87_v7, 1 }
  0x87   :  { %v71_v18 = vadd.f32 %v70_v57, %v69_v43  ;;  %v83_v22 = vadd.f32 %v82_v60, %v81_v47  ;;  %v65_v27 = vadd.f32 %v64_v61, %v63_v48  ;;  %v77_v39 = vadd.f32 %v76_v1, %v75_v52 }
  0x90   :  { %v135_v44 = vpop.xlane.xlu0 %134 }
  0x91   :  { %v136_v49 = vmax.f32 %v135_v44, 1.0 }
  0x93   :  { %3784 = vrcp.f32 %v136_v49  ;;  %v138_v58 = vrot.slane %v136_v49, 1 }
  0x94   :  { %v47_v59 = vpop.permute.xlu0 %46 }
  0x95   :  { %v54_v62 = vmul.f32 %v47_v59, %v27_v45  ;;  %v55_v63 = vmul.f32 %v47_v59, %v28_v46  ;;  %v56_v0 = vmul.f32 %v47_v59, %v29_v50  ;;  %v57_v2 = vmul.f32 %v47_v59, %v30_v51 }
  0x96   :  { %v58_v4 = vmul.f32 %v47_v59, %v31_v53  ;;  %v59_v5 = vmul.f32 %v47_v59, %v32_v54  ;;  %3786 = vrcp.f32 %v138_v58  ;;  %v89_v51 = vadd.f32 %v88_v35, %v87_v7 }
  0x97   :  { %v96_v9 = vrot.slane %v54_v62, 4  ;;  %v102_v10 = vrot.slane %v55_v63, 4  ;;  %v108_v11 = vrot.slane %v56_v0, 4  ;;  %v114_v12 = vrot.slane %v57_v2, 4 }
  0x98   :  { %v120_v13 = vrot.slane %v58_v4, 4  ;;  %v126_v14 = vrot.slane %v59_v5, 4  ;;  %v95_v58 = vadd.f32 %v94_v6, %v4077_v55 }
  0x99   :  { %v97_v15 = vadd.f32 %v96_v9, %v54_v62  ;;  %v103_v16 = vadd.f32 %v102_v10, %v55_v63  ;;  %v109_v17 = vadd.f32 %v108_v11, %v56_v0  ;;  %v115_v19 = vadd.f32 %v114_v12, %v57_v2 }
  0x9a   :  { %v121_v20 = vadd.f32 %v120_v13, %v58_v4  ;;  %v127_v21 = vadd.f32 %v126_v14, %v59_v5 }
  0x9b   :  { %v98_v23 = vrot.slane %v97_v15, 2  ;;  %v104_v24 = vrot.slane %v103_v16, 2  ;;  %v110_v26 = vrot.slane %v109_v17, 2  ;;  %v116_v28 = vrot.slane %v115_v19, 2 }
  0x9c   :  { %v122_v29 = vrot.slane %v121_v20, 2  ;;  %v128_v30 = vrot.slane %v127_v21, 2 }
  0x9d   :  { %v3785_v31 = vpop.eup %3784  ;;  %v99_v32 = vadd.f32 %v98_v23, %v97_v15  ;;  %v105_v33 = vadd.f32 %v104_v24, %v103_v16  ;;  %v111_v34 = vadd.f32 %v110_v26, %v109_v17  ;;  %v117_v36 = vadd.f32 %v116_v28, %v115_v19 }
  0x9e   :  { %v123_v37 = vadd.f32 %v122_v29, %v121_v20  ;;  %v143_v38 = vmul.f32 %v3785_v31, %v71_v18  ;;  %v145_v41 = vmul.f32 %v3785_v31, %v83_v22  ;;  %v142_v43 = vmul.f32 %v3785_v31, %v65_v27 }
  0x9f   :  { %v106_v40 = vrot.slane %v105_v33, 1  ;;  %v100_v42 = vrot.slane %v99_v32, 1  ;;  %v129_v45 = vadd.f32 %v128_v30, %v127_v21  ;;  %v118_v46 = vrot.slane %v117_v36, 1 }
  0xa0   :  { %v124_v44 = vrot.slane %v123_v37, 1  ;;  %v112_v47 = vrot.slane %v111_v34, 1  ;;  %v156_v49 = vpack.c.bf16 %v143_v38, %v143_v38  ;;  %v3787_v53 = vpop.eup %3786  ;;  %v158_v56 = vpack.c.bf16 %v145_v41, %v145_v41  ;;  %v3400_v38 = vld [vmem:[%s4954_s2 + $0x600] ss:$24 sps:$4 sm:$0xff]  }
  0xa1   :  { %v107_v48 = vadd.f32 %v106_v40, %v105_v33  ;;  %v101_v50 = vadd.f32 %v100_v42, %v99_v32  ;;  %v119_v54 = vadd.f32 %v118_v46, %v117_v36  ;;  %v155_v61 = vpack.c.bf16 %v142_v43, %v142_v43  ;;  %v3408_v42 = vld [vmem:[%s4954_s2 + $0x634] ss:$24 sps:$4 sm:$0xff]  }
  0xa2   :  { %v113_v57 = vadd.f32 %v112_v47, %v111_v34  ;;  %v125_v52 = vadd.f32 %v124_v44, %v123_v37  ;;  %v144_v63 = vmul.f32 %v3785_v31, %v77_v39  ;;  %v130_v1 = vrot.slane %v129_v45, 1  ;;  %v3403_v34 = vld [vmem:[%s4954_s2 + $0x8] ss:$24 sps:$4 sm:$0xff]   ;;  %v3411_v43 = vld [vmem:[%s4954_s2 + $0x3c] ss:$24 sps:$4 sm:$0xff]  }
  0xa3   :  { %v150_v59 = vmul.f32 %v3787_v53, %v107_v48  ;;  %v149_v60 = vmul.f32 %v3787_v53, %v101_v50  ;;  %v152_v62 = vmul.f32 %v3787_v53, %v119_v54  ;;  %v500_v4 = vunpack.c.l.b16 %v156_v49  ;;  %v3409_v48 = vld [vmem:[%s4954_s2 + $0x38] ss:$24 sps:$4 sm:$0xff]  }
  0xa4   :  { %v151_v0 = vmul.f32 %v3787_v53, %v113_v57  ;;  %v146_v9 = vmul.f32 %v3785_v31, %v89_v51  ;;  %v157_v7 = vpack.c.bf16 %v144_v63, %v144_v63  ;;  %v131_v12 = vadd.f32 %v130_v1, %v129_v45  ;;  %v3406_v50 = vld [vmem:[%s4954_s2 + $0x630] ss:$24 sps:$4 sm:$0xff]   ;;  %v3417_v51 = vld [vmem:[%s4954_s2 + $0x6c] ss:$24 sps:$4 sm:$0xff]   ;;  %v3424_v1 = vld [vmem:[%s4954_s2 + $0x6c0] ss:$24 sps:$4 sm:$0xff]  }
  0xa5   :  { %v162_v2 = vpack.c.bf16 %v150_v59, %v150_v59  ;;  %v161_v5 = vpack.c.bf16 %v149_v60, %v149_v60  ;;  %v164_v10 = vpack.c.bf16 %v152_v62, %v152_v62  ;;  %v147_v15 = vmul.f32 %v3785_v31, %v95_v58  ;;  %v3415_v57 = vld [vmem:[%s4954_s2 + $0x68] ss:$24 sps:$4 sm:$0xff]   ;;  %v3420_v59 = vld [vmem:[%s4954_s2 + $0x694] ss:$24 sps:$4 sm:$0xff]   ;;  %v3421_v60 = vld [vmem:[%s4954_s2 + $0x98] ss:$24 sps:$4 sm:$0xff]  }
  0xa6   :  { %v163_v11 = vpack.c.bf16 %v151_v0, %v151_v0  ;;  %v153_v55 = vmul.f32 %v3787_v53, %v125_v52  ;;  %v502_v6 = vunpack.c.l.b16 %v158_v56  ;;  %v154_v18 = vmul.f32 %v3787_v53, %v131_v12  ;;  %v3414_v56 = vld [vmem:[%s4954_s2 + $0x664] ss:$24 sps:$4 sm:$0xff]   ;;  %v3412_v58 = vld [vmem:[%s4954_s2 + $0x660] ss:$24 sps:$4 sm:$0xff]  }
  0xa7   :  { %v506_v13 = vunpack.c.l.b16 %v162_v2  ;;  %v505_v14 = vunpack.c.l.b16 %v161_v5  ;;  %v508_v16 = vunpack.c.l.b16 %v164_v10  ;;  %v499_v20 = vunpack.c.l.b16 %v155_v61  ;;  %v3423_v52 = vld [vmem:[%s4954_s2 + $0x9c] ss:$24 sps:$4 sm:$0xff]   ;;  %v3418_v61 = vld [vmem:[%s4954_s2 + $0x690] ss:$24 sps:$4 sm:$0xff]   ;;  %v3429_v62 = vld [vmem:[%s4954_s2 + $0xcc] ss:$24 sps:$4 sm:$0xff]  }
  0xa8   :  { %v507_v17 = vunpack.c.l.b16 %v163_v11  ;;  %v501_v22 = vunpack.c.l.b16 %v157_v7  ;;  %v166_v26 = vpack.c.bf16 %v154_v18, %v154_v18  ;;  %v165_v27 = vpack.c.bf16 %v153_v55, %v153_v55  ;;  %v3426_v63 = vld [vmem:[%s4954_s2 + $0x6c4] ss:$24 sps:$4 sm:$0xff]   ;;  %v3427_v0 = vld [vmem:[%s4954_s2 + $0xc8] ss:$24 sps:$4 sm:$0xff]   ;;  %v3433_v5 = vld [vmem:[%s4954_s2 + $0xf8] ss:$24 sps:$4 sm:$0xff]  }
  0xa9   :  { %v514_v19 = vrot.slane %v506_v13, 7  ;;  %v511_v21 = vrot.slane %v505_v14, 7  ;;  %v518_v23 = vrot.slane %v508_v16, 7  ;;  %v160_v30 = vpack.c.bf16 %v147_v15, %v147_v15  ;;  %v3435_v2 = vld [vmem:[%s4954_s2 + $0xfc] ss:$24 sps:$4 sm:$0xff]  }
  0xaa   :  { %v516_v24 = vrot.slane %v507_v17, 7  ;;  %v159_v32 = vpack.c.bf16 %v146_v9, %v146_v9  ;;  %v510_v40 = vunpack.c.l.b16 %v166_v26  ;;  %v509_v41 = vunpack.c.l.b16 %v165_v27  ;;  %v3430_v9 = vld [vmem:[%s4954_s2 + $0x6f0] ss:$24 sps:$4 sm:$0xff]   ;;  %v3441_v10 = vld [vmem:[%s4954_s2 + $0x12c] ss:$24 sps:$4 sm:$0xff]  }
  0xab   :  { %v515_v28 = vsel %vm512_vm1, %v514_v19, %v500_v4  ;;  %v513_v29 = vsel %vm512_vm1, %v511_v21, %v499_v20  ;;  %v519_v33 = vsel %vm512_vm1, %v518_v23, %v502_v6  ;;  %v504_v44 = vunpack.c.l.b16 %v160_v30  ;;  %v3432_v4 = vld [vmem:[%s4954_s2 + $0x6f4] ss:$24 sps:$4 sm:$0xff]   ;;  %v3438_v7 = vld [vmem:[%s4954_s2 + $0x724] ss:$24 sps:$4 sm:$0xff]   ;;  %v3439_v11 = vld [vmem:[%s4954_s2 + $0x128] ss:$24 sps:$4 sm:$0xff]  }
  0xac   :  { %v4083_v31 = vpack.c.b16 %v515_v28, %v515_v28  ;;  %v4089_v35 = vpack.c.b16 %v513_v29, %v513_v29  ;;  %v517_v36 = vsel %vm512_vm1, %v516_v24, %v501_v22  ;;  %v4092_v37 = vpack.c.b16 %v519_v33, %v519_v33  ;;  %v3436_v12 = vld [vmem:[%s4954_s2 + $0x720] ss:$24 sps:$4 sm:$0xff]   ;;  %v3447_v13 = vld [vmem:[%s4954_s2 + $0x15c] ss:$24 sps:$4 sm:$0xff]   ;;  %v3442_v55 = vld [vmem:[%s4954_s2 + $0x750] ss:$24 sps:$4 sm:$0xff]  }
  0xad   :  { %v4097_v39 = vpack.c.b16 %v517_v36, %v517_v36  ;;  %v522_v45 = vrot.slane %v510_v40, 7  ;;  %v503_v46 = vunpack.c.l.b16 %v159_v32  ;;  %v520_v47 = vrot.slane %v509_v41, 7  ;;  %v3444_v14 = vld [vmem:[%s4954_s2 + $0x754] ss:$24 sps:$4 sm:$0xff]   ;;  %v3445_v15 = vld [vmem:[%s4954_s2 + $0x158] ss:$24 sps:$4 sm:$0xff]  }
  0xae   :  { %2008 = vmatprep.mubr.bf16.mxu1 %v4083_v31  ;;  %2049 = vmatprep.mubr.bf16.mxu0 %v4092_v37  ;;  %v3453_v6 = vld [vmem:[%s4954_s2 + $0x18c] ss:$24 sps:$4 sm:$0xff]   ;;  %v3451_v17 = vld [vmem:[%s4954_s2 + $0x188] ss:$24 sps:$4 sm:$0xff]   ;;  %v3459_v19 = vld [vmem:[%s4954_s2 + $0x1bc] ss:$24 sps:$4 sm:$0xff]  }
  0xaf   :  { %2009 = vmatmul.mubr.bf16.vlgmr.msra.gmra.mrb[0].mxu1 %v4089_v35  ;;  %2050 = vmatmul.mubr.bf16.vlgmr.msra.gmra.mrb[0].mxu0 %v4097_v39  ;;  %v523_v49 = vsel %vm512_vm1, %v522_v45, %v504_v44  ;;  %v4121_v53 = vsel %vm512_vm1, %v520_v47, %v503_v46  ;;  %v3450_v16 = vld [vmem:[%s4954_s2 + $0x784] ss:$24 sps:$4 sm:$0xff]   ;;  %v3448_v18 = vld [vmem:[%s4954_s2 + $0x780] ss:$24 sps:$4 sm:$0xff]   ;;  %v3456_v20 = vld [vmem:[%s4954_s2 + $0x7b4] ss:$24 sps:$4 sm:$0xff]  }
  0xb0   :  { %2100 = vmatpush1.bf16.msra.mxu1 %v3403_v34  ;;  %2059 = vmatpush1.bf16.msra.mxu0 %v3400_v38  ;;  %v4123_v54 = vpack.c.b16 %v523_v49, %v523_v49  ;;  %v3457_v21 = vld [vmem:[%s4954_s2 + $0x1b8] ss:$24 sps:$4 sm:$0xff]   ;;  %v3465_v23 = vld [vmem:[%s4954_s2 + $0x1ec] ss:$24 sps:$4 sm:$0xff]   ;;  %v3463_v26 = vld [vmem:[%s4954_s2 + $0x1e8] ss:$24 sps:$4 sm:$0xff]  }
  0xb1   :  { %2131 = vmatprep.mubr.bf16.mxu1 %v4083_v31  ;;  %2060 = vmatprep.subr.bf16.mxu0 %v3408_v42  ;;  %v3454_v22 = vld [vmem:[%s4954_s2 + $0x7b0] ss:$24 sps:$4 sm:$0xff]   ;;  %v3462_v24 = vld [vmem:[%s4954_s2 + $0x7e4] ss:$24 sps:$4 sm:$0xff]   ;;  %v3460_v27 = vld [vmem:[%s4954_s2 + $0x7e0] ss:$24 sps:$4 sm:$0xff]  }
  0xb2   :  { %2101 = vmatprep.subr.bf16.mxu1 %v3411_v43  ;;  %2090 = vmatprep.mubr.bf16.mxu0 %v4123_v54  ;;  %v3471_v28 = vld [vmem:[%s4954_s2 + $0x21c] ss:$24 sps:$4 sm:$0xff]   ;;  %v3469_v30 = vld [vmem:[%s4954_s2 + $0x218] ss:$24 sps:$4 sm:$0xff]   ;;  %v3477_v33 = vld [vmem:[%s4954_s2 + $0x24c] ss:$24 sps:$4 sm:$0xff]  }
  0xb3   :  { %v3468_v29 = vld [vmem:[%s4954_s2 + $0x814] ss:$24 sps:$4 sm:$0xff]   ;;  %v3466_v32 = vld [vmem:[%s4954_s2 + $0x810] ss:$24 sps:$4 sm:$0xff]   ;;  %v3474_v34 = vld [vmem:[%s4954_s2 + $0x844] ss:$24 sps:$4 sm:$0xff]  }
  0xb4   :  { %2102 = vmatpush1.bf16.msra.mxu1 %v3409_v48  ;;  %2061 = vmatpush1.bf16.msra.mxu0 %v3406_v50  ;;  %v3475_v36 = vld [vmem:[%s4954_s2 + $0x248] ss:$24 sps:$4 sm:$0xff]   ;;  %v3483_v40 = vld [vmem:[%s4954_s2 + $0x27c] ss:$24 sps:$4 sm:$0xff]   ;;  %v3481_v42 = vld [vmem:[%s4954_s2 + $0x278] ss:$24 sps:$4 sm:$0xff]  }
  0xb5   :  { %2103 = vmatprep.subr.bf16.mxu1 %v3417_v51  ;;  %2062 = vmatprep.subr.bf16.mxu0 %v3414_v56  ;;  %v3472_v38 = vld [vmem:[%s4954_s2 + $0x840] ss:$24 sps:$4 sm:$0xff]   ;;  %v3480_v41 = vld [vmem:[%s4954_s2 + $0x874] ss:$24 sps:$4 sm:$0xff]   ;;  %v3478_v43 = vld [vmem:[%s4954_s2 + $0x870] ss:$24 sps:$4 sm:$0xff]  }
  0xb6   :  { %v3489_v44 = vld [vmem:[%s4954_s2 + $0x2ac] ss:$24 sps:$4 sm:$0xff]   ;;  %v3487_v46 = vld [vmem:[%s4954_s2 + $0x2a8] ss:$24 sps:$4 sm:$0xff]   ;;  %v3495_v48 = vld [vmem:[%s4954_s2 + $0x2dc] ss:$24 sps:$4 sm:$0xff]  }
  0xb7   :  { %v3486_v45 = vld [vmem:[%s4954_s2 + $0x8a4] ss:$24 sps:$4 sm:$0xff]   ;;  %v3484_v47 = vld [vmem:[%s4954_s2 + $0x8a0] ss:$24 sps:$4 sm:$0xff]   ;;  %v3492_v49 = vld [vmem:[%s4954_s2 + $0x8d4] ss:$24 sps:$4 sm:$0xff]  }
  0xb8   :  { %2104 = vmatpush1.bf16.msra.mxu1 %v3415_v57  ;;  %2063 = vmatpush1.bf16.msra.mxu0 %v3412_v58  ;;  %v3493_v50 = vld [vmem:[%s4954_s2 + $0x2d8] ss:$24 sps:$4 sm:$0xff]   ;;  %v3498_v56 = vld [vmem:[%s4954_s2 + $0x30c] ss:$24 sps:$4 sm:$0xff]   ;;  %v3496_v58 = vld [vmem:[%s4954_s2 + $0x308] ss:$24 sps:$4 sm:$0xff]  }
  0xb9   :  { %2105 = vmatprep.subr.bf16.mxu1 %v3423_v52  ;;  %2064 = vmatprep.subr.bf16.mxu0 %v3420_v59  ;;  %v3490_v51 = vld [vmem:[%s4954_s2 + $0x8d0] ss:$24 sps:$4 sm:$0xff]   ;;  %v3501_v57 = vld [vmem:[%s4954_s2 + $0x14] ss:$24 sps:$4 sm:$0xff]   ;;  %v4305_v59 = vpack.c.b16 %v4121_v53, %v4121_v53  ;;  %v3505_v53 = vld [vmem:[%s4954_s2 + $0x40] ss:$24 sps:$4 sm:$0xff]  }
  0xba   :  { %v3499_v52 = vld [vmem:[%s4954_s2 + $0x10] ss:$24 sps:$4 sm:$0xff]  }
  0xbc   :  { %2106 = vmatpush1.bf16.msra.mxu1 %v3421_v60  ;;  %2065 = vmatpush1.bf16.msra.mxu0 %v3418_v61  ;;  %v3504_v60 = vld [vmem:[%s4954_s2 + $0x33c] ss:$24 sps:$4 sm:$0xff]  }
  0xbd   :  { %2107 = vmatprep.subr.bf16.mxu1 %v3429_v62  ;;  %2066 = vmatprep.subr.bf16.mxu0 %v3426_v63  ;;  %v3507_v61 = vld [vmem:[%s4954_s2 + $0x44] ss:$24 sps:$4 sm:$0xff]   ;;  %v3502_v62 = vld [vmem:[%s4954_s2 + $0x338] ss:$24 sps:$4 sm:$0xff]  }
  0xbe   :  { %v3510_v63 = vld [vmem:[%s4954_s2 + $0x36c] ss:$24 sps:$4 sm:$0xff]  }
  0xc0   :  { %2108 = vmatpush1.bf16.msra.mxu1 %v3427_v0  ;;  %2067 = vmatpush1.bf16.msra.mxu0 %v3424_v1  ;;  %v3513_v0 = vld [vmem:[%s4954_s2 + $0x74] ss:$24 sps:$4 sm:$0xff]   ;;  %v3508_v1 = vld [vmem:[%s4954_s2 + $0x368] ss:$24 sps:$4 sm:$0xff]  }
  0xc1   :  { %2109 = vmatprep.subr.bf16.mxu1 %v3435_v2  ;;  %2068 = vmatprep.subr.bf16.mxu0 %v3432_v4  ;;  %v3511_v2 = vld [vmem:[%s4954_s2 + $0x70] ss:$24 sps:$4 sm:$0xff]   ;;  %v3519_v4 = vld [vmem:[%s4954_s2 + $0xa4] ss:$24 sps:$4 sm:$0xff]  }
  0xc4   :  { %2110 = vmatpush1.bf16.msra.mxu1 %v3433_v5  ;;  %2069 = vmatpush1.bf16.msra.mxu0 %v3430_v9  ;;  %v3514_v5 = vld [vmem:[%s4954_s2 + $0x398] ss:$24 sps:$4 sm:$0xff]  }
  0xc5   :  { %2111 = vmatprep.subr.bf16.mxu1 %v3441_v10  ;;  %2070 = vmatprep.subr.bf16.mxu0 %v3438_v7  ;;  %v3517_v9 = vld [vmem:[%s4954_s2 + $0xa0] ss:$24 sps:$4 sm:$0xff]   ;;  %v3522_v10 = vld [vmem:[%s4954_s2 + $0x3cc] ss:$24 sps:$4 sm:$0xff]  }
  0xc6   :  { %v3525_v7 = vld [vmem:[%s4954_s2 + $0xd4] ss:$24 sps:$4 sm:$0xff]  }
  0xc8   :  { %2112 = vmatpush1.bf16.msra.mxu1 %v3439_v11  ;;  %2071 = vmatpush1.bf16.msra.mxu0 %v3436_v12  ;;  %v3520_v11 = vld [vmem:[%s4954_s2 + $0x3c8] ss:$24 sps:$4 sm:$0xff]  }
  0xc9   :  { %2113 = vmatprep.subr.bf16.mxu1 %v3447_v13  ;;  %2072 = vmatprep.subr.bf16.mxu0 %v3444_v14  ;;  %v3523_v12 = vld [vmem:[%s4954_s2 + $0xd0] ss:$24 sps:$4 sm:$0xff]   ;;  %v3528_v13 = vld [vmem:[%s4954_s2 + $0x3fc] ss:$24 sps:$4 sm:$0xff]  }
  0xca   :  { %v3531_v14 = vld [vmem:[%s4954_s2 + $0x104] ss:$24 sps:$4 sm:$0xff]  }
  0xcc   :  { %2114 = vmatpush1.bf16.msra.mxu1 %v3445_v15  ;;  %2073 = vmatpush1.bf16.msra.mxu0 %v3442_v55  ;;  %v3526_v15 = vld [vmem:[%s4954_s2 + $0x3f8] ss:$24 sps:$4 sm:$0xff]  }
  0xcd   :  { %2115 = vmatprep.subr.bf16.mxu1 %v3453_v6  ;;  %2074 = vmatprep.subr.bf16.mxu0 %v3450_v16  ;;  %v3529_v55 = vld [vmem:[%s4954_s2 + $0x100] ss:$24 sps:$4 sm:$0xff]   ;;  %v3534_v6 = vld [vmem:[%s4954_s2 + $0x42c] ss:$24 sps:$4 sm:$0xff]  }
  0xce   :  { %v3537_v16 = vld [vmem:[%s4954_s2 + $0x134] ss:$24 sps:$4 sm:$0xff]  }
  0xd0   :  { %2116 = vmatpush1.bf16.msra.mxu1 %v3451_v17  ;;  %2075 = vmatpush1.bf16.msra.mxu0 %v3448_v18  ;;  %v3532_v17 = vld [vmem:[%s4954_s2 + $0x428] ss:$24 sps:$4 sm:$0xff]  }
  0xd1   :  { %2117 = vmatprep.subr.bf16.mxu1 %v3459_v19  ;;  %2076 = vmatprep.subr.bf16.mxu0 %v3456_v20  ;;  %v3535_v18 = vld [vmem:[%s4954_s2 + $0x130] ss:$24 sps:$4 sm:$0xff]   ;;  %v3540_v19 = vld [vmem:[%s4954_s2 + $0x45c] ss:$24 sps:$4 sm:$0xff]  }
  0xd2   :  { %v3543_v20 = vld [vmem:[%s4954_s2 + $0x164] ss:$24 sps:$4 sm:$0xff]  }
  0xd4   :  { %2118 = vmatpush1.bf16.msra.mxu1 %v3457_v21  ;;  %2077 = vmatpush1.bf16.msra.mxu0 %v3454_v22  ;;  %v3538_v21 = vld [vmem:[%s4954_s2 + $0x458] ss:$24 sps:$4 sm:$0xff]  }
  0xd5   :  { %2119 = vmatprep.subr.bf16.mxu1 %v3465_v23  ;;  %2078 = vmatprep.subr.bf16.mxu0 %v3462_v24  ;;  %v3541_v22 = vld [vmem:[%s4954_s2 + $0x160] ss:$24 sps:$4 sm:$0xff]   ;;  %v3546_v23 = vld [vmem:[%s4954_s2 + $0x48c] ss:$24 sps:$4 sm:$0xff]  }
  0xd6   :  { %v3549_v24 = vld [vmem:[%s4954_s2 + $0x194] ss:$24 sps:$4 sm:$0xff]  }
  0xd8   :  { %2120 = vmatpush1.bf16.msra.mxu1 %v3463_v26  ;;  %2079 = vmatpush1.bf16.msra.mxu0 %v3460_v27  ;;  %v3544_v26 = vld [vmem:[%s4954_s2 + $0x488] ss:$24 sps:$4 sm:$0xff]  }
  0xd9   :  { %2121 = vmatprep.subr.bf16.mxu1 %v3471_v28  ;;  %2080 = vmatprep.subr.bf16.mxu0 %v3468_v29  ;;  %v3547_v27 = vld [vmem:[%s4954_s2 + $0x190] ss:$24 sps:$4 sm:$0xff]   ;;  %v3552_v28 = vld [vmem:[%s4954_s2 + $0x4bc] ss:$24 sps:$4 sm:$0xff]  }
  0xda   :  { %v3555_v29 = vld [vmem:[%s4954_s2 + $0x1c4] ss:$24 sps:$4 sm:$0xff]  }
  0xdc   :  { %2122 = vmatpush1.bf16.msra.mxu1 %v3469_v30  ;;  %2081 = vmatpush1.bf16.msra.mxu0 %v3466_v32  ;;  %v3550_v30 = vld [vmem:[%s4954_s2 + $0x4b8] ss:$24 sps:$4 sm:$0xff]  }
  0xdd   :  { %2123 = vmatprep.subr.bf16.mxu1 %v3477_v33  ;;  %2082 = vmatprep.subr.bf16.mxu0 %v3474_v34  ;;  %v3553_v32 = vld [vmem:[%s4954_s2 + $0x1c0] ss:$24 sps:$4 sm:$0xff]   ;;  %v3558_v33 = vld [vmem:[%s4954_s2 + $0x4ec] ss:$24 sps:$4 sm:$0xff]  }
  0xde   :  { %v3561_v34 = vld [vmem:[%s4954_s2 + $0x1f4] ss:$24 sps:$4 sm:$0xff]  }
  0xe0   :  { %2124 = vmatpush1.bf16.msra.mxu1 %v3475_v36  ;;  %2083 = vmatpush1.bf16.msra.mxu0 %v3472_v38  ;;  %v3556_v36 = vld [vmem:[%s4954_s2 + $0x4e8] ss:$24 sps:$4 sm:$0xff]  }
  0xe1   :  { %2125 = vmatprep.subr.bf16.mxu1 %v3483_v40  ;;  %2084 = vmatprep.subr.bf16.mxu0 %v3480_v41  ;;  %v3559_v38 = vld [vmem:[%s4954_s2 + $0x1f0] ss:$24 sps:$4 sm:$0xff]   ;;  %v3564_v40 = vld [vmem:[%s4954_s2 + $0x51c] ss:$24 sps:$4 sm:$0xff]  }
  0xe2   :  { %v3567_v41 = vld [vmem:[%s4954_s2 + $0x224] ss:$24 sps:$4 sm:$0xff]  }
  0xe4   :  { %2126 = vmatpush1.bf16.msra.mxu1 %v3481_v42  ;;  %2085 = vmatpush1.bf16.msra.mxu0 %v3478_v43  ;;  %v3562_v42 = vld [vmem:[%s4954_s2 + $0x518] ss:$24 sps:$4 sm:$0xff]  }
  0xe5   :  { %2127 = vmatprep.subr.bf16.mxu1 %v3489_v44  ;;  %2086 = vmatprep.subr.bf16.mxu0 %v3486_v45  ;;  %v3565_v43 = vld [vmem:[%s4954_s2 + $0x220] ss:$24 sps:$4 sm:$0xff]   ;;  %v3570_v44 = vld [vmem:[%s4954_s2 + $0x54c] ss:$24 sps:$4 sm:$0xff]  }
  0xe6   :  { %v3573_v45 = vld [vmem:[%s4954_s2 + $0x254] ss:$24 sps:$4 sm:$0xff]  }
  0xe8   :  { %2128 = vmatpush1.bf16.msra.mxu1 %v3487_v46  ;;  %2087 = vmatpush1.bf16.msra.mxu0 %v3484_v47  ;;  %v3568_v46 = vld [vmem:[%s4954_s2 + $0x548] ss:$24 sps:$4 sm:$0xff]  }
  0xe9   :  { %2129 = vmatprep.subr.bf16.mxu1 %v3495_v48  ;;  %2088 = vmatprep.subr.bf16.mxu0 %v3492_v49  ;;  %v3571_v47 = vld [vmem:[%s4954_s2 + $0x250] ss:$24 sps:$4 sm:$0xff]   ;;  %v3576_v48 = vld [vmem:[%s4954_s2 + $0x57c] ss:$24 sps:$4 sm:$0xff]  }
  0xea   :  { %v3579_v49 = vld [vmem:[%s4954_s2 + $0x284] ss:$24 sps:$4 sm:$0xff]  }
  0xec   :  { %2130 = vmatpush1.bf16.msra.mxu1 %v3493_v50  ;;  %2089 = vmatpush1.bf16.msra.mxu0 %v3490_v51  ;;  %v3574_v50 = vld [vmem:[%s4954_s2 + $0x578] ss:$24 sps:$4 sm:$0xff]  }
  0xed   :  { %2140 = vmatprep.subr.bf16.mxu1 %v3498_v56  ;;  %2222 = vmatprep.subr.bf16.mxu0 %v3501_v57  ;;  %v3577_v51 = vld [vmem:[%s4954_s2 + $0x280] ss:$24 sps:$4 sm:$0xff]   ;;  %v3582_v56 = vld [vmem:[%s4954_s2 + $0x5ac] ss:$24 sps:$4 sm:$0xff]  }
  0xee   :  { %v3585_v57 = vld [vmem:[%s4954_s2 + $0x2b4] ss:$24 sps:$4 sm:$0xff]  }
  0xef   :  { %2132 = vmatmul.mubr.bf16.vlgmr.msra.gmra.mrb[4].mxu1 %v4089_v35  ;;  %2091 = vmatmul.mubr.bf16.vlgmr.msra.gmra.mrb[0].mxu0 %v4305_v59 }
  0xf0   :  { %2141 = vmatpush1.bf16.msra.mxu1 %v3496_v58  ;;  %2172 = vmatprep.mubr.bf16.mxu1 %v4092_v37  ;;  %v3580_v58 = vld [vmem:[%s4954_s2 + $0x5a8] ss:$24 sps:$4 sm:$0xff]  }
  0xf1   :  { %2223 = vmatpush1.bf16.msra.mxu0 %v3499_v52  ;;  %2254 = vmatprep.mubr.bf16.mxu0 %v4083_v31  ;;  %v3516_v31 = vld [vmem:[%s4954_s2 + $0x39c] ss:$24 sps:$4 sm:$0xff]   ;;  %v3583_v52 = vld [vmem:[%s4954_s2 + $0x2b0] ss:$24 sps:$4 sm:$0xff]  }
  0xf2   :  { %2142 = vmatprep.subr.bf16.mxu1 %v3504_v60  ;;  %2224 = vmatprep.subr.bf16.mxu0 %v3507_v61  ;;  %v3588_v60 = vld [vmem:[%s4954_s2 + $0x5dc] ss:$24 sps:$4 sm:$0xff]  }
  0xf3   :  { %v3591_v61 = vld [vmem:[%s4954_s2 + $0x2e4] ss:$24 sps:$4 sm:$0xff]  }
  0xf4   :  { %2143 = vmatpush1.bf16.msra.mxu1 %v3502_v62  ;;  %v3586_v62 = vld [vmem:[%s4954_s2 + $0x5d8] ss:$24 sps:$4 sm:$0xff]  }
  0xf5   :  { %2225 = vmatpush1.bf16.msra.mxu0 %v3505_v53  ;;  %2144 = vmatprep.subr.bf16.mxu1 %v3510_v63  ;;  %v3589_v53 = vld [vmem:[%s4954_s2 + $0x2e0] ss:$24 sps:$4 sm:$0xff]   ;;  %v3594_v63 = vld [vmem:[%s4954_s2 + $0x60c] ss:$24 sps:$4 sm:$0xff]  }
  0xf6   :  { %2226 = vmatprep.subr.bf16.mxu0 %v3513_v0  ;;  %v3597_v0 = vld [vmem:[%s4954_s2 + $0x314] ss:$24 sps:$4 sm:$0xff]  }
  0xf8   :  { %2145 = vmatpush1.bf16.msra.mxu1 %v3508_v1  ;;  %v3592_v1 = vld [vmem:[%s4954_s2 + $0x608] ss:$24 sps:$4 sm:$0xff]  }
  0xf9   :  { %2227 = vmatpush1.bf16.msra.mxu0 %v3511_v2  ;;  %2146 = vmatprep.subr.bf16.mxu1 %v3516_v31  ;;  %v3595_v2 = vld [vmem:[%s4954_s2 + $0x310] ss:$24 sps:$4 sm:$0xff]   ;;  %v3600_v31 = vld [vmem:[%s4954_s2 + $0x63c] ss:$24 sps:$4 sm:$0xff]  }
  0xfa   :  { %2228 = vmatprep.subr.bf16.mxu0 %v3519_v4  ;;  %v3603_v4 = vld [vmem:[%s4954_s2 + $0x344] ss:$24 sps:$4 sm:$0xff]  }
  0xfc   :  { %2147 = vmatpush1.bf16.msra.mxu1 %v3514_v5  ;;  %v3598_v5 = vld [vmem:[%s4954_s2 + $0x638] ss:$24 sps:$4 sm:$0xff]  }
  0xfd   :  { %2229 = vmatpush1.bf16.msra.mxu0 %v3517_v9  ;;  %2148 = vmatprep.subr.bf16.mxu1 %v3522_v10  ;;  %v3601_v9 = vld [vmem:[%s4954_s2 + $0x340] ss:$24 sps:$4 sm:$0xff]   ;;  %v3606_v10 = vld [vmem:[%s4954_s2 + $0x66c] ss:$24 sps:$4 sm:$0xff]  }
  0xfe   :  { %2230 = vmatprep.subr.bf16.mxu0 %v3525_v7  ;;  %v3604_v7 = vld [vmem:[%s4954_s2 + $0x668] ss:$24 sps:$4 sm:$0xff]  }
 0x100   :  { %2149 = vmatpush1.bf16.msra.mxu1 %v3520_v11  ;;  %v3607_v11 = vld [vmem:[%s4954_s2 + $0x370] ss:$24 sps:$4 sm:$0xff]  }
 0x101   :  { %2231 = vmatpush1.bf16.msra.mxu0 %v3523_v12  ;;  %2150 = vmatprep.subr.bf16.mxu1 %v3528_v13  ;;  %v3610_v12 = vld [vmem:[%s4954_s2 + $0x698] ss:$24 sps:$4 sm:$0xff]   ;;  %v3615_v13 = vld [vmem:[%s4954_s2 + $0x3a4] ss:$24 sps:$4 sm:$0xff]  }
 0x102   :  { %2232 = vmatprep.subr.bf16.mxu0 %v3531_v14  ;;  %v3613_v14 = vld [vmem:[%s4954_s2 + $0x3a0] ss:$24 sps:$4 sm:$0xff]  }
 0x104   :  { %2151 = vmatpush1.bf16.msra.mxu1 %v3526_v15  ;;  %v3618_v15 = vld [vmem:[%s4954_s2 + $0x6cc] ss:$24 sps:$4 sm:$0xff]  }
 0x105   :  { %2233 = vmatpush1.bf16.msra.mxu0 %v3529_v55  ;;  %2152 = vmatprep.subr.bf16.mxu1 %v3534_v6  ;;  %v3621_v55 = vld [vmem:[%s4954_s2 + $0x3d4] ss:$24 sps:$4 sm:$0xff]   ;;  %v3616_v6 = vld [vmem:[%s4954_s2 + $0x6c8] ss:$24 sps:$4 sm:$0xff]  }
 0x106   :  { %2234 = vmatprep.subr.bf16.mxu0 %v3537_v16  ;;  %v3619_v16 = vld [vmem:[%s4954_s2 + $0x3d0] ss:$24 sps:$4 sm:$0xff]  }
 0x108   :  { %2153 = vmatpush1.bf16.msra.mxu1 %v3532_v17  ;;  %v3624_v17 = vld [vmem:[%s4954_s2 + $0x6fc] ss:$24 sps:$4 sm:$0xff]  }
 0x109   :  { %2235 = vmatpush1.bf16.msra.mxu0 %v3535_v18  ;;  %2154 = vmatprep.subr.bf16.mxu1 %v3540_v19  ;;  %v3627_v18 = vld [vmem:[%s4954_s2 + $0x404] ss:$24 sps:$4 sm:$0xff]   ;;  %v3622_v19 = vld [vmem:[%s4954_s2 + $0x6f8] ss:$24 sps:$4 sm:$0xff]  }
 0x10a   :  { %2236 = vmatprep.subr.bf16.mxu0 %v3543_v20  ;;  %v3625_v20 = vld [vmem:[%s4954_s2 + $0x400] ss:$24 sps:$4 sm:$0xff]  }
 0x10c   :  { %2155 = vmatpush1.bf16.msra.mxu1 %v3538_v21  ;;  %v3630_v21 = vld [vmem:[%s4954_s2 + $0x72c] ss:$24 sps:$4 sm:$0xff]  }
 0x10d   :  { %2237 = vmatpush1.bf16.msra.mxu0 %v3541_v22  ;;  %2156 = vmatprep.subr.bf16.mxu1 %v3546_v23  ;;  %v3633_v22 = vld [vmem:[%s4954_s2 + $0x434] ss:$24 sps:$4 sm:$0xff]   ;;  %v3628_v23 = vld [vmem:[%s4954_s2 + $0x728] ss:$24 sps:$4 sm:$0xff]  }
 0x10e   :  { %2238 = vmatprep.subr.bf16.mxu0 %v3549_v24  ;;  %v3631_v24 = vld [vmem:[%s4954_s2 + $0x430] ss:$24 sps:$4 sm:$0xff]  }
 0x110   :  { %2157 = vmatpush1.bf16.msra.mxu1 %v3544_v26  ;;  %v3636_v26 = vld [vmem:[%s4954_s2 + $0x75c] ss:$24 sps:$4 sm:$0xff]  }
 0x111   :  { %2239 = vmatpush1.bf16.msra.mxu0 %v3547_v27  ;;  %2158 = vmatprep.subr.bf16.mxu1 %v3552_v28  ;;  %v3639_v27 = vld [vmem:[%s4954_s2 + $0x464] ss:$24 sps:$4 sm:$0xff]   ;;  %v3634_v28 = vld [vmem:[%s4954_s2 + $0x758] ss:$24 sps:$4 sm:$0xff]  }
 0x112   :  { %2240 = vmatprep.subr.bf16.mxu0 %v3555_v29  ;;  %v3637_v29 = vld [vmem:[%s4954_s2 + $0x460] ss:$24 sps:$4 sm:$0xff]  }
 0x114   :  { %2159 = vmatpush1.bf16.msra.mxu1 %v3550_v30  ;;  %v3642_v30 = vld [vmem:[%s4954_s2 + $0x78c] ss:$24 sps:$4 sm:$0xff]  }
 0x115   :  { %2241 = vmatpush1.bf16.msra.mxu0 %v3553_v32  ;;  %2160 = vmatprep.subr.bf16.mxu1 %v3558_v33  ;;  %v3640_v32 = vld [vmem:[%s4954_s2 + $0x788] ss:$24 sps:$4 sm:$0xff]   ;;  %v3645_v33 = vld [vmem:[%s4954_s2 + $0x494] ss:$24 sps:$4 sm:$0xff]  }
 0x116   :  { %2242 = vmatprep.subr.bf16.mxu0 %v3561_v34  ;;  %v3643_v34 = vld [vmem:[%s4954_s2 + $0x490] ss:$24 sps:$4 sm:$0xff]  }
 0x118   :  { %2161 = vmatpush1.bf16.msra.mxu1 %v3556_v36  ;;  %v3648_v36 = vld [vmem:[%s4954_s2 + $0x7bc] ss:$24 sps:$4 sm:$0xff]  }
 0x119   :  { %2243 = vmatpush1.bf16.msra.mxu0 %v3559_v38  ;;  %2162 = vmatprep.subr.bf16.mxu1 %v3564_v40  ;;  %v3646_v38 = vld [vmem:[%s4954_s2 + $0x7b8] ss:$24 sps:$4 sm:$0xff]   ;;  %v3651_v40 = vld [vmem:[%s4954_s2 + $0x4c4] ss:$24 sps:$4 sm:$0xff]  }
 0x11a   :  { %2244 = vmatprep.subr.bf16.mxu0 %v3567_v41  ;;  %v3649_v41 = vld [vmem:[%s4954_s2 + $0x4c0] ss:$24 sps:$4 sm:$0xff]  }
 0x11c   :  { %2163 = vmatpush1.bf16.msra.mxu1 %v3562_v42  ;;  %v3654_v42 = vld [vmem:[%s4954_s2 + $0x7ec] ss:$24 sps:$4 sm:$0xff]  }
 0x11d   :  { %2245 = vmatpush1.bf16.msra.mxu0 %v3565_v43  ;;  %2164 = vmatprep.subr.bf16.mxu1 %v3570_v44  ;;  %v3657_v43 = vld [vmem:[%s4954_s2 + $0x4f4] ss:$24 sps:$4 sm:$0xff]   ;;  %v3652_v44 = vld [vmem:[%s4954_s2 + $0x7e8] ss:$24 sps:$4 sm:$0xff]  }
 0x11e   :  { %2246 = vmatprep.subr.bf16.mxu0 %v3573_v45  ;;  %v3655_v45 = vld [vmem:[%s4954_s2 + $0x4f0] ss:$24 sps:$4 sm:$0xff]  }
 0x120   :  { %2165 = vmatpush1.bf16.msra.mxu1 %v3568_v46  ;;  %v3660_v46 = vld [vmem:[%s4954_s2 + $0x81c] ss:$24 sps:$4 sm:$0xff]  }
 0x121   :  { %2247 = vmatpush1.bf16.msra.mxu0 %v3571_v47  ;;  %2166 = vmatprep.subr.bf16.mxu1 %v3576_v48  ;;  %v3663_v47 = vld [vmem:[%s4954_s2 + $0x524] ss:$24 sps:$4 sm:$0xff]   ;;  %v3658_v48 = vld [vmem:[%s4954_s2 + $0x818] ss:$24 sps:$4 sm:$0xff]  }
 0x122   :  { %2248 = vmatprep.subr.bf16.mxu0 %v3579_v49  ;;  %v3661_v49 = vld [vmem:[%s4954_s2 + $0x520] ss:$24 sps:$4 sm:$0xff]  }
 0x124   :  { %2167 = vmatpush1.bf16.msra.mxu1 %v3574_v50  ;;  %v3666_v50 = vld [vmem:[%s4954_s2 + $0x84c] ss:$24 sps:$4 sm:$0xff]  }
 0x125   :  { %2249 = vmatpush1.bf16.msra.mxu0 %v3577_v51  ;;  %2168 = vmatprep.subr.bf16.mxu1 %v3582_v56  ;;  %v3669_v51 = vld [vmem:[%s4954_s2 + $0x554] ss:$24 sps:$4 sm:$0xff]   ;;  %v3664_v56 = vld [vmem:[%s4954_s2 + $0x848] ss:$24 sps:$4 sm:$0xff]  }
 0x126   :  { %2250 = vmatprep.subr.bf16.mxu0 %v3585_v57  ;;  %v3667_v57 = vld [vmem:[%s4954_s2 + $0x550] ss:$24 sps:$4 sm:$0xff]  }
 0x128   :  { %2169 = vmatpush1.bf16.msra.mxu1 %v3580_v58  ;;  %v3672_v58 = vld [vmem:[%s4954_s2 + $0x87c] ss:$24 sps:$4 sm:$0xff]  }
 0x129   :  { %2251 = vmatpush1.bf16.msra.mxu0 %v3583_v52  ;;  %2170 = vmatprep.subr.bf16.mxu1 %v3588_v60  ;;  %v3675_v52 = vld [vmem:[%s4954_s2 + $0x584] ss:$24 sps:$4 sm:$0xff]   ;;  %v3670_v60 = vld [vmem:[%s4954_s2 + $0x878] ss:$24 sps:$4 sm:$0xff]  }
 0x12a   :  { %2252 = vmatprep.subr.bf16.mxu0 %v3591_v61  ;;  %v3673_v61 = vld [vmem:[%s4954_s2 + $0x580] ss:$24 sps:$4 sm:$0xff]  }
 0x12c   :  { %2171 = vmatpush1.bf16.msra.mxu1 %v3586_v62  ;;  %v3678_v62 = vld [vmem:[%s4954_s2 + $0x8ac] ss:$24 sps:$4 sm:$0xff]  }
 0x12d   :  { %2253 = vmatpush1.bf16.msra.mxu0 %v3589_v53  ;;  %2181 = vmatprep.subr.bf16.mxu1 %v3594_v63  ;;  %v3681_v53 = vld [vmem:[%s4954_s2 + $0x5b4] ss:$24 sps:$4 sm:$0xff]   ;;  %v3676_v63 = vld [vmem:[%s4954_s2 + $0x8a8] ss:$24 sps:$4 sm:$0xff]  }
 0x12e   :  { %2263 = vmatprep.subr.bf16.mxu0 %v3597_v0  ;;  %v3679_v0 = vld [vmem:[%s4954_s2 + $0x5b0] ss:$24 sps:$4 sm:$0xff]  }
 0x12f   :  { %2173 = vmatmul.mubr.bf16.vlgmr.msra.gmra.mrb[4].mxu1 %v4097_v39 }
 0x130   :  { %2255 = vmatmul.mubr.bf16.vlgmr.msra.gmra.mrb[4].mxu0 %v4089_v35  ;;  %2182 = vmatpush1.bf16.msra.mxu1 %v3592_v1  ;;  %v3609_v35 = vld [vmem:[%s4954_s2 + $0x374] ss:$24 sps:$4 sm:$0xff]  }
 0x131   :  { %2213 = vmatprep.mubr.bf16.mxu1 %v4123_v54  ;;  %2264 = vmatpush1.bf16.msra.mxu0 %v3595_v2  ;;  %v3684_v1 = vld [vmem:[%s4954_s2 + $0x8dc] ss:$24 sps:$4 sm:$0xff]  }
 0x132   :  { %2295 = vmatprep.mubr.bf16.mxu0 %v4092_v37  ;;  %2183 = vmatprep.subr.bf16.mxu1 %v3600_v31  ;;  %v3612_v37 = vld [vmem:[%s4954_s2 + $0x69c] ss:$24 sps:$4 sm:$0xff]   ;;  %v3682_v31 = vld [vmem:[%s4954_s2 + $0x8d8] ss:$24 sps:$4 sm:$0xff]  }
 0x133   :  { %2265 = vmatprep.subr.bf16.mxu0 %v3603_v4  ;;  %v3687_v2 = vld [vmem:[%s4954_s2 + $0x5e4] ss:$24 sps:$4 sm:$0xff]   ;;  %v3685_v4 = vld [vmem:[%s4954_s2 + $0x5e0] ss:$24 sps:$4 sm:$0xff]  }
 0x134   :  { %2184 = vmatpush1.bf16.msra.mxu1 %v3598_v5  ;;  %v3736_v5 = vld [vmem:[%s4956_s4 + $0x40] sm:$0xff]  }
 0x135   :  { %2266 = vmatpush1.bf16.msra.mxu0 %v3601_v9  ;;  %2185 = vmatprep.subr.bf16.mxu1 %v3606_v10  ;;  %v3690_v9 = vld [vmem:[%s4954_s2 + $0x614] ss:$24 sps:$4 sm:$0xff]   ;;  %v3737_v10 = vld [vmem:[%s4956_s4] sm:$0xff]  }
 0x136   :  { %2267 = vmatprep.subr.bf16.mxu0 %v3609_v35  ;;  %v3688_v35 = vld [vmem:[%s4954_s2 + $0x610] ss:$24 sps:$4 sm:$0xff]  }
 0x138   :  { %2186 = vmatpush1.bf16.msra.mxu1 %v3604_v7  ;;  %v3693_v7 = vld [vmem:[%s4954_s2 + $0x644] ss:$24 sps:$4 sm:$0xff]  }
 0x139   :  { %2268 = vmatpush1.bf16.msra.mxu0 %v3607_v11  ;;  %2187 = vmatprep.subr.bf16.mxu1 %v3612_v37  ;;  %v3738_v11 = vld [vmem:[%s4956_s4 + $0x48] sm:$0xff]  }
 0x13a   :  { %2269 = vmatprep.subr.bf16.mxu0 %v3615_v13  ;;  %v3739_v37 = vld [vmem:[%s4956_s4 + $0x8] sm:$0xff]   ;;  %v3740_v13 = vld [vmem:[%s4956_s4 + $0x50] sm:$0xff]  }
 0x13c   :  { %2188 = vmatpush1.bf16.msra.mxu1 %v3610_v12  ;;  %v3691_v12 = vld [vmem:[%s4954_s2 + $0x640] ss:$24 sps:$4 sm:$0xff]  }
 0x13d   :  { %2270 = vmatpush1.bf16.msra.mxu0 %v3613_v14  ;;  %2189 = vmatprep.subr.bf16.mxu1 %v3618_v15  ;;  %v3741_v14 = vld [vmem:[%s4956_s4 + $0x10] sm:$0xff]   ;;  %v3742_v15 = vld [vmem:[%s4956_s4 + $0x58] sm:$0xff]  }
 0x13e   :  { %2271 = vmatprep.subr.bf16.mxu0 %v3621_v55  ;;  %v3699_v55 = vld [vmem:[%s4954_s2 + $0x6a4] ss:$24 sps:$4 sm:$0xff]  }
 0x140   :  { %2190 = vmatpush1.bf16.msra.mxu1 %v3616_v6  ;;  %v3743_v6 = vld [vmem:[%s4956_s4 + $0x18] sm:$0xff]  }
 0x141   :  { %2272 = vmatpush1.bf16.msra.mxu0 %v3619_v16  ;;  %2191 = vmatprep.subr.bf16.mxu1 %v3624_v17  ;;  %v3697_v16 = vld [vmem:[%s4954_s2 + $0x6a0] ss:$24 sps:$4 sm:$0xff]  }
 0x142   :  { %2273 = vmatprep.subr.bf16.mxu0 %v3627_v18  ;;  %v3744_v17 = vld [vmem:[%s4956_s4 + $0x60] sm:$0xff]   ;;  %v3702_v18 = vld [vmem:[%s4954_s2 + $0x6d4] ss:$24 sps:$4 sm:$0xff]  }
 0x144   :  { %2192 = vmatpush1.bf16.msra.mxu1 %v3622_v19  ;;  %v3745_v19 = vld [vmem:[%s4956_s4 + $0x20] sm:$0xff]  }
 0x145   :  { %2274 = vmatpush1.bf16.msra.mxu0 %v3625_v20  ;;  %2193 = vmatprep.subr.bf16.mxu1 %v3630_v21  ;;  %v3700_v20 = vld [vmem:[%s4954_s2 + $0x6d0] ss:$24 sps:$4 sm:$0xff]  }
 0x146   :  { %2275 = vmatprep.subr.bf16.mxu0 %v3633_v22  ;;  %v3746_v21 = vld [vmem:[%s4956_s4 + $0x68] sm:$0xff]   ;;  %v3705_v22 = vld [vmem:[%s4954_s2 + $0x704] ss:$24 sps:$4 sm:$0xff]  }
 0x148   :  { %2194 = vmatpush1.bf16.msra.mxu1 %v3628_v23  ;;  %v3747_v23 = vld [vmem:[%s4956_s4 + $0x28] sm:$0xff]  }
 0x149   :  { %2276 = vmatpush1.bf16.msra.mxu0 %v3631_v24  ;;  %2195 = vmatprep.subr.bf16.mxu1 %v3636_v26  ;;  %v3703_v24 = vld [vmem:[%s4954_s2 + $0x700] ss:$24 sps:$4 sm:$0xff]   ;;  %v3748_v26 = vld [vmem:[%s4956_s4 + $0x70] sm:$0xff]  }
 0x14a   :  { %2277 = vmatprep.subr.bf16.mxu0 %v3639_v27 }
 0x14c   :  { %2196 = vmatpush1.bf16.msra.mxu1 %v3634_v28  ;;  %v3708_v28 = vld [vmem:[%s4954_s2 + $0x734] ss:$24 sps:$4 sm:$0xff]  }
 0x14d   :  { %2278 = vmatpush1.bf16.msra.mxu0 %v3637_v29  ;;  %2197 = vmatprep.subr.bf16.mxu1 %v3642_v30 }
 0x14e   :  { %2279 = vmatprep.subr.bf16.mxu0 %v3645_v33 }
 0x150   :  { %2198 = vmatpush1.bf16.msra.mxu1 %v3640_v32  ;;  %v3749_v32 = vld [vmem:[%s4956_s4 + $0x30] sm:$0xff]  }
 0x151   :  { %2280 = vmatpush1.bf16.msra.mxu0 %v3643_v34  ;;  %2199 = vmatprep.subr.bf16.mxu1 %v3648_v36  ;;  %v3706_v34 = vld [vmem:[%s4954_s2 + $0x730] ss:$24 sps:$4 sm:$0xff]   ;;  %v3750_v36 = vld [vmem:[%s4956_s4 + $0x78] sm:$0xff]  }
 0x152   :  { %2281 = vmatprep.subr.bf16.mxu0 %v3651_v40  ;;  %v3751_v40 = vld [vmem:[%s4956_s4 + $0x38] sm:$0xff]  }
 0x154   :  { %2200 = vmatpush1.bf16.msra.mxu1 %v3646_v38  ;;  %v3711_v38 = vld [vmem:[%s4954_s2 + $0x764] ss:$24 sps:$4 sm:$0xff]  }
 0x155   :  { %2282 = vmatpush1.bf16.msra.mxu0 %v3649_v41  ;;  %2201 = vmatprep.subr.bf16.mxu1 %v3654_v42  ;;  %v3709_v41 = vld [vmem:[%s4954_s2 + $0x760] ss:$24 sps:$4 sm:$0xff]  }
 0x156   :  { %2283 = vmatprep.subr.bf16.mxu0 %v3657_v43  ;;  %v3752_v42 = vld [vmem:[%s4956_s4 + $0xc0] sm:$0xff]   ;;  %v3714_v43 = vld [vmem:[%s4954_s2 + $0x794] ss:$24 sps:$4 sm:$0xff]  }
 0x158   :  { %2202 = vmatpush1.bf16.msra.mxu1 %v3652_v44  ;;  %v3712_v44 = vld [vmem:[%s4954_s2 + $0x790] ss:$24 sps:$4 sm:$0xff]  }
 0x159   :  { %2284 = vmatpush1.bf16.msra.mxu0 %v3655_v45  ;;  %2203 = vmatprep.subr.bf16.mxu1 %v3660_v46  ;;  %v3717_v45 = vld [vmem:[%s4954_s2 + $0x7c4] ss:$24 sps:$4 sm:$0xff]   ;;  %v3715_v46 = vld [vmem:[%s4954_s2 + $0x7c0] ss:$24 sps:$4 sm:$0xff]  }
 0x15a   :  { %2285 = vmatprep.subr.bf16.mxu0 %v3663_v47  ;;  %v3720_v47 = vld [vmem:[%s4954_s2 + $0x7f4] ss:$24 sps:$4 sm:$0xff]  }
 0x15c   :  { %2204 = vmatpush1.bf16.msra.mxu1 %v3658_v48  ;;  %v3718_v48 = vld [vmem:[%s4954_s2 + $0x7f0] ss:$24 sps:$4 sm:$0xff]  }
 0x15d   :  { %2286 = vmatpush1.bf16.msra.mxu0 %v3661_v49  ;;  %2205 = vmatprep.subr.bf16.mxu1 %v3666_v50  ;;  %v3723_v49 = vld [vmem:[%s4954_s2 + $0x824] ss:$24 sps:$4 sm:$0xff]   ;;  %v3721_v50 = vld [vmem:[%s4954_s2 + $0x820] ss:$24 sps:$4 sm:$0xff]  }
 0x15e   :  { %2287 = vmatprep.subr.bf16.mxu0 %v3669_v51  ;;  %v3726_v51 = vld [vmem:[%s4954_s2 + $0x854] ss:$24 sps:$4 sm:$0xff]  }
 0x160   :  { %2206 = vmatpush1.bf16.msra.mxu1 %v3664_v56  ;;  %v3724_v56 = vld [vmem:[%s4954_s2 + $0x850] ss:$24 sps:$4 sm:$0xff]  }
 0x161   :  { %2288 = vmatpush1.bf16.msra.mxu0 %v3667_v57  ;;  %2207 = vmatprep.subr.bf16.mxu1 %v3672_v58  ;;  %v3729_v57 = vld [vmem:[%s4954_s2 + $0x884] ss:$24 sps:$4 sm:$0xff]   ;;  %v3727_v58 = vld [vmem:[%s4954_s2 + $0x880] ss:$24 sps:$4 sm:$0xff]  }
 0x162   :  { %2289 = vmatprep.subr.bf16.mxu0 %v3675_v52  ;;  %v3732_v52 = vld [vmem:[%s4954_s2 + $0x8b4] ss:$24 sps:$4 sm:$0xff]  }
 0x164   :  { %2208 = vmatpush1.bf16.msra.mxu1 %v3670_v60  ;;  %v3730_v60 = vld [vmem:[%s4954_s2 + $0x8b0] ss:$24 sps:$4 sm:$0xff]  }
 0x165   :  { %2290 = vmatpush1.bf16.msra.mxu0 %v3673_v61  ;;  %2209 = vmatprep.subr.bf16.mxu1 %v3678_v62  ;;  %v3735_v61 = vld [vmem:[%s4954_s2 + $0x8e4] ss:$24 sps:$4 sm:$0xff]   ;;  %v3733_v62 = vld [vmem:[%s4954_s2 + $0x8e0] ss:$24 sps:$4 sm:$0xff]  }
 0x166   :  { %2291 = vmatprep.subr.bf16.mxu0 %v3681_v53  ;;  %v4841_v53 = vld [vmem:[%s4957_s3] sm:$0x3f] }
 0x168   :  { %2210 = vmatpush1.bf16.msra.mxu1 %v3676_v63  ;;  %v460_v63 = vrot.slane %v4841_v53, %v36_v8  ;;  %v3753_v8 = vld [vmem:[%s4956_s4 + $0x80] sm:$0xff]  }
 0x169   :  { %2292 = vmatpush1.bf16.msra.mxu0 %v3679_v0  ;;  %2211 = vmatprep.subr.bf16.mxu1 %v3684_v1  ;;  %v464_v0 = vrot.slane %v4841_v53, %v43_v25  ;;  %v3754_v25 = vld [vmem:[%s4956_s4 + $0xc8] sm:$0xff]  }
 0x16a   :  { %2293 = vmatprep.subr.bf16.mxu0 %v3687_v2 }
 0x16c   :  { %2212 = vmatpush1.bf16.msra.mxu1 %v3682_v31 }
 0x16d   :  { %2294 = vmatpush1.bf16.msra.mxu0 %v3685_v4  ;;  %3210 = vmatprep.subr.bf16.mxu1 %v3736_v5 }
 0x16e   :  { %2304 = vmatprep.subr.bf16.mxu0 %v3690_v9 }
 0x16f   :  { %2214 = vmatmul.mubr.bf16.vlgmr.msra.gmra.mrb[4].mxu1 %v4305_v59 }
 0x170   :  { %2296 = vmatmul.mubr.bf16.vlgmr.msra.gmra.mrb[4].mxu0 %v4097_v39  ;;  %3211 = vmatpush3.bf16.msra.mxu1 %v3737_v10  ;;  %v3696_v39 = vld [vmem:[%s4954_s2 + $0x674] ss:$24 sps:$4 sm:$0xff]  }
 0x171   :  { %2305 = vmatpush1.bf16.msra.mxu0 %v3688_v35  ;;  %2336 = vmatprep.mubr.bf16.mxu0 %v4123_v54  ;;  %v3694_v54 = vld [vmem:[%s4954_s2 + $0x670] ss:$24 sps:$4 sm:$0xff]  }
 0x172   :  { %2306 = vmatprep.subr.bf16.mxu0 %v3693_v7  ;;  %3212 = vmatprep.subr.bf16.mxu1 %v3738_v11 }
 0x174   :  { %3213 = vmatpush3.bf16.msra.mxu1 %v3739_v37 }
 0x175   :  { %2307 = vmatpush1.bf16.msra.mxu0 %v3691_v12  ;;  %3214 = vmatprep.subr.bf16.mxu1 %v3740_v13  ;;  %v3755_v12 = vld [vmem:[%s4956_s4 + $0x88] sm:$0xff]   ;;  %v3756_v13 = vld [vmem:[%s4956_s4 + $0xd0] sm:$0xff]  }
 0x176   :  { %2308 = vmatprep.subr.bf16.mxu0 %v3696_v39  ;;  %v3757_v39 = vld [vmem:[%s4956_s4 + $0x90] sm:$0xff]  }
 0x178   :  { %3215 = vmatpush3.bf16.msra.mxu1 %v3741_v14  ;;  %v3758_v14 = vld [vmem:[%s4956_s4 + $0xd8] sm:$0xff]  }
 0x179   :  { %2309 = vmatpush1.bf16.msra.mxu0 %v3694_v54  ;;  %3216 = vmatprep.subr.bf16.mxu1 %v3742_v15  ;;  %v3759_v54 = vld [vmem:[%s4956_s4 + $0x98] sm:$0xff]   ;;  %v3760_v15 = vld [vmem:[%s4956_s4 + $0xe0] sm:$0xff]  }
 0x17a   :  { %2310 = vmatprep.subr.bf16.mxu0 %v3699_v55  ;;  %v3761_v55 = vld [vmem:[%s4956_s4 + $0xa0] sm:$0xff]  }
 0x17c   :  { %3217 = vmatpush3.bf16.msra.mxu1 %v3743_v6  ;;  %v3762_v6 = vld [vmem:[%s4956_s4 + $0xe8] sm:$0xff]  }
 0x17d   :  { %2311 = vmatpush1.bf16.msra.mxu0 %v3697_v16  ;;  %3218 = vmatprep.subr.bf16.mxu1 %v3744_v17  ;;  %v3763_v16 = vld [vmem:[%s4956_s4 + $0xa8] sm:$0xff]   ;;  %v3764_v17 = vld [vmem:[%s4956_s4 + $0xf0] sm:$0xff]  }
 0x17e   :  { %2312 = vmatprep.subr.bf16.mxu0 %v3702_v18  ;;  %v3765_v18 = vld [vmem:[%s4956_s4 + $0xb0] sm:$0xff]  }
 0x180   :  { %3219 = vmatpush3.bf16.msra.mxu1 %v3745_v19  ;;  %v3766_v19 = vld [vmem:[%s4956_s4 + $0xf8] sm:$0xff]  }
 0x181   :  { %2313 = vmatpush1.bf16.msra.mxu0 %v3700_v20  ;;  %3220 = vmatprep.subr.bf16.mxu1 %v3746_v21  ;;  %v3767_v20 = vld [vmem:[%s4956_s4 + $0xb8] sm:$0xff]   ;;  %v3768_v21 = vld [vmem:[%s4956_s4 + $0x140] sm:$0xff]  }
 0x182   :  { %v2010_v27 = vpop.f32.mrb[0].mxu1  ;;  %2314 = vmatprep.subr.bf16.mxu0 %v3705_v22  ;;  %v467_v22 = vsub.s32 2, %v3835_v3 }
 0x183   :  { %v2012_v29 = vpop.f32.mrb[1].mxu1  ;;  %v2011_v1 = vadd.f32 %v2010_v27, %v460_v63 }
 0x184   :  { %v2014_v30 = vpop.f32.mrb[2].mxu1  ;;  %3221 = vmatpush3.bf16.msra.mxu1 %v3747_v23  ;;  %v2013_v2 = vadd.f32 %v2012_v29, %v464_v0  ;;  %v471_v23 = vsub.s32 3, %v3835_v3 }
 0x185   :  { %2315 = vmatpush1.bf16.msra.mxu0 %v3703_v24  ;;  %v2015_v33 = vpop.f32.mrb[3].mxu1  ;;  %3222 = vmatprep.subr.bf16.mxu1 %v3748_v26  ;;  %v468_v24 = vrot.slane %v4841_v53, %v467_v22 }
 0x186   :  { %2316 = vmatprep.subr.bf16.mxu0 %v3708_v28  ;;  %v472_v26 = vrot.slane %v4841_v53, %v471_v23 }
 0x188   :  { %3223 = vmatpush3.bf16.msra.mxu1 %v3749_v32 }
 0x189   :  { %2317 = vmatpush1.bf16.msra.mxu0 %v3706_v34  ;;  %3224 = vmatprep.subr.bf16.mxu1 %v3750_v36 }
 0x18a   :  { %2318 = vmatprep.subr.bf16.mxu0 %v3711_v38 }
 0x18c   :  { %3225 = vmatpush3.bf16.msra.mxu1 %v3751_v40  ;;  %v3769_v40 = vld [vmem:[%s4956_s4 + $0x100] sm:$0xff]  }
 0x18d   :  { %2319 = vmatpush1.bf16.msra.mxu0 %v3709_v41  ;;  %3232 = vmatprep.subr.bf16.mxu1 %v3752_v42  ;;  %v3770_v42 = vld [vmem:[%s4956_s4 + $0x148] sm:$0xff]  }
 0x18e   :  { %2320 = vmatprep.subr.bf16.mxu0 %v3714_v43  ;;  %v3771_v43 = vld [vmem:[%s4956_s4 + $0x108] sm:$0xff]  }
 0x191   :  { %2321 = vmatpush1.bf16.msra.mxu0 %v3712_v44  ;;  %v3772_v44 = vld [vmem:[%s4956_s4 + $0x150] sm:$0xff]  }
 0x192   :  { %2322 = vmatprep.subr.bf16.mxu0 %v3717_v45  ;;  %v3773_v45 = vld [vmem:[%s4956_s4 + $0x110] sm:$0xff]  }
 0x195   :  { %2323 = vmatpush1.bf16.msra.mxu0 %v3715_v46  ;;  %v3774_v46 = vld [vmem:[%s4956_s4 + $0x158] sm:$0xff]  }
 0x196   :  { %2324 = vmatprep.subr.bf16.mxu0 %v3720_v47  ;;  %v3775_v47 = vld [vmem:[%s4956_s4 + $0x118] sm:$0xff]  }
 0x199   :  { %2325 = vmatpush1.bf16.msra.mxu0 %v3718_v48  ;;  %v3776_v48 = vld [vmem:[%s4956_s4 + $0x160] sm:$0xff]  }
 0x19a   :  { %2326 = vmatprep.subr.bf16.mxu0 %v3723_v49  ;;  %v3777_v49 = vld [vmem:[%s4956_s4 + $0x120] sm:$0xff]  }
 0x19d   :  { %2327 = vmatpush1.bf16.msra.mxu0 %v3721_v50  ;;  %v3778_v50 = vld [vmem:[%s4956_s4 + $0x168] sm:$0xff]  }
 0x19e   :  { %2328 = vmatprep.subr.bf16.mxu0 %v3726_v51  ;;  %v3779_v51 = vld [vmem:[%s4956_s4 + $0x128] sm:$0xff]  }
 0x1a1   :  { %2329 = vmatpush1.bf16.msra.mxu0 %v3724_v56  ;;  %v3780_v56 = vld [vmem:[%s4956_s4 + $0x170] sm:$0xff]  }
 0x1a2   :  { %2330 = vmatprep.subr.bf16.mxu0 %v3729_v57  ;;  %v3781_v57 = vld [vmem:[%s4956_s4 + $0x130] sm:$0xff]  }
 0x1a5   :  { %2331 = vmatpush1.bf16.msra.mxu0 %v3727_v58  ;;  %v3782_v58 = vld [vmem:[%s4956_s4 + $0x178] sm:$0xff]  }
 0x1a6   :  { %2332 = vmatprep.subr.bf16.mxu0 %v3732_v52  ;;  %v3783_v52 = vld [vmem:[%s4956_s4 + $0x138] sm:$0xff]  }
 0x1a9   :  { %2333 = vmatpush1.bf16.msra.mxu0 %v3730_v60  ;;  %v475_v60 = vsub.s32 4, %v3835_v3 }
 0x1aa   :  { %2334 = vmatprep.subr.bf16.mxu0 %v3735_v61  ;;  %v479_v61 = vsub.s32 5, %v3835_v3 }
 0x1ac   :  { %v480_v63 = vrot.slane %v4841_v53, %v479_v61 }
 0x1ad   :  { %2335 = vmatpush1.bf16.msra.mxu0 %v3733_v62  ;;  %v476_v62 = vrot.slane %v4841_v53, %v475_v60 }
 0x1b0   :  { %2337 = vmatmul.mubr.bf16.vlgmr.msra.gmra.mrb[4].mxu0 %v4305_v59 }
 0x1c2   :  { %v2092_v31 = vpop.f32.mrb[0].mxu0 }
 0x1c3   :  { %v3277_v4 = vadd.f32 %v2092_v31, %v2011_v1  ;;  %v2094_v5 = vpop.f32.mrb[1].mxu0 }
 0x1c4   :  { %v3279_v9 = vadd.f32 %v2094_v5, %v2013_v2  ;;  %v2096_v59 = vpop.f32.mrb[2].mxu0 }
 0x1c5   :  { %3788 = vtanh.f32 %v3277_v4  ;;  %v2097_v10 = vpop.f32.mrb[3].mxu0 }
 0x1c6   :  { %3790 = vtanh.f32 %v3279_v9 }
 0x1cf   :  { %v3789_v35 = vpop.eup %3788 }
 0x1d0   :  { %v3791_v7 = vpop.eup %3790  ;;  %v2351_v37 = vpack.c.bf16 %v3789_v35, %v3789_v35 }
 0x1d1   :  { %v2352_v11 = vpack.c.bf16 %v3791_v7, %v3791_v7 }
 0x1d3   :  { %2773 = vmatprep.mubr.bf16.mxu1 %v2352_v11 }
 0x1d4   :  { %2774 = vmatmul.mubr.bf16.vlgmr.msra.gmra.mrb[8].mxu1 %v2351_v37 }
 0x1d5   :  { %3233 = vmatpush3.bf16.msra.mxu1 %v3753_v8 }
 0x1d6   :  { %3234 = vmatprep.subr.bf16.mxu1 %v3754_v25 }
 0x1d9   :  { %3235 = vmatpush3.bf16.msra.mxu1 %v3755_v12 }
 0x1da   :  { %3236 = vmatprep.subr.bf16.mxu1 %v3756_v13 }
 0x1dd   :  { %3237 = vmatpush3.bf16.msra.mxu1 %v3757_v39 }
 0x1de   :  { %3238 = vmatprep.subr.bf16.mxu1 %v3758_v14 }
 0x1e1   :  { %3239 = vmatpush3.bf16.msra.mxu1 %v3759_v54 }
 0x1e2   :  { %3240 = vmatprep.subr.bf16.mxu1 %v3760_v15 }
 0x1e5   :  { %3241 = vmatpush3.bf16.msra.mxu1 %v3761_v55 }
 0x1e6   :  { %3242 = vmatprep.subr.bf16.mxu1 %v3762_v6 }
 0x1e9   :  { %3243 = vmatpush3.bf16.msra.mxu1 %v3763_v16 }
 0x1ea   :  { %3244 = vmatprep.subr.bf16.mxu1 %v3764_v17 }
 0x1ed   :  { %3245 = vmatpush3.bf16.msra.mxu1 %v3765_v18 }
 0x1ee   :  { %3246 = vmatprep.subr.bf16.mxu1 %v3766_v19 }
 0x1f1   :  { %3247 = vmatpush3.bf16.msra.mxu1 %v3767_v20 }
 0x1f2   :  { %3254 = vmatprep.subr.bf16.mxu1 %v3768_v21 }
 0x242   :  { %v2215_v27 = vpop.f32.mrb[4].mxu1 }
 0x243   :  { %v3280_v28 = vadd.f32 %v2215_v27, %v468_v24  ;;  %v2217_v29 = vpop.f32.mrb[5].mxu1 }
 0x244   :  { %v3281_v30 = vadd.f32 %v2217_v29, %v472_v26  ;;  %v2219_v32 = vpop.f32.mrb[6].mxu1 }
 0x245   :  { %3792 = vtanh.f32 %v3280_v28  ;;  %v2220_v33 = vpop.f32.mrb[7].mxu1 }
 0x246   :  { %3794 = vtanh.f32 %v3281_v30 }
 0x24f   :  { %v3793_v34 = vpop.eup %3792 }
 0x250   :  { %v3795_v36 = vpop.eup %3794  ;;  %v2353_v41 = vpack.c.bf16 %v3793_v34, %v3793_v34 }
 0x251   :  { %v2354_v38 = vpack.c.bf16 %v3795_v36, %v3795_v36 }
 0x253   :  { %2813 = vmatprep.mubr.bf16.mxu1 %v2354_v38 }
 0x254   :  { %2814 = vmatmul.mubr.bf16.vlgmr.msra.gmra.mrb[12].mxu1 %v2353_v41 }
 0x255   :  { %3255 = vmatpush3.bf16.msra.mxu1 %v3769_v40 }
 0x256   :  { %3256 = vmatprep.subr.bf16.mxu1 %v3770_v42 }
 0x259   :  { %3257 = vmatpush3.bf16.msra.mxu1 %v3771_v43 }
 0x25a   :  { %3258 = vmatprep.subr.bf16.mxu1 %v3772_v44 }
 0x25d   :  { %3259 = vmatpush3.bf16.msra.mxu1 %v3773_v45 }
 0x25e   :  { %3260 = vmatprep.subr.bf16.mxu1 %v3774_v46 }
 0x261   :  { %3261 = vmatpush3.bf16.msra.mxu1 %v3775_v47 }
 0x262   :  { %3262 = vmatprep.subr.bf16.mxu1 %v3776_v48 }
 0x265   :  { %3263 = vmatpush3.bf16.msra.mxu1 %v3777_v49 }
 0x266   :  { %3264 = vmatprep.subr.bf16.mxu1 %v3778_v50 }
 0x269   :  { %3265 = vmatpush3.bf16.msra.mxu1 %v3779_v51 }
 0x26a   :  { %3266 = vmatprep.subr.bf16.mxu1 %v3780_v56 }
 0x26d   :  { %3267 = vmatpush3.bf16.msra.mxu1 %v3781_v57 }
 0x26e   :  { %3268 = vmatprep.subr.bf16.mxu1 %v3782_v58 }
 0x271   :  { %3269 = vmatpush3.bf16.msra.mxu1 %v3783_v52 }
 0x283   :  { %v2338_v0 = vpop.f32.mrb[4].mxu0 }
 0x284   :  { %v3282_v1 = vadd.f32 %v2338_v0, %v476_v62  ;;  %v2340_v2 = vpop.f32.mrb[5].mxu0 }
 0x285   :  { %v3283_v31 = vadd.f32 %v2340_v2, %v480_v63  ;;  %v2342_v4 = vpop.f32.mrb[6].mxu0 }
 0x286   :  { %3796 = vtanh.f32 %v3282_v1  ;;  %v2343_v5 = vpop.f32.mrb[7].mxu0 }
 0x287   :  { %3798 = vtanh.f32 %v3283_v31 }
 0x290   :  { %v3797_v9 = vpop.eup %3796 }
 0x291   :  { %v3799_v59 = vpop.eup %3798  ;;  %v2355_v35 = vpack.c.bf16 %v3797_v9, %v3797_v9 }
 0x292   :  { %v2356_v10 = vpack.c.bf16 %v3799_v59, %v3799_v59 }
 0x294   :  { %2853 = vmatprep.mubr.bf16.mxu1 %v2356_v10 }
 0x295   :  { %2854 = vmatmul.mubr.bf16.vlgmr.msra.gmra.mrb[16].mxu1 %v2355_v35 }
 0x2a7   :  { %v3226_v7 = vpop.f32.mrb[8].mxu1 }
 0x2a8   :  { %v3227_v3 = vpop.f32.mrb[9].mxu1 }
 0x2a9   :  { %v3228_v11 = vadd.f32 %v3227_v3, %v3226_v7  ;;  %v3229_v8 = vpop.f32.mrb[10].mxu1 }
 0x2aa   :  { %v3230_v37 = vpop.f32.mrb[11].mxu1 }
 0x327   :  { %v3248_v53 = vpop.f32.mrb[12].mxu1 }
 0x328   :  { %v3249_v25 = vpop.f32.mrb[13].mxu1 }
 0x329   :  { %v3250_v12 = vadd.f32 %v3249_v25, %v3248_v53  ;;  %v3251_v13 = vpop.f32.mrb[14].mxu1 }
 0x32a   :  { %v3252_v39 = vpop.f32.mrb[15].mxu1 }
 0x32b   :  { %v2816_v14 = vadd.f32 %v3250_v12, %v3228_v11 }
 0x368   :  { %v3270_v54 = vpop.f32.mrb[16].mxu1 }
 0x369   :  { %v3271_v15 = vpop.f32.mrb[17].mxu1 }
 0x36a   :  { %v3272_v55 = vadd.f32 %v3271_v15, %v3270_v54  ;;  %v3273_v6 = vpop.f32.mrb[18].mxu1 }
 0x36b   :  { %v3274_v16 = vpop.f32.mrb[19].mxu1 }
 0x36c   :  { %v2856_v17 = vadd.f32 %v3272_v55, %v2816_v14 }
 0x36e   :  { %v2861_v18 = vmul.f32 %v2856_v17, %v2856_v17 }
 0x370   :  { %v2863_v19 = vsel %vm2862_vm2, %v2861_v18, 0.0 }
 0x371   :  { %2864 = vadd.xlane.f32.xlu1 %v2863_v19 }
 0x3fe   :  { %v2865_v20 = vpop.xlane.xlu1 %2864 }
 0x3ff   :  { %v2866_v21 = vadd.f32 1e-12, %v2865_v20 }
 0x401   :  { %3800 = vrsqrt.f32 %v2866_v21 }
 0x40b   :  { %v3801_v22 = vpop.eup %3800 }
 0x40c   :  { %v2868_v23 = vmul.f32 %v3801_v22, %v2856_v17 }
 0x40e   :  { %2869 = vst.msk [vmem:[%s4958_s5] sm:$0x3] %vm2862_vm2, %v2868_v23 }

</bundles_post_ra>
